<compile_context>
chip_gen: v7x
topology: tpu7x:2x2x1
jax: 0.10.0
libtpu: 0.0.40
codegen_flags: <defaults>
</compile_context>

<pallas_src>
import functools

import jax
import jax.numpy as jnp
import numpy as np
from jax.experimental import pallas as pl
from jax.experimental.pallas import tpu as pltpu


# --------------------------- fused Pallas kernel (whole bottleneck) ---------------------------

def _bottleneck_kernel(x_ref, w1_ref, b1_ref, w2_ref, b2_ref, w3_ref, b3_ref,
                       o_ref, h1pad_ref, *, H, W, dil, interior):
    """One image per grid step.  x_ref: (1, H*W, Cin) bf16; o_ref: (1, H*W, Cin) bf16."""
    HW = H * W
    planes = b1_ref.shape[-1]

    # ---- stage 1: 1x1 conv (BN1 scale folded into w1) + shift + ReLU --------------------
    h1 = jnp.dot(x_ref[0], w1_ref[...], preferred_element_type=jnp.float32)
    h1b = jnp.maximum(h1 + b1_ref[...], 0.0).astype(jnp.bfloat16)     # (HW, planes) bf16

    # ---- stage 2: 3x3 dilated conv, fully in VMEM ----------------------------------------
    # Zero only the two border slabs actually read (dil*W rows each).  Done every step so
    # correctness does not depend on which core/grid-offset runs a given image.
    zslab = jnp.zeros((dil * W, planes), h1pad_ref.dtype)
    h1pad_ref[interior - dil * W:interior, :] = zslab
    h1pad_ref[interior + HW:interior + HW + dil * W, :] = zslab
    # Aligned interior store of the bf16 stage-1 output.
    h1pad_ref[interior:interior + HW, :] = h1b

    # Column-direction validity masks (mask out the W wrap-around of the flattened layout).
    w_col = jax.lax.broadcasted_iota(jnp.int32, (HW, 1), 0) % W
    mask_l = w_col >= dil            # tap at column c - dil is valid
    mask_r = w_col < (W - dil)       # tap at column c + dil is valid
    zrows = jnp.zeros((dil, planes), jnp.bfloat16)

    def packed_taps(row):
        """row: (HW, planes) bf16 -> (HW, 3*planes) [c-dil | c | c+dil] taps, masked."""
        left = jnp.concatenate([zrows, row[:HW - dil, :]], axis=0)    # value sublane shift
        right = jnp.concatenate([row[dil:, :], zrows], axis=0)
        left = jnp.where(mask_l, left, jnp.zeros_like(left))
        right = jnp.where(mask_r, right, jnp.zeros_like(right))
        return jnp.concatenate([left, row, right], axis=1)

    # kh = 1 (centre row): use the in-register h1 directly (no scratch reload).
    acc = jnp.dot(packed_taps(h1b), w2_ref[1], preferred_element_type=jnp.float32)
    # kh = 0 / kh = 2: one aligned bf16 scratch read each (zero border handles H edges).
    row_top = h1pad_ref[interior - dil * W:interior - dil * W + HW, :]
    acc = acc + jnp.dot(packed_taps(row_top), w2_ref[0], preferred_element_type=jnp.float32)
    row_bot = h1pad_ref[interior + dil * W:interior + dil * W + HW, :]
    acc = acc + jnp.dot(packed_taps(row_bot), w2_ref[2], preferred_element_type=jnp.float32)

    h2 = jnp.maximum(acc + b2_ref[...], 0.0).astype(jnp.bfloat16)     # (HW, planes) bf16

    # ---- stage 3: 1x1 conv + shift + residual + ReLU ------------------------------------
    h3 = jnp.dot(h2, w3_ref[...], preferred_element_type=jnp.float32)
    # Residual re-read at point of use (keeps the (HW, Cin) input out of live registers
    # across both matmul stages).
    h3 = h3 + b3_ref[...] + x_ref[0].astype(jnp.float32)
    o_ref[0] = jnp.maximum(h3, 0.0).astype(o_ref.dtype)


# --------------------------- wrapper ---------------------------

def bottleneck_forward(x, p, dilation=1):
    """x: (N, Cin, H, W) float32; downsample=None path => requires Cin == planes*4, stride==1."""
    n, cin, h, w = x.shape
    planes = p["b1"].shape[-1]
    assert cin == planes * 4, "downsample=None requires inplanes == planes * expansion"
    assert dilation in (1, 2, 4), "module padding rule only matches dilation in {1,2,4}"
    hw = h * w

    # External layout is NCHW (PyTorch contract) -> one boundary transpose to (N, H*W, C).
    x2d = jnp.transpose(x, (0, 2, 3, 1)).reshape(n, hw, cin).astype(jnp.bfloat16)

    # Padded-scratch geometry: `interior` (multiple of 8, >= dil*W) rows of top border,
    # HW interior rows, `interior` rows of bottom border.
    interior = -(-dilation * w // 8) * 8
    pad_rows = 2 * interior + hw

    # VMEM budget computed from the actual blocks (x / out double-buffered, weights,
    # bf16 scratch), with 2x headroom; capped at 64 MiB so it is valid on every generation.
    bpe = 2  # bf16
    need = (2 * hw * cin * bpe                                  # x block
            + 2 * hw * cin * bpe                                # out block
            + 2 * (cin * planes + 9 * planes * planes + planes * cin) * bpe   # weights
            + 2 * (2 * planes + cin) * 4                        # f32 shifts
            + pad_rows * planes * bpe)                          # scratch
    vmem_limit = int(min(64 * 1024 * 1024, max(32 * 1024 * 1024, 2 * need)))

    out = pl.pallas_call(
        functools.partial(_bottleneck_kernel, H=h, W=w, dil=dilation, interior=interior),
        out_shape=jax.ShapeDtypeStruct((n, hw, cin), jnp.bfloat16),
        grid=(n,),
        in_specs=[
            pl.BlockSpec((1, hw, cin), lambda b: (b, 0, 0)),            # x / residual
            pl.BlockSpec((cin, planes), lambda b: (0, 0)),              # w1 (BN1 scale folded)
            pl.BlockSpec((1, planes), lambda b: (0, 0)),                # shift1
            pl.BlockSpec((3, 3 * planes, planes), lambda b: (0, 0, 0)), # w2, per-kh packed K taps
            pl.BlockSpec((1, planes), lambda b: (0, 0)),                # shift2
            pl.BlockSpec((planes, cin), lambda b: (0, 0)),              # w3 (BN3 scale folded)
            pl.BlockSpec((1, cin), lambda b: (0, 0)),                   # shift3
        ],
        out_specs=pl.BlockSpec((1, hw, cin), lambda b: (b, 0, 0)),
        scratch_shapes=[pltpu.VMEM((pad_rows, planes), jnp.bfloat16)],
        compiler_params=pltpu.CompilerParams(
            dimension_semantics=("parallel",),       # images split across TCs on megacore parts
            vmem_limit_bytes=vmem_limit,
        ),
    )(x2d, p["w1e"], p["b1"], p["w2e"], p["b2"], p["w3e"], p["b3"])

    # Keep the module's NCHW float32 contract (chained blocks should skip this, see TODO).
    return jnp.transpose(out.reshape(n, h, w, cin), (0, 3, 1, 2)).astype(jnp.float32)


# --------------------------- deterministic parameter init ---------------------------

def init_params(key, inplanes, planes, eps=1e-5):
    ks = jax.random.split(key, 15)
    w1 = jax.random.normal(ks[0], (planes, inplanes, 1, 1), jnp.float32) * 0.1
    w2 = jax.random.normal(ks[1], (planes, planes, 3, 3), jnp.float32) * 0.1
    w3 = jax.random.normal(ks[2], (planes * 4, planes, 1, 1), jnp.float32) * 0.1

    def bn(kg, kb, km, kv, c):
        gamma = jax.random.uniform(kg, (c,), jnp.float32, 0.5, 1.5)
        beta = jax.random.normal(kb, (c,), jnp.float32) * 0.1
        mean = jax.random.normal(km, (c,), jnp.float32) * 0.1
        var = jax.random.uniform(kv, (c,), jnp.float32, 0.5, 1.5)
        scale = gamma / jnp.sqrt(var + eps)
        shift = beta - mean * scale
        return scale, shift

    scale1, shift1 = bn(ks[3], ks[4], ks[5], ks[6], planes)
    scale2, shift2 = bn(ks[7], ks[8], ks[9], ks[10], planes)
    scale3, shift3 = bn(ks[11], ks[12], ks[13], ks[14], planes * 4)

    w1m = w1[:, :, 0, 0].T                                               # (Cin, planes)
    # (O, I, KH, KW) -> (KH, KW, I, O) -> (KH, KW*I, O): per-kh the K axis is [kw0|kw1|kw2] taps.
    w2m = jnp.transpose(w2, (2, 3, 1, 0)).reshape(3, 3 * planes, planes)
    w3m = w3[:, :, 0, 0].T                                               # (planes, 4*planes)

    return {
        # raw (OIHW) weights + BN for the reference
        "w1": w1, "w2": w2, "w3": w3,
        "scale1": scale1, "shift1": shift1,
        "scale2": scale2, "shift2": shift2,
        "scale3": scale3, "shift3": shift3,
        # kernel operands: BN scale folded into weight output columns, cast to bf16 once
        "w1e": (w1m * scale1[None, :]).astype(jnp.bfloat16),
        "w2e": (w2m * scale2[None, None, :]).astype(jnp.bfloat16),
        "w3e": (w3m * scale3[None, :]).astype(jnp.bfloat16),
        "b1": shift1.reshape(1, planes).astype(jnp.float32),
        "b2": shift2.reshape(1, planes).astype(jnp.float32),
        "b3": shift3.reshape(1, planes * 4).astype(jnp.float32),
    }


# --------------------------- plain-JAX reference for verification ---------------------------

def reference_forward(x, p, dilation=1):
    def conv(x, w, dil=1, pad=0):
        return jax.lax.conv_general_dilated(
            x, w, window_strides=(1, 1),
            padding=[(pad, pad), (pad, pad)],
            rhs_dilation=(dil, dil),
            dimension_numbers=("NCHW", "OIHW", "NCHW"),
            precision=jax.lax.Precision.HIGHEST)

    def bn(x, s, b):
        return x * s[None, :, None, None] + b[None, :, None, None]

    out = jnp.maximum(bn(conv(x, p["w1"]), p["scale1"], p["shift1"]), 0.0)
    pad = {1: 1, 2: 2, 4: 4}.get(dilation, 1)
    out = jnp.maximum(bn(conv(out, p["w2"], dil=dilation, pad=pad), p["scale2"], p["shift2"]), 0.0)
    out = bn(conv(out, p["w3"]), p["scale3"], p["shift3"])
    out = out + x  # downsample is None
    return jnp.maximum(out, 0.0)


if __name__ == "__main__":
    # Small shapes: planes=4, inplanes=planes*expansion=16 (so downsample=None works), stride=1.
    batch, planes, H, W = 2, 4, 16, 16
    inplanes = planes * 4
    dilation = 1

    key = jax.random.PRNGKey(0)
    kx, kp = jax.random.split(key)
    x = jax.random.normal(kx, (batch, inplanes, H, W), jnp.float32)
    params = init_params(kp, inplanes, planes)

    out = jax.block_until_ready(bottleneck_forward(x, params, dilation=dilation))
    ref = jax.block_until_ready(reference_forward(x, params, dilation=dilation))

    assert out.shape == (batch, inplanes, H, W), out.shape
    np.testing.assert_allclose(np.asarray(out), np.asarray(ref), rtol=2e-2, atol=2e-2)
    print("KERNEL_OK")
</pallas_src>

<mosaic_0001>
module attributes {stable_mosaic.version = 11 : i64} {
  func.func @_bottleneck_kernel(%arg0: i32, %arg1: memref<1x256x16xbf16, #tpu.memory_space<vmem>>, %arg2: memref<16x4xbf16, #tpu.memory_space<vmem>>, %arg3: memref<1x4xf32, #tpu.memory_space<vmem>>, %arg4: memref<3x12x4xbf16, #tpu.memory_space<vmem>>, %arg5: memref<1x4xf32, #tpu.memory_space<vmem>>, %arg6: memref<4x16xbf16, #tpu.memory_space<vmem>>, %arg7: memref<1x16xf32, #tpu.memory_space<vmem>>, %arg8: memref<1x256x16xbf16, #tpu.memory_space<vmem>>, %arg9: memref<288x4xbf16, #tpu.memory_space<vmem>>) attributes {dimension_semantics = [#tpu.dimension_semantics<parallel>], iteration_bounds = array<i64: 2>, scalar_prefetch = 0 : i64, scratch_operands = 1 : i64, tpu.core_type = #tpu.core_type<tc>, window_params = [{transform_indices = @transform_0, window_bounds = array<i64: 1, 256, 16>}, {pipeline_mode = #tpu.pipeline_mode<synchronous>, transform_indices = @transform_1, window_bounds = array<i64: 16, 4>}, {pipeline_mode = #tpu.pipeline_mode<synchronous>, transform_indices = @transform_2, window_bounds = array<i64: 1, 4>}, {pipeline_mode = #tpu.pipeline_mode<synchronous>, transform_indices = @transform_3, window_bounds = array<i64: 3, 12, 4>}, {pipeline_mode = #tpu.pipeline_mode<synchronous>, transform_indices = @transform_4, window_bounds = array<i64: 1, 4>}, {pipeline_mode = #tpu.pipeline_mode<synchronous>, transform_indices = @transform_5, window_bounds = array<i64: 4, 16>}, {pipeline_mode = #tpu.pipeline_mode<synchronous>, transform_indices = @transform_6, window_bounds = array<i64: 1, 16>}, {transform_indices = @transform_7, window_bounds = array<i64: 1, 256, 16>}]} {
    %c0 = arith.constant 0 : index
    %c0_0 = arith.constant 0 : index
    %c0_1 = arith.constant 0 : index
    %0 = vector.load %arg1[%c0, %c0_0, %c0_1] : memref<1x256x16xbf16, #tpu.memory_space<vmem>>, vector<1x256x16xbf16>
    %1 = vector.shape_cast %0 : vector<1x256x16xbf16> to vector<256x16xbf16>
    %c0_2 = arith.constant 0 : index
    %c0_3 = arith.constant 0 : index
    %2 = vector.load %arg2[%c0_2, %c0_3] : memref<16x4xbf16, #tpu.memory_space<vmem>>, vector<16x4xbf16>
    %cst = arith.constant dense<0.000000e+00> : vector<256x4xf32>
    %3 = tpu.matmul %1, %2, %cst {dimension_numbers = #tpu.dot_dimension_numbers<[1], [0], [0], [1], [0, 0, 1, 1], [], []>} : vector<256x16xbf16>, vector<16x4xbf16>, vector<256x4xf32> -> vector<256x4xf32>
    %c0_4 = arith.constant 0 : index
    %c0_5 = arith.constant 0 : index
    %4 = vector.load %arg3[%c0_4, %c0_5] : memref<1x4xf32, #tpu.memory_space<vmem>>, vector<1x4xf32>
    %5 = vector.broadcast %4 : vector<1x4xf32> to vector<256x4xf32>
    %6 = arith.addf %3, %5 : vector<256x4xf32>
    %cst_6 = arith.constant 0.000000e+00 : f32
    %7 = vector.broadcast %cst_6 : f32 to vector<256x4xf32>
    %8 = arith.maximumf %6, %7 : vector<256x4xf32>
    %9 = arith.truncf %8 : vector<256x4xf32> to vector<256x4xbf16>
    %cst_7 = arith.constant 0.000000e+00 : bf16
    %10 = vector.broadcast %cst_7 : bf16 to vector<16x4xbf16>
    %c0_8 = arith.constant 0 : index
    %c0_9 = arith.constant 0 : index
    %11 = vector.load %arg9[%c0_8, %c0_9] : memref<288x4xbf16, #tpu.memory_space<vmem>>, vector<16x4xbf16>
    tpu.vector_store %arg9[%c0_8, %c0_9], %10 {strides = array<i32>} : memref<288x4xbf16, #tpu.memory_space<vmem>>, vector<16x4xbf16>,
    %c272 = arith.constant 272 : index
    %c0_10 = arith.constant 0 : index
    %12 = vector.load %arg9[%c272, %c0_10] : memref<288x4xbf16, #tpu.memory_space<vmem>>, vector<16x4xbf16>
    tpu.vector_store %arg9[%c272, %c0_10], %10 {strides = array<i32>} : memref<288x4xbf16, #tpu.memory_space<vmem>>, vector<16x4xbf16>,
    %c16 = arith.constant 16 : index
    %c0_11 = arith.constant 0 : index
    %13 = vector.load %arg9[%c16, %c0_11] : memref<288x4xbf16, #tpu.memory_space<vmem>>, vector<256x4xbf16>
    tpu.vector_store %arg9[%c16, %c0_11], %9 {strides = array<i32>} : memref<288x4xbf16, #tpu.memory_space<vmem>>, vector<256x4xbf16>,
    %14 = tpu.iota {dimensions = array<i32: 0>} : vector<256x1xi32>
    %c16_i32 = arith.constant 16 : i32
    %c0_i32 = arith.constant 0 : i32
    %15 = arith.cmpi eq, %c16_i32, %c0_i32 : i32
    %c1_i32 = arith.constant 1 : i32
    %16 = arith.select %15, %c1_i32, %c16_i32 : i32
    %17 = vector.broadcast %16 : i32 to vector<256x1xi32>
    %18 = arith.remsi %14, %17 : vector<256x1xi32>
    %c0_i32_12 = arith.constant 0 : i32
    %19 = vector.broadcast %c0_i32_12 : i32 to vector<256x1xi32>
    %20 = arith.cmpi ne, %18, %19 : vector<256x1xi32>
    %c0_i32_13 = arith.constant 0 : i32
    %21 = vector.broadcast %c0_i32_13 : i32 to vector<256x1xi32>
    %22 = arith.cmpi slt, %18, %21 : vector<256x1xi32>
    %c0_i32_14 = arith.constant 0 : i32
    %23 = arith.cmpi slt, %16, %c0_i32_14 : i32
    %24 = vector.broadcast %23 : i1 to vector<256x1xi1>
    %25 = vector.broadcast %24 : vector<256x1xi1> to vector<256x1xi1>
    %26 = arith.xori %22, %25 : vector<256x1xi1>
    %27 = arith.andi %26, %20 : vector<256x1xi1>
    %28 = vector.broadcast %16 : i32 to vector<256x1xi32>
    %29 = arith.addi %18, %28 : vector<256x1xi32>
    %30 = arith.select %27, %29, %18 : vector<256x1xi1>, vector<256x1xi32>
    %c1_i32_15 = arith.constant 1 : i32
    %31 = vector.broadcast %c1_i32_15 : i32 to vector<256x1xi32>
    %32 = arith.cmpi sge, %30, %31 : vector<256x1xi32>
    %c15_i32 = arith.constant 15 : i32
    %33 = vector.broadcast %c15_i32 : i32 to vector<256x1xi32>
    %34 = arith.cmpi slt, %30, %33 : vector<256x1xi32>
    %cst_16 = arith.constant 0.000000e+00 : bf16
    %35 = vector.broadcast %cst_16 : bf16 to vector<1x4xbf16>
    %36 = vector.extract_strided_slice %9 {offsets = [0, 0], sizes = [255, 4], strides = [1, 1]} : vector<256x4xbf16> to vector<255x4xbf16>
    %37 = tpu.concatenate %35, %36 in 0 : vector<1x4xbf16>, vector<255x4xbf16> -> vector<256x4xbf16>
    %38 = vector.extract_strided_slice %9 {offsets = [1, 0], sizes = [255, 4], strides = [1, 1]} : vector<256x4xbf16> to vector<255x4xbf16>
    %39 = tpu.concatenate %38, %35 in 0 : vector<255x4xbf16>, vector<1x4xbf16> -> vector<256x4xbf16>
    %cst_17 = arith.constant 0.000000e+00 : bf16
    %40 = vector.broadcast %cst_17 : bf16 to vector<256x4xbf16>
    %41 = vector.shape_cast %32 : vector<256x1xi1> to vector<256x1xi1>
    %42 = vector.broadcast %41 : vector<256x1xi1> to vector<256x4xi1>
    %43 = arith.select %42, %37, %40 : vector<256x4xi1>, vector<256x4xbf16>
    %cst_18 = arith.constant 0.000000e+00 : bf16
    %44 = vector.broadcast %cst_18 : bf16 to vector<256x4xbf16>
    %45 = vector.shape_cast %34 : vector<256x1xi1> to vector<256x1xi1>
    %46 = vector.broadcast %45 : vector<256x1xi1> to vector<256x4xi1>
    %47 = arith.select %46, %39, %44 : vector<256x4xi1>, vector<256x4xbf16>
    %48 = tpu.concatenate %43, %9, %47 in 1 : vector<256x4xbf16>, vector<256x4xbf16>, vector<256x4xbf16> -> vector<256x12xbf16>
    %c1 = arith.constant 1 : index
    %c0_19 = arith.constant 0 : index
    %c0_20 = arith.constant 0 : index
    %49 = vector.load %arg4[%c1, %c0_19, %c0_20] : memref<3x12x4xbf16, #tpu.memory_space<vmem>>, vector<1x12x4xbf16>
    %50 = vector.shape_cast %49 : vector<1x12x4xbf16> to vector<12x4xbf16>
    %cst_21 = arith.constant dense<0.000000e+00> : vector<256x4xf32>
    %51 = tpu.matmul %48, %50, %cst_21 {dimension_numbers = #tpu.dot_dimension_numbers<[1], [0], [0], [1], [0, 0, 1, 1], [], []>} : vector<256x12xbf16>, vector<12x4xbf16>, vector<256x4xf32> -> vector<256x4xf32>
    %c0_22 = arith.constant 0 : index
    %c0_23 = arith.constant 0 : index
    %52 = vector.load %arg9[%c0_22, %c0_23] : memref<288x4xbf16, #tpu.memory_space<vmem>>, vector<256x4xbf16>
    %53 = vector.extract_strided_slice %52 {offsets = [0, 0], sizes = [255, 4], strides = [1, 1]} : vector<256x4xbf16> to vector<255x4xbf16>
    %54 = tpu.concatenate %35, %53 in 0 : vector<1x4xbf16>, vector<255x4xbf16> -> vector<256x4xbf16>
    %55 = vector.extract_strided_slice %52 {offsets = [1, 0], sizes = [255, 4], strides = [1, 1]} : vector<256x4xbf16> to vector<255x4xbf16>
    %56 = tpu.concatenate %55, %35 in 0 : vector<255x4xbf16>, vector<1x4xbf16> -> vector<256x4xbf16>
    %cst_24 = arith.constant 0.000000e+00 : bf16
    %57 = vector.broadcast %cst_24 : bf16 to vector<256x4xbf16>
    %58 = vector.shape_cast %32 : vector<256x1xi1> to vector<256x1xi1>
    %59 = vector.broadcast %58 : vector<256x1xi1> to vector<256x4xi1>
    %60 = arith.select %59, %54, %57 : vector<256x4xi1>, vector<256x4xbf16>
    %cst_25 = arith.constant 0.000000e+00 : bf16
    %61 = vector.broadcast %cst_25 : bf16 to vector<256x4xbf16>
    %62 = vector.shape_cast %34 : vector<256x1xi1> to vector<256x1xi1>
    %63 = vector.broadcast %62 : vector<256x1xi1> to vector<256x4xi1>
    %64 = arith.select %63, %56, %61 : vector<256x4xi1>, vector<256x4xbf16>
    %65 = tpu.concatenate %60, %52, %64 in 1 : vector<256x4xbf16>, vector<256x4xbf16>, vector<256x4xbf16> -> vector<256x12xbf16>
    %c0_26 = arith.constant 0 : index
    %c0_27 = arith.constant 0 : index
    %c0_28 = arith.constant 0 : index
    %66 = vector.load %arg4[%c0_26, %c0_27, %c0_28] : memref<3x12x4xbf16, #tpu.memory_space<vmem>>, vector<1x12x4xbf16>
    %67 = vector.shape_cast %66 : vector<1x12x4xbf16> to vector<12x4xbf16>
    %cst_29 = arith.constant dense<0.000000e+00> : vector<256x4xf32>
    %68 = tpu.matmul %65, %67, %cst_29 {dimension_numbers = #tpu.dot_dimension_numbers<[1], [0], [0], [1], [0, 0, 1, 1], [], []>} : vector<256x12xbf16>, vector<12x4xbf16>, vector<256x4xf32> -> vector<256x4xf32>
    %69 = arith.addf %51, %68 : vector<256x4xf32>
    %c32 = arith.constant 32 : index
    %c0_30 = arith.constant 0 : index
    %70 = vector.load %arg9[%c32, %c0_30] : memref<288x4xbf16, #tpu.memory_space<vmem>>, vector<256x4xbf16>
    %71 = vector.extract_strided_slice %70 {offsets = [0, 0], sizes = [255, 4], strides = [1, 1]} : vector<256x4xbf16> to vector<255x4xbf16>
    %72 = tpu.concatenate %35, %71 in 0 : vector<1x4xbf16>, vector<255x4xbf16> -> vector<256x4xbf16>
    %73 = vector.extract_strided_slice %70 {offsets = [1, 0], sizes = [255, 4], strides = [1, 1]} : vector<256x4xbf16> to vector<255x4xbf16>
    %74 = tpu.concatenate %73, %35 in 0 : vector<255x4xbf16>, vector<1x4xbf16> -> vector<256x4xbf16>
    %cst_31 = arith.constant 0.000000e+00 : bf16
    %75 = vector.broadcast %cst_31 : bf16 to vector<256x4xbf16>
    %76 = vector.shape_cast %32 : vector<256x1xi1> to vector<256x1xi1>
    %77 = vector.broadcast %76 : vector<256x1xi1> to vector<256x4xi1>
    %78 = arith.select %77, %72, %75 : vector<256x4xi1>, vector<256x4xbf16>
    %cst_32 = arith.constant 0.000000e+00 : bf16
    %79 = vector.broadcast %cst_32 : bf16 to vector<256x4xbf16>
    %80 = vector.shape_cast %34 : vector<256x1xi1> to vector<256x1xi1>
    %81 = vector.broadcast %80 : vector<256x1xi1> to vector<256x4xi1>
    %82 = arith.select %81, %74, %79 : vector<256x4xi1>, vector<256x4xbf16>
    %83 = tpu.concatenate %78, %70, %82 in 1 : vector<256x4xbf16>, vector<256x4xbf16>, vector<256x4xbf16> -> vector<256x12xbf16>
    %c2 = arith.constant 2 : index
    %c0_33 = arith.constant 0 : index
    %c0_34 = arith.constant 0 : index
    %84 = vector.load %arg4[%c2, %c0_33, %c0_34] : memref<3x12x4xbf16, #tpu.memory_space<vmem>>, vector<1x12x4xbf16>
    %85 = vector.shape_cast %84 : vector<1x12x4xbf16> to vector<12x4xbf16>
    %cst_35 = arith.constant dense<0.000000e+00> : vector<256x4xf32>
    %86 = tpu.matmul %83, %85, %cst_35 {dimension_numbers = #tpu.dot_dimension_numbers<[1], [0], [0], [1], [0, 0, 1, 1], [], []>} : vector<256x12xbf16>, vector<12x4xbf16>, vector<256x4xf32> -> vector<256x4xf32>
    %87 = arith.addf %69, %86 : vector<256x4xf32>
    %c0_36 = arith.constant 0 : index
    %c0_37 = arith.constant 0 : index
    %88 = vector.load %arg5[%c0_36, %c0_37] : memref<1x4xf32, #tpu.memory_space<vmem>>, vector<1x4xf32>
    %89 = vector.broadcast %88 : vector<1x4xf32> to vector<256x4xf32>
    %90 = arith.addf %87, %89 : vector<256x4xf32>
    %cst_38 = arith.constant 0.000000e+00 : f32
    %91 = vector.broadcast %cst_38 : f32 to vector<256x4xf32>
    %92 = arith.maximumf %90, %91 : vector<256x4xf32>
    %93 = arith.truncf %92 : vector<256x4xf32> to vector<256x4xbf16>
    %c0_39 = arith.constant 0 : index
    %c0_40 = arith.constant 0 : index
    %94 = vector.load %arg6[%c0_39, %c0_40] : memref<4x16xbf16, #tpu.memory_space<vmem>>, vector<4x16xbf16>
    %cst_41 = arith.constant dense<0.000000e+00> : vector<256x16xf32>
    %95 = tpu.matmul %93, %94, %cst_41 {dimension_numbers = #tpu.dot_dimension_numbers<[1], [0], [0], [1], [0, 0, 1, 1], [], []>} : vector<256x4xbf16>, vector<4x16xbf16>, vector<256x16xf32> -> vector<256x16xf32>
    %c0_42 = arith.constant 0 : index
    %c0_43 = arith.constant 0 : index
    %96 = vector.load %arg7[%c0_42, %c0_43] : memref<1x16xf32, #tpu.memory_space<vmem>>, vector<1x16xf32>
    %97 = vector.broadcast %96 : vector<1x16xf32> to vector<256x16xf32>
    %98 = arith.addf %95, %97 : vector<256x16xf32>
    %c0_44 = arith.constant 0 : index
    %c0_45 = arith.constant 0 : index
    %c0_46 = arith.constant 0 : index
    %99 = vector.load %arg1[%c0_44, %c0_45, %c0_46] : memref<1x256x16xbf16, #tpu.memory_space<vmem>>, vector<1x256x16xbf16>
    %100 = vector.shape_cast %99 : vector<1x256x16xbf16> to vector<256x16xbf16>
    %101 = arith.extf %100 : vector<256x16xbf16> to vector<256x16xf32>
    %102 = arith.addf %98, %101 : vector<256x16xf32>
    %cst_47 = arith.constant 0.000000e+00 : f32
    %103 = vector.broadcast %cst_47 : f32 to vector<256x16xf32>
    %104 = arith.maximumf %102, %103 : vector<256x16xf32>
    %105 = arith.truncf %104 : vector<256x16xf32> to vector<256x16xbf16>
    %c0_48 = arith.constant 0 : index
    %c0_49 = arith.constant 0 : index
    %c0_50 = arith.constant 0 : index
    %106 = vector.load %arg8[%c0_48, %c0_49, %c0_50] : memref<1x256x16xbf16, #tpu.memory_space<vmem>>, vector<1x256x16xbf16>
    %107 = vector.shape_cast %106 : vector<1x256x16xbf16> to vector<256x16xbf16>
    %108 = vector.shape_cast %105 : vector<256x16xbf16> to vector<1x256x16xbf16>
    tpu.vector_store %arg8[%c0_48, %c0_49, %c0_50], %108 {strides = array<i32>} : memref<1x256x16xbf16, #tpu.memory_space<vmem>>, vector<1x256x16xbf16>,
    return
  }
  func.func @transform_0(%arg0: i32) -> (i32, i32, i32) {
    %c0_i32 = arith.constant 0 : i32
    %c0_i32_0 = arith.constant 0 : i32
    %c0_i32_1 = arith.constant 0 : i32
    return %arg0, %c0_i32, %c0_i32_0 : i32, i32, i32
  }
  func.func @transform_1(%arg0: i32) -> (i32, i32) {
    %c0_i32 = arith.constant 0 : i32
    %c0_i32_0 = arith.constant 0 : i32
    %c0_i32_1 = arith.constant 0 : i32
    return %c0_i32, %c0_i32_0 : i32, i32
  }
  func.func @transform_2(%arg0: i32) -> (i32, i32) {
    %c0_i32 = arith.constant 0 : i32
    %c0_i32_0 = arith.constant 0 : i32
    %c0_i32_1 = arith.constant 0 : i32
    return %c0_i32, %c0_i32_0 : i32, i32
  }
  func.func @transform_3(%arg0: i32) -> (i32, i32, i32) {
    %c0_i32 = arith.constant 0 : i32
    %c0_i32_0 = arith.constant 0 : i32
    %c0_i32_1 = arith.constant 0 : i32
    %c0_i32_2 = arith.constant 0 : i32
    return %c0_i32, %c0_i32_0, %c0_i32_1 : i32, i32, i32
  }
  func.func @transform_4(%arg0: i32) -> (i32, i32) {
    %c0_i32 = arith.constant 0 : i32
    %c0_i32_0 = arith.constant 0 : i32
    %c0_i32_1 = arith.constant 0 : i32
    return %c0_i32, %c0_i32_0 : i32, i32
  }
  func.func @transform_5(%arg0: i32) -> (i32, i32) {
    %c0_i32 = arith.constant 0 : i32
    %c0_i32_0 = arith.constant 0 : i32
    %c0_i32_1 = arith.constant 0 : i32
    return %c0_i32, %c0_i32_0 : i32, i32
  }
  func.func @transform_6(%arg0: i32) -> (i32, i32) {
    %c0_i32 = arith.constant 0 : i32
    %c0_i32_0 = arith.constant 0 : i32
    %c0_i32_1 = arith.constant 0 : i32
    return %c0_i32, %c0_i32_0 : i32, i32
  }
  func.func @transform_7(%arg0: i32) -> (i32, i32, i32) {
    %c0_i32 = arith.constant 0 : i32
    %c0_i32_0 = arith.constant 0 : i32
    %c0_i32_1 = arith.constant 0 : i32
    return %arg0, %c0_i32, %c0_i32_0 : i32, i32, i32
  }
}

</mosaic_0001>

<bundles_post_ra>
// kernel: tpu_custom_call.1
= control target key start
LH: loop header
LB: loop body
LE: loop exit
PB: predicated region body
PF: predicated region fallthrough
CT: control target
= control target key end

     0   :  { %s4843_s24 = smov 0   ;;  %s7437_s0 = inlined_call_operand.vmem [shape: bf16[2,256,16], index: 0, kind: input, shape index: {}]   ;;  %s7438_s1 = inlined_call_operand.vmem [shape: bf16[16,4], index: 1, kind: input, shape index: {}]   ;;  %s7439_s2 = inlined_call_operand.vmem [shape: f32[1,4], index: 2, kind: input, shape index: {}]   ;;  %s7440_s3 = inlined_call_operand.vmem [shape: bf16[3,12,4], index: 3, kind: input, shape index: {}]   ;;  %s7441_s4 = inlined_call_operand.vmem [shape: f32[1,4], index: 4, kind: input, shape index: {}]   ;;  %s7442_s5 = inlined_call_operand.vmem [shape: bf16[4,16], index: 5, kind: input, shape index: {}]   ;;  %s7443_s6 = inlined_call_operand.vmem [shape: f32[1,16], index: 6, kind: input, shape index: {}]   ;;  %s7444_s7 = inlined_call_operand.vmem [shape: bf16[2,256,16], index: 7, kind: output, shape index: {}]  }
   0x1 LB: > { %s4135_s25 = sadd.s32 4294967295, %s4797_s24   ;;  %p4139_p0 = scmp.ge.s32.totalorder %s4797_s24, 1  ;;  %s4797_s24 = sphi %s4843_s24, %s17_s24  }
   0x2   : > { %p237_p1 = scmp.lt.s32.totalorder %s4797_s24, 3 }
   0x4   : > { %p238_p2 = pnand %p4139_p0, %p237_p1 }
   0x6   : > { %241 = sbr.rel (%p238_p2) target bundleno = 1048 (0x418), region = 48 }
   0xd   : > { %v4768_v0 = vld [vmem:[%s7438_s1] sm:$0xff]   ;;  %p269_p3 = scmp.lt.s32.totalorder %s4135_s25, 1  ;;  %vm409_vm0 = vcmask 130048   ;;  %vm7499_vm1 = vcmask 31744   ;;  %v7456_v17 = vmov 0   ;;  %v686_v18 = vlaneseq  ;;  %s4801_s11 = smov 4  }
   0xe   : > { %4515 = vmatprep.subr.bf16.mxu0 %v4768_v0  ;;  %668 = vst.msk [vmem:[#allocation2] sm:$0xff] %vm7499_vm1, %v7456_v17  ;;  %669 = vst.msk [vmem:[#allocation2 + $0x88] sm:$0xff] %vm7499_vm1, %v7456_v17  ;;  %vm4800_vm4 = vmmov 1   ;;  %v5017_v63 = vld [vmem:[%s7439_s2] ss:$0 sm:$0xff]  ;;  %s4802_s12 = smov 8  }
   0xf   : > { %s8343_s25 = smov (!%p269_p3, %s4135_s25), 1  ;;  %4516 = vmatpush3.bf16.msra.mxu0 %v4768_v0  ;;  %v4900_v19 = vshrl.u32 %v686_v18, 7  ;;  %vm1446_vm5 = vmpackc.low %vm4800_vm4, %vm4800_vm4 }
  0x10   : > { %s4317_s28 = sshll.u32 %s8343_s25, 7  ;;  %v4947_v43 = vsel %vm1446_vm5, 65537, %v7456_v17 }
  0x11   : > { %s4862_s8 = scalar_lea.vmem %s7437_s0, %s4317_s28  ;;  %v688_v20 = vadd.s32 8, %v4900_v19  ;;  %v690_v21 = vadd.s32 24, %v4900_v19  ;;  %v692_v22 = vadd.s32 40, %v4900_v19  ;;  %v694_v23 = vadd.s32 56, %v4900_v19  ;;  %s7328_s30 = scalar_lea.vmem %s7444_s7, %s4317_s28 }
  0x12   : > { %v4769_v1 = vld [vmem:[%s4862_s8] sm:$0xff]   ;;  %v4770_v2 = vld [vmem:[%s4862_s8 + $0x8] sm:$0xff]   ;;  %v4771_v3 = vld [vmem:[%s4862_s8 + $0x10] sm:$0xff]   ;;  %v689_v25 = vadd.s32 16, %v4900_v19  ;;  %v696_v27 = vadd.s32 72, %v4900_v19  ;;  %v698_v35 = vadd.s32 88, %v4900_v19 }
  0x13   : > { %4517 = vmatprep.mubr.msk.bf16.mxu0 %vm409_vm0, %v4769_v1  ;;  %v4772_v4 = vld [vmem:[%s4862_s8 + $0x18] sm:$0xff]   ;;  %v4773_v5 = vld [vmem:[%s4862_s8 + $0x20] sm:$0xff]   ;;  %v4774_v6 = vld [vmem:[%s4862_s8 + $0x28] sm:$0xff]   ;;  %v730_v24 = vand.u32 15, %v688_v20  ;;  %v744_v26 = vand.u32 15, %v690_v21  ;;  %v758_v28 = vand.u32 15, %v692_v22 }
  0x14   : > { %4518 = vmatmul.mubr.msk.bf16.vlgmr.msra.gmra.mrb[0].mxu0 %vm409_vm0, %v4770_v2  ;;  %v4775_v7 = vld [vmem:[%s4862_s8 + $0x30] sm:$0xff]   ;;  %v4776_v8 = vld [vmem:[%s4862_s8 + $0x38] sm:$0xff]   ;;  %v4777_v9 = vld [vmem:[%s4862_s8 + $0x40] sm:$0xff]   ;;  %v772_v29 = vand.u32 15, %v694_v23  ;;  %v737_v31 = vand.u32 15, %v689_v25  ;;  %v786_v33 = vand.u32 15, %v696_v27 }
  0x15   : > { %4521 = vmatprep.mubr.msk.bf16.mxu0 %vm409_vm0, %v4771_v3  ;;  %v4778_v10 = vld [vmem:[%s4862_s8 + $0x48] sm:$0xff]   ;;  %v4779_v11 = vld [vmem:[%s4862_s8 + $0x50] sm:$0xff]   ;;  %v4780_v12 = vld [vmem:[%s4862_s8 + $0x58] sm:$0xff]   ;;  %vm4908_vm2 = vcmp.lt.s32.totalorder %v730_v24, 15  ;;  %vm4912_vm3 = vcmp.lt.s32.totalorder %v744_v26, 15  ;;  %vm4916_vm6 = vcmp.lt.s32.totalorder %v758_v28, 15 }
  0x16   : > { %v4781_v13 = vld [vmem:[%s4862_s8 + $0x60] sm:$0xff]   ;;  %v4782_v14 = vld [vmem:[%s4862_s8 + $0x68] sm:$0xff]   ;;  %v4783_v15 = vld [vmem:[%s4862_s8 + $0x70] sm:$0xff]   ;;  %v723_v36 = vand.u32 15, %v4900_v19  ;;  %vm4925_vm8 = vcmp.lt.s32.totalorder %v772_v29, 15  ;;  %v700_v38 = vadd.s32 104, %v4900_v19 }
  0x17   : > { %v4784_v16 = vld [vmem:[%s4862_s8 + $0x78] sm:$0xff]   ;;  %vm1654_vm7 = vmpackc.low %vm4908_vm2, %vm4908_vm2  ;;  %vm4933_vm10 = vcmp.ge.s32.totalorder %v737_v31, 1  ;;  %v693_v40 = vadd.s32 48, %v4900_v19  ;;  %vm4941_vm12 = vcmp.lt.s32.totalorder %v786_v33, 15  ;;  %v702_v42 = vadd.s32 120, %v4900_v19  ;;  %v4959_v48 = vld [vmem:[#allocation2] sm:$0xff] }
  0x18   : > { %vm1656_vm9 = vmpackc.low %vm4912_vm3, %vm4912_vm3  ;;  %v4950_v44 = vsel %vm1654_vm7, 65537, %v7456_v17  ;;  %v800_v45 = vand.u32 15, %v698_v35  ;;  %vm4955_vm14 = vcmp.ge.s32.totalorder %v723_v36, 1  ;;  %v814_v47 = vand.u32 15, %v700_v38  ;;  %7648 = vst [vmem:[#allocation3_spill] sm:$0xff] %v4959_v48 }
  0x19   : > { %vm1658_vm11 = vmpackc.low %vm4916_vm6, %vm4916_vm6  ;;  %v704_v49 = vadd.s32 136, %v4900_v19  ;;  %v765_v50 = vand.u32 15, %v693_v40  ;;  %v4194_v51 = vcombine.low %v4947_v43, %v4950_v44  ;;  %v4976_v52 = vsel %vm1656_vm9, 65537, %v7456_v17 }
  0x1a   : > { %vm1660_vm13 = vmpackc.low %vm4925_vm8, %vm4925_vm8  ;;  %v706_v53 = vadd.s32 152, %v4900_v19  ;;  %v828_v54 = vand.u32 15, %v702_v42  ;;  %v4988_v55 = vsel %vm1658_vm11, 65537, %v7456_v17  ;;  %vm4993_vm3 = vcmp.lt.s32.totalorder %v800_v45, 15 }
  0x1b   : > { %vm1447_vm15 = vmpackc.low %vm4933_vm10, %vm4933_vm10  ;;  %v4991_v56 = vsel %vm1660_vm13, 65537, %v7456_v17  ;;  %v7445_v58 = vshll.u32 %v4959_v48, 16  ;;  %v708_v60 = vadd.s32 168, %v4900_v19  ;;  %vm5002_vm4 = vcmp.lt.s32.totalorder %v814_v47, 15 }
  0x1c   : > { %4522 = vmatmul.mubr.msk.bf16.gmra.mrb[4].mxu0 %vm409_vm0, %v4772_v4  ;;  %vm1445_vm2 = vmpackc.low %vm4955_vm14, %vm4955_vm14  ;;  %v5012_v62 = vsel %vm1447_vm15, 65537, %v7456_v17  ;;  %v842_v0 = vand.u32 15, %v704_v49  ;;  %vm5022_vm5 = vcmp.ge.s32.totalorder %v765_v50, 1  ;;  %v5027_v3 = vadd.s32 32, %v4900_v19 }
  0x1d   : > { %4525 = vmatprep.mubr.msk.bf16.mxu0 %vm409_vm0, %v4773_v5  ;;  %v5020_v1 = vsel %vm1445_vm2, 65537, %v7456_v17  ;;  %v4195_v4 = vcombine.low %v4947_v43, %v4976_v52  ;;  %v4196_v5 = vcombine.low %v4947_v43, %v4988_v55  ;;  %vm1664_vm6 = vmpackc.low %vm4993_vm3, %vm4993_vm3  ;;  %vm5036_vm7 = vcmp.lt.s32.totalorder %v828_v54, 15 }
  0x1e   : > { %7653 = vst [vmem:[#allocation4_spill] sm:$0xff] %v5020_v1  ;;  %vm1666_vm8 = vmpackc.low %vm5002_vm4, %vm5002_vm4  ;;  %vm5059_vm10 = vcmp.lt.s32.totalorder %v842_v0, 15  ;;  %v710_v23 = vadd.s32 184, %v4900_v19  ;;  %v751_v24 = vand.u32 15, %v5027_v3  ;;  %v5075_v27 = vsel %vm1664_vm6, 65537, %v7456_v17 }
  0x1f   : > { %vm1451_vm9 = vmpackc.low %vm5022_vm5, %vm5022_vm5  ;;  %v712_v29 = vadd.s32 200, %v4900_v19  ;;  %v5089_v31 = vsel %vm1666_vm8, 65537, %v7456_v17  ;;  %vm7500_vm13 = vsmask.f32 256  ;;  %vm7501_vm14 = vsmask.f32 7424 }
  0x20   : > { %vm1668_vm11 = vmpackc.low %vm5036_vm7, %vm5036_vm7  ;;  %v5099_v33 = vsel %vm1451_vm9, 65537, %v7456_v17  ;;  %vm5116_vm2 = vcmp.ne.s16.totalorder %v4194_v51, 0  ;;  %v7666_v40 = vmov 0  ;;  %v4199_v41 = vcombine.low %v4947_v43, %v5075_v27 }
  0x21   : > { %7663 = vst [vmem:[#allocation6_spill] sm:$0xff] %v5099_v33  ;;  %vm1670_vm15 = vmpackc.low %vm5059_vm10, %vm5059_vm10  ;;  %v5114_v37 = vsel %vm1668_vm11, 65537, %v7456_v17  ;;  %v7667_v40 = vsel %vm5116_vm2, 4294967295, %v7666_v40  ;;  %v884_v42 = vand.u32 15, %v710_v23  ;;  %v898_v45 = vand.u32 15, %v712_v29 }
  0x22   : > { %7668 = vst [vmem:[#allocation7_spill] sm:$0xff] %v7667_v40  ;;  %v5132_v51 = vsel %vm1670_vm15, 65537, %v7456_v17  ;;  %vm5182_vm7 = vcmp.ne.s16.totalorder %v4195_v4, 0  ;;  %vm5196_vm9 = vcmp.ne.s16.totalorder %v4196_v5, 0  ;;  %v7677_v4 = vmov 0 }
  0x23   : > { %vm5159_vm5 = vcmp.lt.s32.totalorder %v884_v42, 15  ;;  %vm5174_vm6 = vcmp.lt.s32.totalorder %v898_v45, 15  ;;  %v7678_v4 = vsel %vm5196_vm9, 4294967295, %v7677_v4  ;;  %vm5291_vm15 = vcmp.ge.s32.totalorder %v751_v24, 1 }
  0x24   : > { %4526 = vmatmul.mubr.msk.bf16.gmra.mrb[8].mxu0 %vm409_vm0, %v4774_v6  ;;  %v856_v6 = vand.u32 15, %v706_v53  ;;  %vm1676_vm8 = vmpackc.low %vm5159_vm5, %vm5159_vm5  ;;  %7679 = vst [vmem:[#allocation10_spill] sm:$0xff] %v7678_v4  ;;  %vm5345_vm5 = vcmp.ne.s16.totalorder %v4199_v41, 0 }
  0x25   : > { %4529 = vmatprep.mubr.msk.bf16.mxu0 %vm409_vm0, %v4775_v7  ;;  %vm1678_vm10 = vmpackc.low %vm5174_vm6, %vm5174_vm6 }
  0x2c   : > { %4530 = vmatmul.mubr.msk.bf16.gmra.mrb[12].mxu0 %vm409_vm0, %v4776_v8 }
  0x2d   : > { %4533 = vmatprep.mubr.msk.bf16.mxu0 %vm409_vm0, %v4777_v9  ;;  %v4197_v9 = vcombine.low %v4947_v43, %v4991_v56 }
  0x2f   : > { %vm5261_vm11 = vcmp.ne.s16.totalorder %v4197_v9, 0  ;;  %v7686_v9 = vmov 0 }
  0x34   : > { %4534 = vmatmul.mubr.msk.bf16.gmra.mrb[16].mxu0 %vm409_vm0, %v4778_v10  ;;  %v1994_v10 = vshrl.u32 %v4959_v48, 16 }
  0x35   : > { %4537 = vmatprep.mubr.msk.bf16.mxu0 %vm409_vm0, %v4779_v11  ;;  %v2137_v11 = vrot.slane %v7445_v58, 1 }
  0x36   : > { %v5129_v47 = vrot.slane %v1994_v10, 7 }
  0x37   : > { %v5091_v32 = vor.u32 %v2137_v11, %v1994_v10 }
  0x38   : > { %7669 = vst [vmem:[#allocation8_spill] sm:$0xff] %v5129_v47 }
  0x39   : > { %7662 = vst [vmem:[#allocation5_spill] sm:$0xff] %v5091_v32 }
  0x3c   : > { %4538 = vmatmul.mubr.msk.bf16.gmra.mrb[20].mxu0 %vm409_vm0, %v4780_v12 }
  0x3d   : > { %4541 = vmatprep.mubr.msk.bf16.mxu0 %vm409_vm0, %v4781_v13 }
  0x44   : > { %4542 = vmatmul.mubr.msk.bf16.gmra.mrb[24].mxu0 %vm409_vm0, %v4782_v14 }
  0x45   : > { %4545 = vmatprep.mubr.msk.bf16.mxu0 %vm409_vm0, %v4783_v15 }
  0x4c   : > { %4546 = vmatmul.mubr.msk.bf16.gmra.mrb[28].mxu0 %vm409_vm0, %v4784_v16  ;;  %vm1662_vm0 = vmpackc.low %vm4941_vm12, %vm4941_vm12  ;;  %v870_v16 = vand.u32 15, %v708_v60  ;;  %vm5077_vm12 = vcmp.lt.s32.totalorder %v856_v6, 15 }
  0x4d   : > { %v4999_v59 = vsel %vm1662_vm0, 65537, %v7456_v17  ;;  %vm1672_vm3 = vmpackc.low %vm5077_vm12, %vm5077_vm12 }
  0x4e   : > { %v4198_v15 = vcombine.low %v4947_v43, %v4999_v59  ;;  %vm5104_vm0 = vcmp.lt.s32.totalorder %v870_v16, 15  ;;  %v5154_v2 = vsel %vm1672_vm3, 65537, %v7456_v17 }
  0x4f   : > { %vm1674_vm4 = vmpackc.low %vm5104_vm0, %vm5104_vm0 }
  0x50   : > { %vm5277_vm12 = vcmp.ne.s16.totalorder %v4198_v15, 0 }
  0x51   : > { %v7687_v9 = vsel %vm5277_vm12, 4294967295, %v7686_v9 }
  0x52   : > { %7688 = vst [vmem:[#allocation15_spill] sm:$0xff] %v7687_v9 }
  0xe7   : > { %v4519_v8 = vpop.f32.mrb[0].mxu0 }
  0xe8   : > { %v501_v13 = vadd.f32 %v4519_v8, %v5017_v63  ;;  %v492_v14 = vpop.f32.mrb[1].mxu0 }
  0xe9   : > { %v493_v20 = vadd.f32 %v5017_v63, %v492_v14  ;;  %v4520_v21 = vpop.f32.mrb[2].mxu0 }
  0xea   : > { %v504_v25 = vadd.f32 %v4520_v21, %v5017_v63  ;;  %v495_v26 = vpop.f32.mrb[3].mxu0  ;;  %v621_v34 = vmax.f32 %v501_v13, 0.0  ;;  %v716_v21 = vadd.s32 232, %v4900_v19 }
  0xeb   : > { %v496_v30 = vadd.f32 %v5017_v63, %v495_v26  ;;  %v619_v38 = vmax.f32 %v493_v20, 0.0  ;;  %v5172_v20 = vsel %vm1674_vm4, 65537, %v7456_v17  ;;  %v5187_v26 = vadd.s32 216, %v4900_v19 }
  0xec   : > { %v622_v35 = vmax.f32 %v504_v25, 0.0  ;;  %v7674_v25 = vmov 0 }
  0xed   : > { %v620_v39 = vmax.f32 %v496_v30, 0.0  ;;  %v7675_v25 = vsel %vm5182_vm7, 4294967295, %v7674_v25 }
  0xee   : > { %v5125_v44 = vpack.c.bf16 %v622_v35, %v621_v34  ;;  %7676 = vst [vmem:[#allocation9_spill] sm:$0xff] %v7675_v25 }
  0xef   : > { %v651_v49 = vpack.c.bf16 %v620_v39, %v619_v38  ;;  %v4523_v50 = vpop.f32.mrb[4].mxu0 }
  0xf0   : > { %671 = vst.msk [vmem:[#allocation2 + $0x10] sm:$0xff] %vm7499_vm1, %v5125_v44  ;;  %v517_v57 = vadd.f32 %v4523_v50, %v5017_v63  ;;  %1815 = vrot.lane.b32.xlu1 %v5125_v44, %s4801_s11  ;;  %v508_v60 = vpop.f32.mrb[5].mxu0  ;;  %v1179_v61 = vshll.u32 %v5125_v44, 16  ;;  %v1176_v0 = vshrl.u32 %v5125_v44, 16 }
  0xf1   : > { %670 = vst.msk [vmem:[#allocation2 + $0x8] sm:$0xff] %vm7499_vm1, %v651_v49  ;;  %v1172_v6 = vshll.u32 %v651_v49, 16  ;;  %v509_v7 = vadd.f32 %v5017_v63, %v508_v60  ;;  %v4524_v8 = vpop.f32.mrb[6].mxu0  ;;  %1813 = vrot.lane.b32.xlu0 %v651_v49, %s4801_s11  ;;  %v1169_v10 = vshrl.u32 %v651_v49, 16  ;;  %v5225_v60 = vsel %vm1676_vm8, 65537, %v7456_v17  ;;  %vm1449_vm8 = vmpackc.low %vm5291_vm15, %vm5291_vm15 }
  0xf2   : > { %v520_v13 = vadd.f32 %v4524_v8, %v5017_v63  ;;  %v511_v14 = vpop.f32.mrb[7].mxu0  ;;  %v5164_v16 = vrot.slane %v1176_v0, 7  ;;  %v625_v29 = vmax.f32 %v517_v57, 0.0  ;;  %v1317_v34 = vrot.slane %v1179_v61, 1 }
  0xf3   : > { %v512_v22 = vadd.f32 %v5017_v63, %v511_v14  ;;  %v1315_v23 = vrot.slane %v1172_v6, 1  ;;  %v1171_v28 = vrot.slane %v1169_v10, 7  ;;  %v623_v36 = vmax.f32 %v509_v7, 0.0 }
  0xf4   : > { %v626_v30 = vmax.f32 %v520_v13, 0.0  ;;  %v1181_v35 = vor.u32 %v1179_v61, %v5164_v16 }
  0xf5   : > { %v624_v38 = vmax.f32 %v512_v22, 0.0  ;;  %v1316_v52 = vor.u32 %v1315_v23, %v1169_v10  ;;  %v5203_v39 = vor.u32 %v1172_v6, %v1171_v28  ;;  %v5241_v10 = vsel %vm1678_vm10, 65537, %v7456_v17 }
  0xf6   : > { %v5205_v42 = vpack.c.bf16 %v626_v30, %v625_v29  ;;  %v5212_v55 = vsel %vm7500_vm13, %v1171_v28, %v1181_v35  ;;  %v912_v23 = vand.u32 15, %v5187_v26  ;;  %v1319_v30 = vor.u32 %v1317_v34, %v1176_v0 }
  0xf7   : > { %7680 = vst [vmem:[#allocation11_spill] sm:$0xff] %v5203_v39  ;;  %7681 = vst [vmem:[#allocation12_spill] sm:$0xff] %v5212_v55  ;;  %v5214_v5 = vpack.c.bf16 %v624_v38, %v623_v36  ;;  %v4527_v49 = vpop.f32.mrb[8].mxu0  ;;  %v1318_v50 = vsel %vm7501_vm14, %v1316_v52, %v1317_v34  ;;  %v718_v36 = vadd.s32 248, %v4900_v19  ;;  %v7683_v26 = vmov 0 }
  0xf8   : > { %673 = vst.msk [vmem:[#allocation2 + $0x20] sm:$0xff] %vm7499_vm1, %v5205_v42  ;;  %v533_v61 = vadd.f32 %v4527_v49, %v5017_v63  ;;  %1819 = vrot.lane.b32.xlu1 %v5205_v42, %s4801_s11  ;;  %v524_v6 = vpop.f32.mrb[9].mxu0  ;;  %v1781_v7 = vsel %vm5116_vm2, %v1318_v50, 0  ;;  %v1195_v8 = vshll.u32 %v5205_v42, 16  ;;  %v5243_v11 = vld [vmem:[#allocation2 + $0x8] sm:$0xff]  ;;  %v7684_v26 = vsel %vm5261_vm11, 4294967295, %v7683_v26 }
  0xf9   : > { %7682 = vst [vmem:[#allocation13_spill] sm:$0xff] %v5243_v11  ;;  %672 = vst.msk [vmem:[#allocation2 + $0x18] sm:$0xff] %vm7499_vm1, %v5214_v5  ;;  %v525_v13 = vadd.f32 %v5017_v63, %v524_v6  ;;  %v4528_v14 = vpop.f32.mrb[10].mxu0  ;;  %1861 = vrot.lane.b32.xlu0 %v1781_v7, %s4802_s12  ;;  %v7458_v22 = vshll.u32 %v5214_v5, 16  ;;  %v1184_v35 = vshrl.u32 %v5214_v5, 16  ;;  %v7446_v50 = vshrl.u32 %v5243_v11, 16 }
  0xfa   : > { %v536_v28 = vadd.f32 %v4528_v14, %v5017_v63  ;;  %v527_v29 = vpop.f32.mrb[11].mxu0  ;;  %v629_v38 = vmax.f32 %v533_v61, 0.0  ;;  %7685 = vst [vmem:[#allocation14_spill] sm:$0xff] %v7684_v26  ;;  %v1323_v6 = vrot.slane %v1195_v8, 1  ;;  %v7447_v61 = vshll.u32 %v5243_v11, 16 }
  0xfb   : > { %v528_v52 = vadd.f32 %v5017_v63, %v527_v29  ;;  %v1320_v49 = vrot.slane %v7458_v22, 1  ;;  %v627_v0 = vmax.f32 %v525_v13, 0.0  ;;  %v5283_v13 = vrot.slane %v7446_v50, 7 }
  0xfc   : > { %v630_v34 = vmax.f32 %v536_v28, 0.0  ;;  %vm5320_vm0 = vcmp.lt.s32.totalorder %v912_v23, 15 }
  0xfd   : > { %v628_v7 = vmax.f32 %v528_v52, 0.0  ;;  %1817 = vrot.lane.b32.xlu0 %v5214_v5, %s4801_s11  ;;  %v1321_v14 = vsel %vm7501_vm14, %v1319_v30, %v1320_v49  ;;  %v1322_v56 = vor.u32 %v1320_v49, %v1184_v35  ;;  %7689 = vst [vmem:[#allocation16_spill] sm:$0xff] %v5283_v13  ;;  %v926_v30 = vand.u32 15, %v716_v21  ;;  %vm1680_vm6 = vmpackc.low %vm5320_vm0, %vm5320_vm0 }
  0xfe   : > { %v5285_v28 = vpack.c.bf16 %v630_v34, %v629_v38  ;;  %v1782_v29 = vsel %vm5182_vm7, %v1321_v14, 0  ;;  %v940_v52 = vand.u32 15, %v718_v36  ;;  %v5304_v21 = vor.u32 %v7447_v61, %v5283_v13 }
  0xff   : > { %v5295_v59 = vpack.c.bf16 %v628_v7, %v627_v0  ;;  %v4531_v15 = vpop.f32.mrb[12].mxu0  ;;  %1863 = vrot.lane.b32.xlu1 %v1782_v29, %s4802_s12  ;;  %v1324_v58 = vsel %vm7501_vm14, %v1322_v56, %v1323_v6  ;;  %v1192_v56 = vshrl.u32 %v5205_v42, 16  ;;  %vm5327_vm3 = vcmp.lt.s32.totalorder %v926_v30, 15 }
 0x100   : > { %7692 = vst [vmem:[#allocation17_spill] sm:$0xff] %v5304_v21  ;;  %675 = vst.msk [vmem:[#allocation2 + $0x30] sm:$0xff] %vm7499_vm1, %v5285_v28  ;;  %v549_v3 = vadd.f32 %v4531_v15, %v5017_v63  ;;  %v540_v24 = vpop.f32.mrb[13].mxu0  ;;  %v1783_v36 = vsel %vm5196_vm9, %v1324_v58, 0  ;;  %v7449_v0 = vshll.u32 %v5285_v28, 16  ;;  %v5324_v58 = vld [vmem:[#allocation2 + $0x18] sm:$0xff]  ;;  %v7723_v13 = vcombine.low %v4947_v43, %v5154_v2 }
 0x101   : > { %674 = vst.msk [vmem:[#allocation2 + $0x28] sm:$0xff] %vm7499_vm1, %v5295_v59  ;;  %v541_v7 = vadd.f32 %v5017_v63, %v540_v24  ;;  %v4532_v14 = vpop.f32.mrb[14].mxu0  ;;  %1865 = vrot.lane.b32.xlu0 %v1783_v36, %s4802_s12  ;;  %v7448_v29 = vshll.u32 %v5295_v59, 16  ;;  %7695 = vst [vmem:[#allocation18_spill] sm:$0xff] %v5324_v58  ;;  %vm5331_vm4 = vcmp.lt.s32.totalorder %v940_v52, 15  ;;  %v697_v36 = vadd.s32 80, %v4900_v19 }
 0x102   : > { %v552_v50 = vadd.f32 %v4532_v14, %v5017_v63  ;;  %v543_v54 = vpop.f32.mrb[15].mxu0  ;;  %v1325_v18 = vor.u32 %v1323_v6, %v1192_v56  ;;  %v7451_v30 = vshrl.u32 %v5295_v59, 16  ;;  %v7700_v52 = vmov 0  ;;  %vm1682_vm15 = vmpackc.low %vm5327_vm3, %vm5327_vm3 }
 0x103   : > { %v544_v23 = vadd.f32 %v5017_v63, %v543_v54  ;;  %1823 = vrot.lane.b32.xlu1 %v5285_v28, %s4801_s11  ;;  %v1326_v14 = vrot.slane %v7448_v29, 1  ;;  %v7701_v52 = vsel %vm5345_vm5, 4294967295, %v7700_v52  ;;  %v633_v12 = vmax.f32 %v549_v3, 0.0  ;;  %vm1684_vm0 = vmpackc.low %vm5331_vm4, %vm5331_vm4 }
 0x104   : > { %7702 = vst [vmem:[#allocation19_spill] sm:$0xff] %v7701_v52  ;;  %v634_v53 = vmax.f32 %v552_v50, 0.0  ;;  %v1329_v54 = vrot.slane %v7449_v0, 1  ;;  %v7450_v46 = vshrl.u32 %v5324_v58, 16  ;;  %v631_v6 = vmax.f32 %v541_v7, 0.0 }
 0x105   : > { %v632_v34 = vmax.f32 %v544_v23, 0.0  ;;  %1821 = vrot.lane.b32.xlu0 %v5295_v59, %s4801_s11  ;;  %v1327_v29 = vsel %vm7501_vm14, %v1325_v18, %v1326_v14  ;;  %v1328_v27 = vor.u32 %v1326_v14, %v7451_v30  ;;  %v793_v0 = vand.u32 15, %v697_v36 }
 0x106   : > { %v5357_v41 = vpack.c.bf16 %v634_v53, %v633_v12  ;;  %v1784_v50 = vsel %vm5261_vm11, %v1327_v29, 0  ;;  %v5363_v3 = vrot.slane %v7450_v46, 7  ;;  %v7452_v12 = vshll.u32 %v5324_v58, 16 }
 0x107   : > { %v5365_v7 = vpack.c.bf16 %v632_v34, %v631_v6  ;;  %v4535_v23 = vpop.f32.mrb[16].mxu0  ;;  %1867 = vrot.lane.b32.xlu1 %v1784_v50, %s4802_s12  ;;  %v1330_v18 = vsel %vm7501_vm14, %v1328_v27, %v1329_v54  ;;  %v695_v53 = vadd.s32 64, %v4900_v19  ;;  %v5377_v34 = vrot.slane %v1192_v56, 7 }
 0x108   : > { %7703 = vst [vmem:[#allocation20_spill] sm:$0xff] %v5363_v3  ;;  %677 = vst.msk [vmem:[#allocation2 + $0x40] sm:$0xff] %vm7499_vm1, %v5357_v41  ;;  %v565_v29 = vadd.f32 %v4535_v23, %v5017_v63  ;;  %v556_v36 = vpop.f32.mrb[17].mxu0  ;;  %v1785_v14 = vsel %vm5277_vm12, %v1330_v18, 0  ;;  %v7455_v6 = vshrl.u32 %v5285_v28, 16  ;;  %v7454_v23 = vshll.u32 %v5357_v41, 16 }
 0x109   : > { %676 = vst.msk [vmem:[#allocation2 + $0x38] sm:$0xff] %vm7499_vm1, %v5365_v7  ;;  %v557_v27 = vadd.f32 %v5017_v63, %v556_v36  ;;  %v4536_v50 = vpop.f32.mrb[18].mxu0  ;;  %1869 = vrot.lane.b32.xlu0 %v1785_v14, %s4802_s12  ;;  %v7453_v46 = vshll.u32 %v5365_v7, 16  ;;  %v5391_v56 = vor.u32 %v7452_v12, %v5363_v3  ;;  %v5403_v36 = vsel %vm1680_vm6, 65537, %v7456_v17 }
 0x10a   : > { %v568_v18 = vadd.f32 %v4536_v50, %v5017_v63  ;;  %v559_v30 = vpop.f32.mrb[19].mxu0  ;;  %v1186_v14 = vrot.slane %v1184_v35, 7  ;;  %vm5407_vm10 = vcmp.ge.s32.totalorder %v793_v0, 1  ;;  %v1331_v50 = vor.u32 %v1329_v54, %v7455_v6 }
 0x10b   : > { %7704 = vst [vmem:[#allocation21_spill] sm:$0xff] %v5391_v56  ;;  %v560_v49 = vadd.f32 %v5017_v63, %v559_v30  ;;  %v5416_v38 = vrot.slane %v7453_v46, 1  ;;  %v779_v15 = vand.u32 15, %v695_v53  ;;  %v637_v57 = vmax.f32 %v565_v29, 0.0  ;;  %vm1455_vm3 = vmpackc.low %vm5407_vm10, %vm5407_vm10 }
 0x10c   : > { %v638_v35 = vmax.f32 %v568_v18, 0.0  ;;  %v1197_v0 = vor.u32 %v1195_v8, %v5377_v34  ;;  %v5428_v30 = vsel %vm1449_vm8, 65537, %v7456_v17  ;;  %v635_v54 = vmax.f32 %v557_v27, 0.0 }
 0x10d   : > { %7707 = vst [vmem:[#allocation22_spill] sm:$0xff] %v5428_v30  ;;  %v636_v46 = vmax.f32 %v560_v49, 0.0  ;;  %v1333_v61 = vsel %vm7501_vm14, %v1331_v50, %v5416_v38  ;;  %v5434_v53 = vrot.slane %v7454_v23, 1  ;;  %v5444_v8 = vsel %vm1682_vm15, 65537, %v7456_v17 }
 0x10e   : > { %v5439_v29 = vpack.c.bf16 %v638_v35, %v637_v57  ;;  %v1786_v42 = vsel %vm5345_vm5, %v1333_v61, 0  ;;  %v5447_v27 = vsel %vm7500_vm13, %v1186_v14, %v1197_v0  ;;  %v7464_v23 = vshrl.u32 %v5357_v41, 16 }
 0x10f   : > { %7709 = vst [vmem:[#allocation24_spill] sm:$0xff] %v5447_v27  ;;  %v5449_v18 = vpack.c.bf16 %v636_v46, %v635_v54  ;;  %v4539_v49 = vpop.f32.mrb[20].mxu0  ;;  %1871 = vrot.lane.b32.xlu1 %v1786_v42, %s4802_s12  ;;  %v1985_v50 = vld [vmem:[#allocation2 + $0x40] sm:$0xff]  ;;  %v5459_v57 = vsel %vm1684_vm0, 65537, %v7456_v17  ;;  %vm5461_vm6 = vcmp.ge.s32.totalorder %v779_v15, 1  ;;  %v5475_v24 = vsel %vm1455_vm3, 65537, %v7456_v17 }
 0x110   : > { %7708 = vst [vmem:[#allocation23_spill] sm:$0xff] %v5439_v29  ;;  %679 = vst.msk [vmem:[#allocation2 + $0x50] sm:$0xff] %vm7499_vm1, %v5439_v29  ;;  %v581_v46 = vadd.f32 %v4539_v49, %v5017_v63  ;;  %v572_v0 = vpop.f32.mrb[21].mxu0  ;;  %v2057_v54 = vshrl.u32 %v1985_v50, 16  ;;  %v2060_v61 = vshll.u32 %v1985_v50, 16  ;;  %2265 = vrot.lane.b32.xlu0 %v1985_v50, %s4801_s11  ;;  %v1337_v50 = vor.u32 %v5434_v53, %v7464_v23 }
 0x111   : > { %7712 = vst [vmem:[#allocation25_spill] sm:$0xff] %v5475_v24  ;;  %678 = vst.msk [vmem:[#allocation2 + $0x48] sm:$0xff] %vm7499_vm1, %v5449_v18  ;;  %v573_v15 = vadd.f32 %v5017_v63, %v572_v0  ;;  %v4540_v42 = vpop.f32.mrb[22].mxu0  ;;  %v5485_v6 = vadd.s32 112, %v4900_v19  ;;  %v7714_v52 = vshll.u32 %v5449_v18, 16  ;;  %vm5553_vm10 = vcmp.ne.s16.totalorder %v7723_v13, 0 }
 0x112   : > { %v641_v45 = vmax.f32 %v581_v46, 0.0  ;;  %v5487_v12 = vrot.slane %v2057_v54, 7  ;;  %v584_v17 = vadd.f32 %v4540_v42, %v5017_v63  ;;  %v575_v22 = vpop.f32.mrb[23].mxu0  ;;  %v5491_v0 = vrot.slane %v2060_v61, 1  ;;  %vm1453_vm4 = vmpackc.low %vm5461_vm6, %vm5461_vm6 }
 0x113   : > { %v639_v48 = vmax.f32 %v573_v15, 0.0  ;;  %v576_v49 = vadd.f32 %v5017_v63, %v575_v22  ;;  %v5496_v9 = vrot.slane %v7714_v52, 1  ;;  %v7716_v22 = vcombine.low %v4947_v43, %v5132_v51 }
 0x114   : > { %7713 = vst [vmem:[#allocation26_spill] sm:$0xff] %v5491_v0  ;;  %v5502_v46 = vor.u32 %v2060_v61, %v5487_v12  ;;  %v642_v42 = vmax.f32 %v584_v17, 0.0  ;;  %v7717_v52 = vmov 0  ;;  %v2162_v35 = vor.u32 %v5491_v0, %v2057_v54 }
 0x115   : > { %v640_v44 = vmax.f32 %v576_v49, 0.0  ;;  %vm5511_vm8 = vcmp.ne.s16.totalorder %v7716_v22, 0  ;;  %v5519_v17 = vsel %vm7501_vm14, %v1337_v50, %v5496_v9  ;;  %v7720_v49 = vshll.u32 %v5214_v5, 16 }
 0x116   : > { %7715 = vst [vmem:[#allocation27_spill] sm:$0xff] %v5502_v46  ;;  %v7718_v52 = vsel %vm5511_vm8, 4294967295, %v7717_v52  ;;  %v5523_v23 = vpack.c.bf16 %v642_v42, %v641_v45  ;;  %v7721_v22 = vmov 0   ;;  %v7722_v61 = vshll.u32 %v5439_v29, 16 }
 0x117   : > { %7719 = vst [vmem:[#allocation28_spill] sm:$0xff] %v7718_v52  ;;  %v5527_v15 = vor.u32 %v7720_v49, %v1186_v14  ;;  %v5532_v46 = vsel %vm1453_vm4, 65537, %v7721_v22  ;;  %v5535_v26 = vpack.c.bf16 %v640_v44, %v639_v48  ;;  %v4543_v50 = vpop.f32.mrb[24].mxu0  ;;  %v1987_v4 = vld [vmem:[#allocation2 + $0x50] sm:$0xff]  ;;  %v7736_v58 = vmov 0 }
 0x118   : > { %v5539_v45 = vrot.slane %v7722_v61, 1  ;;  %681 = vst.msk [vmem:[#allocation2 + $0x60] sm:$0xff] %vm7499_vm1, %v5523_v23  ;;  %v597_v14 = vadd.f32 %v4543_v50, %v5017_v63  ;;  %v588_v42 = vpop.f32.mrb[25].mxu0  ;;  %v2073_v49 = vshrl.u32 %v1987_v4, 16  ;;  %v2076_v51 = vshll.u32 %v1987_v4, 16  ;;  %2269 = vrot.lane.b32.xlu0 %v1987_v4, %s4801_s11  ;;  %v1986_v48 = vld [vmem:[#allocation2 + $0x48] sm:$0xff] }
 0x119   : > { %680 = vst.msk [vmem:[#allocation2 + $0x58] sm:$0xff] %vm7499_vm1, %v5535_v26  ;;  %v589_v54 = vadd.f32 %v5017_v63, %v588_v42  ;;  %v4544_v61 = vpop.f32.mrb[26].mxu0  ;;  %v2065_v5 = vshrl.u32 %v1986_v48, 16  ;;  %v2068_v3 = vshll.u32 %v1986_v48, 16  ;;  %v7724_v50 = vmov 0 }
 0x11a   : > { %v7725_v50 = vsel %vm5553_vm10, 4294967295, %v7724_v50  ;;  %v645_v56 = vmax.f32 %v597_v14, 0.0  ;;  %v5558_v47 = vrot.slane %v2073_v49, 7  ;;  %v2166_v44 = vrot.slane %v2076_v51, 1  ;;  %v591_v24 = vpop.f32.mrb[27].mxu0 }
 0x11b   : > { %7726 = vst [vmem:[#allocation29_spill] sm:$0xff] %v7725_v50  ;;  %v600_v21 = vadd.f32 %v4544_v61, %v5017_v63  ;;  %v643_v42 = vmax.f32 %v589_v54, 0.0  ;;  %v592_v25 = vadd.f32 %v5017_v63, %v591_v24  ;;  %v5562_v27 = vrot.slane %v2065_v5, 7 }
 0x11c   : > { %7727 = vst [vmem:[#allocation30_spill] sm:$0xff] %v5558_v47  ;;  %v2163_v40 = vrot.slane %v2068_v3, 1  ;;  %v5565_v2 = vor.u32 %v2076_v51, %v5558_v47  ;;  %2267 = vrot.lane.b32.xlu0 %v1986_v48, %s4801_s11  ;;  %v7728_v14 = vshrl.u32 %v5439_v29, 16  ;;  %v7729_v55 = vshll.u32 %v5535_v26, 16 }
 0x11d   : > { %v646_v13 = vmax.f32 %v600_v21, 0.0  ;;  %v644_v30 = vmax.f32 %v592_v25, 0.0  ;;  %v5574_v54 = vor.u32 %v2068_v3, %v5562_v27  ;;  %v7730_v51 = vcombine.low %v4947_v43, %v5172_v20 }
 0x11e   : > { %v1343_v4 = vor.u32 %v5539_v45, %v7728_v14  ;;  %v1344_v61 = vrot.slane %v7729_v55, 1  ;;  %v2165_v24 = vor.u32 %v2163_v40, %v2065_v5  ;;  %v2164_v32 = vsel %vm7501_vm14, %v2162_v35, %v2163_v40 }
 0x11f   : > { %vm5580_vm15 = vcmp.ne.s16.totalorder %v7730_v51, 0  ;;  %v7731_v21 = vmov 0  ;;  %v5584_v48 = vpack.c.bf16 %v646_v13, %v645_v56  ;;  %v2225_v14 = vsel %vm5511_vm8, %v2164_v32, 0  ;;  %v4547_v35 = vpop.f32.mrb[28].mxu0  ;;  %v5597_v20 = vld [vmem:[#allocation2 + $0x60] sm:$0xff] }
 0x120   : > { %v7732_v21 = vsel %vm5580_vm15, 4294967295, %v7731_v21  ;;  %v5589_v25 = vsel %vm7501_vm14, %v1343_v4, %v1344_v61  ;;  %v5592_v55 = vadd.s32 96, %v4900_v19  ;;  %v2168_v3 = vor.u32 %v2166_v44, %v2073_v49  ;;  %2313 = vrot.lane.b32.xlu1 %v2225_v14, %s4802_s12  ;;  %v604_v4 = vpop.f32.mrb[29].mxu0  ;;  %2273 = vrot.lane.b32.xlu0 %v5597_v20, %s4801_s11 }
 0x121   : > { %7733 = vst [vmem:[#allocation31_spill] sm:$0xff] %v7732_v21  ;;  %7734 = vst [vmem:[#allocation32_spill] sm:$0xff] %v5589_v25  ;;  %v5594_v40 = vpack.c.bf16 %v644_v30, %v643_v42  ;;  %v2167_v56 = vsel %vm7501_vm14, %v2165_v24, %v2166_v44  ;;  %v5601_v5 = vadd.s32 128, %v4900_v19  ;;  %v613_v32 = vadd.f32 %v4547_v35, %v5017_v63  ;;  %v1988_v42 = vld [vmem:[#allocation2 + $0x58] sm:$0xff]  ;;  %v4548_v24 = vpop.f32.mrb[30].mxu0 }
 0x122   : > { %683 = vst.msk [vmem:[#allocation2 + $0x70] sm:$0xff] %vm7499_vm1, %v5584_v48  ;;  %v2089_v49 = vshrl.u32 %v5597_v20, 16  ;;  %v2092_v30 = vshll.u32 %v5597_v20, 16  ;;  %v605_v44 = vadd.f32 %v5017_v63, %v604_v4  ;;  %v2081_v51 = vshrl.u32 %v1988_v42, 16  ;;  %v607_v39 = vpop.f32.mrb[31].mxu0 }
 0x123   : > { %682 = vst.msk [vmem:[#allocation2 + $0x68] sm:$0xff] %vm7499_vm1, %v5594_v40  ;;  %v2084_v14 = vshll.u32 %v1988_v42, 16  ;;  %v7735_v35 = vcombine.low %v4947_v43, %v5225_v60  ;;  %v649_v25 = vmax.f32 %v613_v32, 0.0  ;;  %v616_v13 = vadd.f32 %v4548_v24, %v5017_v63 }
 0x124   : > { %v5622_v33 = vrot.slane %v2089_v49, 7  ;;  %v2226_v4 = vsel %vm5553_vm10, %v2167_v56, 0  ;;  %v647_v11 = vmax.f32 %v605_v44, 0.0  ;;  %v608_v29 = vadd.f32 %v5017_v63, %v607_v39 }
 0x125   : > { %vm5617_vm0 = vcmp.ne.s16.totalorder %v7735_v35, 0  ;;  %2315 = vrot.lane.b32.xlu1 %v2226_v4, %s4802_s12  ;;  %v5629_v60 = vrot.slane %v2081_v51, 7  ;;  %v2169_v35 = vrot.slane %v2084_v14, 1  ;;  %v2172_v32 = vrot.slane %v2092_v30, 1 }
 0x126   : > { %v7737_v58 = vsel %vm5617_vm0, 4294967295, %v7736_v58  ;;  %7739 = vst [vmem:[#allocation34_spill] sm:$0xff] %v5622_v33  ;;  %v5632_v0 = vor.u32 %v2092_v30, %v5622_v33  ;;  %v650_v20 = vmax.f32 %v616_v13, 0.0  ;;  %v7740_v47 = vshrl.u32 %v5535_v26, 16 }
 0x127   : > { %7738 = vst [vmem:[#allocation33_spill] sm:$0xff] %v7737_v58  ;;  %v648_v1 = vmax.f32 %v608_v29, 0.0  ;;  %v5637_v50 = vor.u32 %v2084_v14, %v5629_v60  ;;  %v2171_v56 = vor.u32 %v2169_v35, %v2081_v51  ;;  %v2170_v63 = vsel %vm7501_vm14, %v2168_v3, %v2169_v35 }
 0x128   : > { %v1346_v24 = vor.u32 %v1344_v61, %v7740_v47  ;;  %v7741_v39 = vcombine.low %v4947_v43, %v5241_v10  ;;  %v7742_v44 = vmov 0  ;;  %v5647_v4 = vpack.c.bf16 %v650_v20, %v649_v25 }
 0x129   : > { %v2227_v30 = vsel %vm5580_vm15, %v2170_v63, 0  ;;  %v7745_v47 = vshll.u32 %v5523_v23, 16  ;;  %v5654_v61 = vadd.s32 144, %v4900_v19  ;;  %v5656_v13 = vpack.c.bf16 %v648_v1, %v647_v11  ;;  %2271 = vrot.lane.b32.xlu1 %v1988_v42, %s4801_s11  ;;  %v1991_v3 = vld [vmem:[#allocation2 + $0x70] sm:$0xff] }
 0x12a   : > { %vm5643_vm3 = vcmp.ne.s16.totalorder %v7741_v39, 0  ;;  %2317 = vrot.lane.b32.xlu0 %v2227_v30, %s4802_s12  ;;  %v2173_v10 = vsel %vm7501_vm14, %v2171_v56, %v2172_v32  ;;  %v7498_v25 = vshll.u32 %v5594_v40, 16  ;;  %685 = vst.msk [vmem:[#allocation2 + $0x80] sm:$0xff] %vm7499_vm1, %v5647_v4  ;;  %v2105_v14 = vshrl.u32 %v1991_v3, 16  ;;  %v1990_v20 = vld [vmem:[#allocation2 + $0x68] sm:$0xff] }
 0x12b   : > { %v7743_v44 = vsel %vm5643_vm3, 4294967295, %v7742_v44  ;;  %v1347_v29 = vrot.slane %v7745_v47, 1  ;;  %v7497_v1 = vshrl.u32 %v5523_v23, 16  ;;  %v5670_v11 = vadd.s32 160, %v4900_v19  ;;  %684 = vst.msk [vmem:[#allocation2 + $0x78] sm:$0xff] %vm7499_vm1, %v5656_v13 }
 0x12c   : > { %7744 = vst [vmem:[#allocation35_spill] sm:$0xff] %v7743_v44  ;;  %v2108_v42 = vshll.u32 %v1991_v3, 16  ;;  %v2097_v56 = vshrl.u32 %v1990_v20, 16  ;;  %v2100_v63 = vshll.u32 %v1990_v20, 16  ;;  %v2228_v30 = vsel %vm5617_vm0, %v2173_v10, 0 }
 0x12d   : > { %v5666_v35 = vsel %vm7501_vm14, %v1346_v24, %v1347_v29  ;;  %v5677_v47 = vrot.slane %v2105_v14, 7  ;;  %v1349_v24 = vor.u32 %v1347_v29, %v7497_v1  ;;  %v1350_v51 = vrot.slane %v7498_v25, 1  ;;  %2319 = vrot.lane.b32.xlu1 %v2228_v30, %s4802_s12 }
 0x12e   : > { %7746 = vst [vmem:[#allocation36_spill] sm:$0xff] %v5666_v35  ;;  %v2174_v21 = vor.u32 %v2172_v32, %v2089_v49  ;;  %2277 = vrot.lane.b32.xlu0 %v1991_v3, %s4801_s11  ;;  %v5685_v35 = vrot.slane %v2097_v56, 7  ;;  %v2175_v33 = vrot.slane %v2100_v63, 1  ;;  %v7749_v29 = vshrl.u32 %v5594_v40, 16 }
 0x12f   : > { %7747 = vst [vmem:[#allocation37_spill] sm:$0xff] %v5677_v47  ;;  %v5689_v10 = vor.u32 %v2108_v42, %v5677_v47  ;;  %v5692_v58 = vsel %vm7501_vm14, %v1349_v24, %v1350_v51  ;;  %v835_v49 = vand.u32 15, %v5601_v5  ;;  %v2178_v32 = vrot.slane %v2108_v42, 1 }
 0x130   : > { %7748 = vst [vmem:[#allocation38_spill] sm:$0xff] %v5692_v58  ;;  %v1352_v1 = vor.u32 %v1350_v51, %v7749_v29  ;;  %v5698_v30 = vor.u32 %v2100_v63, %v5685_v35  ;;  %v2176_v3 = vsel %vm7501_vm14, %v2174_v21, %v2175_v33  ;;  %v7750_v25 = vcombine.low %v4947_v43, %v5403_v36 }
 0x131   : > { %v7751_v39 = vmov 0  ;;  %v7754_v24 = vcombine.low %v4947_v43, %v5444_v8  ;;  %v7755_v51 = vmov 0  ;;  %v849_v5 = vand.u32 15, %v5654_v61  ;;  %2275 = vrot.lane.b32.xlu1 %v1990_v20, %s4801_s11 }
 0x132   : > { %vm5704_vm6 = vcmp.ne.s16.totalorder %v7750_v25, 0  ;;  %v7758_v42 = vand.u32 15, %v5485_v6  ;;  %v2177_v36 = vor.u32 %v2175_v33, %v2097_v56  ;;  %v2229_v25 = vsel %vm5643_vm3, %v2176_v3, 0 }
 0x133   : > { %v7752_v39 = vsel %vm5704_vm6, 4294967295, %v7751_v39  ;;  %vm5711_vm4 = vcmp.ne.s16.totalorder %v7754_v24, 0  ;;  %v7761_v63 = vcombine.low %v4947_v43, %v5089_v31  ;;  %v7762_v8 = vmov 0  ;;  %2321 = vrot.lane.b32.xlu0 %v2229_v25, %s4802_s12 }
 0x134   : > { %7753 = vst [vmem:[#allocation39_spill] sm:$0xff] %v7752_v39  ;;  %v7756_v51 = vsel %vm5711_vm4, 4294967295, %v7755_v51  ;;  %vm5718_vm1 = vcmp.ge.s32.totalorder %v7758_v42, 1  ;;  %v7765_v29 = vshll.u32 %v5584_v48, 16  ;;  %v7509_v6 = vshll.u32 %v5656_v13, 16 }
 0x135   : > { %7757 = vst [vmem:[#allocation40_spill] sm:$0xff] %v7756_v51  ;;  %vm5727_vm13 = vcmp.ne.s16.totalorder %v7761_v63, 0  ;;  %v7512_v33 = vshrl.u32 %v5584_v48, 16  ;;  %v863_v31 = vand.u32 15, %v5670_v11  ;;  %v709_v3 = vadd.s32 176, %v4900_v19  ;;  %v5744_v63 = vld [vmem:[#allocation2 + $0x78] sm:$0xff]  ;;  %1827 = vrot.lane.b32.xlu1 %v5357_v41, %s4801_s11 }
 0x136   : > { %v7763_v8 = vsel %vm5727_vm13, 4294967295, %v7762_v8  ;;  %v1353_v61 = vrot.slane %v7765_v29, 1  ;;  %v7766_v24 = vshrl.u32 %v5285_v28, 16  ;;  %v7521_v29 = vshrl.u32 %v5365_v7, 16 }
 0x137   : > { %7764 = vst [vmem:[#allocation41_spill] sm:$0xff] %v7763_v8  ;;  %vm7767_vm5 = vsmask.f32 7424  ;;  %v5751_v25 = vadd.s32 192, %v4900_v19  ;;  %v7518_v56 = vshll.u32 %v5744_v63, 16  ;;  %v1356_v47 = vrot.slane %v7509_v6, 1  ;;  %1825 = vrot.lane.b32.xlu0 %v5365_v7, %s4801_s11 }
 0x138   : > { %v5742_v42 = vrot.slane %v7766_v24, 7  ;;  %v5748_v20 = vsel %vm7767_vm5, %v1352_v1, %v1353_v61  ;;  %v1355_v11 = vor.u32 %v1353_v61, %v7512_v33  ;;  %v7517_v24 = vshrl.u32 %v5656_v13, 16  ;;  %vm7769_vm14 = vmmov %vm7767_vm5 }
 0x139   : > { %7768 = vst [vmem:[#allocation42_spill] sm:$0xff] %v5748_v20  ;;  %v2180_v44 = vor.u32 %v2178_v32, %v2105_v14  ;;  %v2179_v58 = vsel %vm7769_vm14, %v2177_v36, %v2178_v32  ;;  %v1334_v1 = vor.u32 %v5416_v38, %v7521_v29  ;;  %vm7770_vm5 = vsmask.f32 256 }
 0x13a   : > { %v5766_v20 = vsel %vm7770_vm5, %v5164_v16, %v5527_v15  ;;  %v2181_v14 = vrot.slane %v7518_v56, 1  ;;  %v7772_v32 = vcombine.low %v4947_v43, %v5114_v37  ;;  %v7773_v36 = vmov 0 }
 0x13b   : > { %7771 = vst [vmem:[#allocation43_spill] sm:$0xff] %v5766_v20  ;;  %vm7776_vm12 = vsmask.f32 7424  ;;  %v1358_v16 = vor.u32 %v1356_v47, %v7517_v24  ;;  %v7777_v15 = vshll.u32 %v5647_v4, 16  ;;  %vm5790_vm5 = vcmp.ge.s32.totalorder %v835_v49, 1  ;;  %v6430_v20 = vld [vmem:[#allocation2 + $0x58] sm:$0xff] }
 0x13c   : > { %vm5777_vm14 = vcmp.ne.s16.totalorder %v7772_v32, 0  ;;  %v5782_v38 = vsel %vm7776_vm12, %v1355_v11, %v1356_v47  ;;  %vm5794_vm11 = vcmp.ge.s32.totalorder %v849_v5, 1  ;;  %v713_v32 = vadd.s32 208, %v4900_v19 }
 0x13d   : > { %v7774_v36 = vsel %vm5777_vm14, 4294967295, %v7773_v36  ;;  %v5788_v61 = vrot.slane %v7777_v15, 1  ;;  %v7782_v11 = vand.u32 15, %v5592_v55  ;;  %vm7785_vm9 = vsmask.f32 7424  ;;  %v5810_v15 = vld [vmem:[#allocation2 + $0x28] sm:$0xff] }
 0x13e   : > { %7775 = vst [vmem:[#allocation44_spill] sm:$0xff] %v7774_v36  ;;  %v2182_v47 = vsel %vm7785_vm9, %v2180_v44, %v2181_v14  ;;  %vm7786_vm7 = vmmov %vm7785_vm9  ;;  %v877_v5 = vand.u32 15, %v709_v3  ;;  %v715_v24 = vadd.s32 224, %v4900_v19  ;;  %v2230_v56 = vsel %vm5704_vm6, %v2179_v58, 0  ;;  %v7864_v36 = vld [vmem:[#allocation6_spill] sm:$0xff] }
 0x13f   : > { %vm5801_vm12 = vcmp.ge.s32.totalorder %v7782_v11, 1  ;;  %v5808_v49 = vsel %vm7786_vm7, %v1358_v16, %v5788_v61  ;;  %7788 = vst [vmem:[#allocation46_spill] sm:$0xff] %v5810_v15  ;;  %v2231_v55 = vsel %vm5711_vm4, %v2182_v47, 0  ;;  %vm7789_vm3 = vmmov %vm7786_vm7  ;;  %v7790_v44 = vshrl.u32 %v5295_v59, 16  ;;  %2323 = vrot.lane.b32.xlu1 %v2230_v56, %s4802_s12 }
 0x140   : > { %7787 = vst [vmem:[#allocation45_spill] sm:$0xff] %v5808_v49  ;;  %v1336_v11 = vsel %vm7789_vm3, %v1334_v1, %v5434_v53  ;;  %2325 = vrot.lane.b32.xlu0 %v2231_v55, %s4802_s12  ;;  %v7791_v3 = vshll.u32 %v5285_v28, 16  ;;  %vm5826_vm7 = vcmp.ge.s32.totalorder %v863_v31, 1  ;;  %v891_v58 = vand.u32 15, %v5751_v25  ;;  %vm7808_vm6 = vmpackc.low %vm5718_vm1, %vm5718_vm1 }
 0x141   : > { %v1202_v29 = vrot.slane %v7790_v44, 7  ;;  %v717_v47 = vadd.s32 240, %v4900_v19  ;;  %v7534_v53 = vshrl.u32 %v5449_v18, 16  ;;  %v7794_v1 = vshll.u32 %v5295_v59, 16  ;;  %v8004_v19 = vld [vmem:[#allocation21_spill] sm:$0xff] }
 0x142   : > { %v1213_v16 = vor.u32 %v7791_v3, %v5742_v42  ;;  %v7532_v56 = vshrl.u32 %v5810_v15, 16  ;;  %v905_v55 = vand.u32 15, %v713_v32  ;;  %v1787_v28 = vsel %vm5727_vm13, %v1336_v11, 0  ;;  %v5855_v32 = vld [vmem:[#allocation2 + $0x38] sm:$0xff] }
 0x143   : > { %v1205_v44 = vor.u32 %v7794_v1, %v1202_v29  ;;  %v7795_v31 = vcombine.low %v4947_v43, %v5459_v57  ;;  %v7537_v59 = vshrl.u32 %v5744_v63, 16  ;;  %vm7798_vm4 = vsmask.f32 256  ;;  %7800 = vst [vmem:[#allocation48_spill] sm:$0xff] %v5855_v32  ;;  %2279 = vrot.lane.b32.xlu1 %v5744_v63, %s4801_s11 }
 0x144   : > { %v5850_v25 = vsel %vm7798_vm4, %v1202_v29, %v1213_v16  ;;  %v919_v3 = vand.u32 15, %v715_v24  ;;  %vm7801_vm13 = vcmask 1047552   ;;  %v7802_v57 = vmov 0  ;;  %1873 = vrot.lane.b32.xlu0 %v1787_v28, %s4802_s12 }
 0x145   : > { %vm5844_vm3 = vcmp.ne.s16.totalorder %v7795_v31, 0  ;;  %7799 = vst [vmem:[#allocation47_spill] sm:$0xff] %v5850_v25  ;;  %vm5859_vm0 = vmand %vm7801_vm13, %vm7785_vm9  ;;  %v1340_v11 = vor.u32 %v5496_v9, %v7534_v53  ;;  %v5868_v29 = vsel %vm7798_vm4, %v5377_v34, %v1205_v44  ;;  %v5872_v16 = vrot.slane %v7532_v56, 7 }
 0x146   : > { %v7803_v57 = vsel %vm5859_vm0, 4294967295, %v7802_v57  ;;  %7804 = vst [vmem:[#allocation49_spill] sm:$0xff] %v5868_v29  ;;  %v7533_v24 = vshll.u32 %v5810_v15, 16  ;;  %v2183_v1 = vor.u32 %v2181_v14, %v7537_v59  ;;  %vm5883_vm4 = vcmp.ge.s32.totalorder %v877_v5, 1  ;;  %vm7809_vm13 = vmpackc.low %vm5790_vm5, %vm5790_vm5 }
 0x147   : > { %7805 = vst [vmem:[#allocation50_spill] sm:$0xff] %v5872_v16  ;;  %v5893_v34 = vsel %vm7808_vm6, 65537, %v7721_v22  ;;  %v933_v44 = vand.u32 15, %v717_v47  ;;  %v5906_v5 = vsel %vm7809_vm13, 65537, %v7721_v22  ;;  %v2049_v28 = vshrl.u32 %v5855_v32, 16 }
 0x148   : > { %v5898_v14 = vor.u32 %v7533_v24, %v5872_v16  ;;  %vm5909_vm9 = vcmp.ge.s32.totalorder %v891_v58, 1  ;;  %v2874_v47 = vshll.u32 %v5855_v32, 16  ;;  %vm7812_vm5 = vsmask.f32 256  ;;  %1829 = vrot.lane.b32.xlu0 %v5449_v18, %s4801_s11 }
 0x149   : > { %v5923_v6 = vsel %vm7812_vm5, %v5562_v27, %v5565_v2  ;;  %vm7814_vm13 = vmmov %vm7812_vm5  ;;  %vm5930_vm2 = vcmp.ge.s32.totalorder %v905_v55, 1  ;;  %v1788_v56 = vsel %vm5777_vm14, %v5519_v17, 0  ;;  %vm7818_vm1 = vsmask.f32 7424  ;;  %v4785_v2 = vld [vmem:[%s7440_s3] sm:$0x3f]  }
 0x14a   : > { %7813 = vst [vmem:[#allocation51_spill] sm:$0xff] %v5923_v6  ;;  %v5928_v58 = vsel %vm7814_vm13, %v5487_v12, %v5574_v54  ;;  %v1342_v24 = vsel %vm7818_vm1, %v1340_v11, %v5539_v45  ;;  %v5939_v53 = vrot.slane %v2049_v28, 7  ;;  %vm5944_vm6 = vcmp.ge.s32.totalorder %v919_v3, 1  ;;  %1875 = vrot.lane.b32.xlu1 %v1788_v56, %s4802_s12  ;;  %vm7825_vm5 = vmpackc.low %vm5826_vm7, %vm5826_vm7  ;;  %v6031_v17 = vld [vmem:[%s7440_s3 + $0x8] sm:$0x3f]  }
 0x14b   : > { %7815 = vst [vmem:[#allocation52_spill] sm:$0xff] %v5928_v58  ;;  %v2200_v12 = vsel %vm5859_vm0, %v2183_v1, 0  ;;  %v5955_v45 = vrot.slane %v2874_v47, 1  ;;  %vm5963_vm13 = vcmp.ge.s32.totalorder %v933_v44, 1  ;;  %v5976_v55 = vsel %vm7825_vm5, 65537, %v7721_v22  ;;  %vm7826_vm1 = vmpackc.low %vm5794_vm11, %vm5794_vm11  ;;  %v6001_v1 = vld [vmem:[#allocation2 + $0x48] sm:$0xff] }
 0x14c   : > { %7819 = vst [vmem:[#allocation53_spill] sm:$0xff] %v5939_v53  ;;  %v5968_v56 = vor.u32 %v2874_v47, %v5939_v53  ;;  %v5984_v3 = vsel %vm7826_vm1, 65537, %v7721_v22  ;;  %vm1471_vm0 = vmpackc.low %vm5930_vm2, %vm5930_vm2  ;;  %v1789_v11 = vsel %vm5511_vm8, %v1342_v24, 0  ;;  %v4186_v37 = vcombine.low %v5906_v5, %v4947_v43  ;;  %v6018_v5 = vld [vmem:[#allocation2 + $0x10] sm:$0xff] }
 0x14d   : > { %7822 = vst [vmem:[#allocation54_spill] sm:$0xff] %v5955_v45  ;;  %vm7827_vm7 = vmpackc.low %vm5801_vm12, %vm5801_vm12  ;;  %v2232_v24 = vsel %vm5844_vm3, %v2200_v12, 0  ;;  %v6021_v47 = vor.u32 %v5955_v45, %v2049_v28  ;;  %vm7565_vm5 = vcmask 1045504   ;;  %1877 = vrot.lane.b32.xlu0 %v1789_v11, %s4802_s12  ;;  %v7834_v33 = vcombine.low %v5012_v62, %v4947_v43  ;;  %v7863_v58 = vld [vmem:[#allocation11_spill] sm:$0xff] }
 0x14e   : > { %v5995_v49 = vsel %vm7827_vm7, 65537, %v7721_v22  ;;  %7828 = vst [vmem:[#allocation55_spill] sm:$0xff] %v6001_v1  ;;  %vm7829_vm11 = vmpackc.low %vm5883_vm4, %vm5883_vm4  ;;  %vm7831_vm4 = vsmask.f32 256  ;;  %2327 = vrot.lane.b32.xlu1 %v2232_v24, %s4802_s12  ;;  %v7835_v59 = vmov 0  ;;  %v7837_v24 = vld [vmem:[#allocation4_spill] sm:$0xff]  ;;  %4752 = vmatprep.subr.msk.bf16.mxu1 %vm7565_vm5, %v4785_v2  ;;  %vm7951_vm8 = vnez %v7803_v57 }
 0x14f   : > { %v6009_v44 = vsel %vm7829_vm11, 65537, %v7721_v22  ;;  %vm1473_vm12 = vmpackc.low %vm5944_vm6, %vm5944_vm6  ;;  %7830 = vst [vmem:[#allocation56_spill] sm:$0xff] %v6021_v47  ;;  %v6026_v9 = vsel %vm7831_vm4, %v5629_v60, %v5632_v0  ;;  %v2451_v60 = vsel %vm7565_vm5, %v4785_v2, 0  ;;  %vm6048_vm7 = vcmp.ne.s16.totalorder %v7834_v33, 0  ;;  %4751 = vmatprep.subr.msk.bf16.mxu0 %vm7565_vm5, %v4785_v2  ;;  %v7851_v33 = vld [vmem:[#allocation26_spill] sm:$0xff] }
 0x150   : > { %7832 = vst [vmem:[#allocation57_spill] sm:$0xff] %v6026_v9  ;;  %7833 = vst [vmem:[#allocation58_spill] sm:$0xff] %v6031_v17  ;;  %v7836_v59 = vsel %vm6048_vm7, 4294967295, %v7835_v59  ;;  %v7838_v11 = vcombine.low %v7837_v24, %v4947_v43  ;;  %v7839_v28 = vmov 0  ;;  %v7538_v62 = vshrl.u32 %v6001_v1, 16  ;;  %v7842_v24 = vld [vmem:[#allocation30_spill] sm:$0xff]  ;;  %4686 = vmatpush3.bf16.msra.mxu1 %v2451_v60  ;;  %4550 = vmatpush3.bf16.msra.mxu0 %v2451_v60 }
 0x151   : > { %vm7841_vm4 = vmpackc.low %vm5909_vm9, %vm5909_vm9  ;;  %vm7843_vm1 = vsmask.f32 256  ;;  %v2832_v0 = vshrl.u32 %v6018_v5, 16  ;;  %v6084_v21 = vsel %vm1473_vm12, 65537, %v7721_v22  ;;  %vm7847_vm12 = vcmask 1040384   ;;  %4753 = vmatprep.subr.msk.bf16.mxu1 %vm7565_vm5, %v6031_v17  ;;  %v6125_v60 = vld [vmem:[#allocation2 + $0x50] sm:$0xff]  ;;  %1833 = vrot.lane.b32.xlu0 %v5535_v26, %s4801_s11 }
 0x152   : > { %vm6055_vm11 = vcmp.ne.s16.totalorder %v7838_v11, 0  ;;  %v6065_v12 = vsel %vm7841_vm4, 65537, %v7721_v22  ;;  %v6074_v11 = vsel %vm7843_vm1, %v7842_v24, %v5637_v50  ;;  %v6092_v50 = vsel %vm1471_vm0, 65537, %v7721_v22  ;;  %vm7845_vm9 = vmpackc.low %vm5963_vm13, %vm5963_vm13  ;;  %7856 = vst [vmem:[#allocation60_spill] sm:$0xff] %v6125_v60  ;;  %v7858_v24 = vld [vmem:[#allocation23_spill] sm:$0xff]  ;;  %v4789_v57 = vld [vmem:[#allocation2 + $0x8] sm:$0xff] }
 0x153   : > { %v7840_v28 = vsel %vm6055_vm11, 4294967295, %v7839_v28  ;;  %7844 = vst [vmem:[#allocation4_spill] sm:$0xff] %v6074_v11  ;;  %v6100_v2 = vsel %vm7845_vm9, 65537, %v7721_v22  ;;  %vm7846_vm6 = vmmov %vm7843_vm1  ;;  %v7848_v27 = vmov 0  ;;  %v6110_v31 = vrot.slane %v7538_v62, 7  ;;  %1831 = vrot.lane.b32.xlu1 %v7858_v24, %s4801_s11 }
 0x154   : > { %vm6104_vm1 = vmand %vm7847_vm12, %vm7846_vm6  ;;  %vm7852_vm2 = vsmask.f32 7424  ;;  %v7857_v62 = vshrl.u32 %v5357_v41, 16  ;;  %v6178_v15 = vrot.slane %v2832_v0, 7  ;;  %vm6184_vm9 = vcmp.ne.s16.totalorder %v4186_v37, 0 }
 0x155   : > { %v7849_v27 = vsel %vm6104_vm1, 4294967295, %v7848_v27  ;;  %7850 = vst [vmem:[#allocation30_spill] sm:$0xff] %v6110_v31  ;;  %v6116_v54 = vsel %vm7852_vm2, %v6021_v47, %v7851_v33  ;;  %vm7854_vm0 = vmmov %vm7846_vm6  ;;  %v2835_v33 = vshll.u32 %v6018_v5, 16  ;;  %v7881_v45 = vshll.u32 %v5357_v41, 16  ;;  %v7888_v41 = vld [vmem:[#allocation5_spill] sm:$0xff] }
 0x156   : > { %7853 = vst [vmem:[#allocation26_spill] sm:$0xff] %v6116_v54  ;;  %v6121_v22 = vsel %vm7854_vm0, %v5685_v35, %v5689_v10  ;;  %v6129_v52 = vrot.slane %v7857_v62, 7  ;;  %v7861_v62 = vshll.u32 %v6001_v1, 16  ;;  %v1313_v35 = vsel %vm6104_vm1, 0, %v7863_v58  ;;  %v7868_v54 = vld [vmem:[#allocation34_spill] sm:$0xff]  ;;  %vm7869_vm4 = vmmov %vm7854_vm0  ;;  %v6168_v1 = vld [vmem:[#allocation2 + $0x60] sm:$0xff] }
 0x157   : > { %7855 = vst [vmem:[#allocation59_spill] sm:$0xff] %v6121_v22  ;;  %v7859_v22 = vld [vmem:[#allocation13_spill] sm:$0xff]  ;;  %v7865_v10 = vcombine.low %v7864_v36, %v4947_v43  ;;  %v6166_v6 = vsel %vm7869_vm4, %v7868_v54, %v5698_v30  ;;  %7871 = vst [vmem:[#allocation11_spill] sm:$0xff] %v6168_v1  ;;  %v7872_v58 = vld [vmem:[#allocation32_spill] sm:$0xff]  ;;  %v2975_v30 = vrot.slane %v2835_v33, 1  ;;  %v7877_v54 = vmov 0 }
 0x158   : > { %v7860_v9 = vshll.u32 %v7859_v22, 16  ;;  %v6146_v8 = vor.u32 %v7861_v62, %v6110_v31  ;;  %7870 = vst [vmem:[#allocation13_spill] sm:$0xff] %v6166_v6  ;;  %v1790_v36 = vsel %vm5553_vm10, %v7872_v58, 0  ;;  %v7876_v62 = vshrl.u32 %v5365_v7, 16  ;;  %v7883_v6 = vld [vmem:[#allocation18_spill] sm:$0xff]  ;;  %vm7889_vm6 = vmmov %vm7852_vm2 }
 0x159   : > { %vm6158_vm13 = vcmp.ne.s16.totalorder %v7865_v10, 0  ;;  %v7874_v10 = vld [vmem:[#allocation36_spill] sm:$0xff]  ;;  %1879 = vrot.lane.b32.xlu1 %v1790_v36, %s4802_s12  ;;  %v7878_v54 = vsel %vm6184_vm9, 4294967295, %v7877_v54  ;;  %v7879_v58 = vshrl.u32 %v6125_v60, 16  ;;  %v1229_v47 = vor.u32 %v7881_v45, %v6129_v52  ;;  %vm7896_vm2 = vmmov %vm7854_vm0 }
 0x15a   : > { %v2139_v11 = vrot.slane %v7860_v9, 1  ;;  %7862 = vst [vmem:[#allocation23_spill] sm:$0xff] %v6146_v8  ;;  %v7866_v9 = vmov 0  ;;  %v1791_v32 = vsel %vm5580_vm15, %v7874_v10, 0  ;;  %v1218_v29 = vrot.slane %v7876_v62, 7 }
 0x15b   : > { %v7867_v9 = vsel %vm6158_vm13, 4294967295, %v7866_v9  ;;  %1881 = vrot.lane.b32.xlu0 %v1791_v32, %s4802_s12  ;;  %v6190_v17 = vrot.slane %v7879_v58, 7  ;;  %v7882_v62 = vshrl.u32 %v7859_v22, 16  ;;  %v7884_v32 = vshll.u32 %v7883_v6, 16  ;;  %v7891_v22 = vld [vmem:[#allocation22_spill] sm:$0xff] }
 0x15c   : > { %v7885_v37 = vshll.u32 %v5365_v7, 16  ;;  %v7558_v8 = vshrl.u32 %v6168_v1, 16  ;;  %v7886_v58 = vshrl.u32 %v5744_v63, 16  ;;  %v7887_v10 = vshrl.u32 %v5449_v18, 16 }
 0x15d   : > { %7880 = vst [vmem:[#allocation6_spill] sm:$0xff] %v6190_v17  ;;  %v2141_v36 = vor.u32 %v2139_v11, %v7882_v62  ;;  %v2977_v25 = vrot.slane %v7884_v32, 1  ;;  %v6211_v45 = vsel %vm7889_vm6, %v7888_v41, %v2139_v11  ;;  %v7892_v62 = vcombine.low %v7891_v22, %v4947_v43  ;;  %v6237_v22 = vld [vmem:[#allocation2 + $0x70] sm:$0xff]  ;;  %1835 = vrot.lane.b32.xlu1 %v5523_v23, %s4801_s11 }
 0x15e   : > { %v1221_v31 = vor.u32 %v7885_v37, %v1218_v29  ;;  %v2115_v53 = vrot.slane %v7886_v58, 7  ;;  %v6207_v16 = vrot.slane %v7887_v10, 7  ;;  %7890 = vst [vmem:[#allocation34_spill] sm:$0xff] %v6211_v45  ;;  %v7895_v7 = vshll.u32 %v6125_v60, 16  ;;  %7900 = vst [vmem:[#allocation5_spill] sm:$0xff] %v6237_v22 }
 0x15f   : > { %vm6216_vm12 = vcmp.ne.s16.totalorder %v7892_v62, 0  ;;  %v6226_v58 = vsel %vm7896_vm2, %v1218_v29, %v1229_v47  ;;  %v6234_v11 = vrot.slane %v7558_v8, 7  ;;  %1837 = vrot.lane.b32.xlu0 %v5594_v40, %s4801_s11  ;;  %v7901_v29 = vld [vmem:[#allocation12_spill] sm:$0xff]  ;;  %v2976_v62 = vor.u32 %v2975_v30, %v2832_v0  ;;  %v7907_v47 = vld [vmem:[#allocation7_spill] sm:$0xff] }
 0x160   : > { %v6223_v37 = vor.u32 %v7895_v7, %v6190_v17  ;;  %7897 = vst [vmem:[#allocation32_spill] sm:$0xff] %v6226_v58  ;;  %v6230_v10 = vsel %vm7854_vm0, %v5742_v42, %v1221_v31  ;;  %v6248_v42 = vsel %vm6055_vm11, %v1313_v35, 0  ;;  %v6251_v31 = vor.u32 %v2835_v33, %v6178_v15  ;;  %v7920_v17 = vld [vmem:[#allocation33_spill] sm:$0xff] }
 0x161   : > { %7898 = vst [vmem:[#allocation36_spill] sm:$0xff] %v6230_v10  ;;  %7899 = vst [vmem:[#allocation18_spill] sm:$0xff] %v6234_v11  ;;  %v7902_v7 = vcombine.low %v5984_v3, %v4947_v43  ;;  %v7903_v8 = vmov 0  ;;  %v7905_v41 = vshrl.u32 %v7883_v6, 16  ;;  %vm7908_vm6 = vnez %v7907_v47 }
 0x162   : > { %vm7909_vm2 = vsmask.f32 7424  ;;  %v7911_v0 = vcombine.low %v5976_v55, %v4947_v43  ;;  %v7912_v3 = vmov 0  ;;  %v7914_v33 = vshll.u32 %v6168_v1, 16 }
 0x163   : > { %vm6256_vm4 = vcmp.ne.s16.totalorder %v7902_v7, 0  ;;  %v6262_v58 = vor.u32 %v2977_v25, %v7905_v41  ;;  %v6268_v10 = vsel %vm7909_vm2, %v2141_v36, %v2975_v30  ;;  %v7916_v41 = vshrl.u32 %v7858_v24, 16 }
 0x164   : > { %v7904_v8 = vsel %vm6256_vm4, 4294967295, %v7903_v8  ;;  %7910 = vst [vmem:[#allocation12_spill] sm:$0xff] %v6268_v10  ;;  %vm6273_vm0 = vcmp.ne.s16.totalorder %v7911_v0, 0  ;;  %v6280_v6 = vor.u32 %v7914_v33, %v6234_v11  ;;  %v1288_v35 = vshrl.u32 %v5647_v4, 16  ;;  %v7922_v33 = vld [vmem:[#allocation42_spill] sm:$0xff]  ;;  %v7923_v11 = vld [vmem:[#allocation35_spill] sm:$0xff] }
 0x165   : > { %7906 = vst [vmem:[#allocation22_spill] sm:$0xff] %v6262_v58  ;;  %v7913_v3 = vsel %vm6273_vm0, 4294967295, %v7912_v3  ;;  %v1242_v7 = vrot.slane %v7916_v41, 7  ;;  %v7917_v30 = vshll.u32 %v5744_v63, 16  ;;  %v7569_v60 = vshrl.u32 %v6237_v22, 16  ;;  %v7919_v58 = vld [vmem:[#allocation38_spill] sm:$0xff] }
 0x166   : > { %7915 = vst [vmem:[#allocation7_spill] sm:$0xff] %v6280_v6  ;;  %v7918_v55 = vshrl.u32 %v5535_v26, 16  ;;  %vm7921_vm2 = vnez %v7920_v17  ;;  %vm7924_vm5 = vnez %v7923_v11  ;;  %v7925_v41 = vshll.u32 %v5449_v18, 16  ;;  %v7930_v18 = vld [vmem:[#allocation24_spill] sm:$0xff] }
 0x167   : > { %v2118_v36 = vor.u32 %v7917_v30, %v2115_v53  ;;  %v1792_v1 = vsel %vm7921_vm2, %v7919_v58, 0  ;;  %v1793_v6 = vsel %vm7924_vm5, %v7922_v33, 0  ;;  %v1361_v63 = vor.u32 %v5788_v61, %v1288_v35  ;;  %v6304_v53 = vld [vmem:[#allocation2 + $0x20] sm:$0xff] }
 0x168   : > { %v6290_v0 = vrot.slane %v7918_v55, 7  ;;  %v1237_v45 = vor.u32 %v7925_v41, %v6207_v16  ;;  %1883 = vrot.lane.b32.xlu1 %v1792_v1, %s4802_s12  ;;  %1885 = vrot.lane.b32.xlu0 %v1793_v6, %s4802_s12  ;;  %v7926_v30 = vld [vmem:[#allocation37_spill] sm:$0xff]  ;;  %vm7927_vm15 = vsmask.f32 256  ;;  %v6312_v58 = vrot.slane %v7569_v60, 7 }
 0x169   : > { %v6308_v55 = vsel %vm7927_vm15, %v7926_v30, %v2118_v36  ;;  %v7931_v6 = vld [vmem:[#allocation9_spill] sm:$0xff]  ;;  %vm7933_vm2 = vsmask.f32 7424  ;;  %v7934_v36 = vcombine.low %v6009_v44, %v4947_v43  ;;  %v7935_v30 = vmov 0 }
 0x16a   : > { %7928 = vst [vmem:[#allocation38_spill] sm:$0xff] %v6308_v55  ;;  %7929 = vst [vmem:[#allocation42_spill] sm:$0xff] %v6312_v58  ;;  %v6322_v41 = vsel %vm7933_vm2, %v2976_v62, %v2977_v25  ;;  %vm7937_vm10 = vsmask.f32 256  ;;  %v6335_v33 = vld [vmem:[#allocation2 + $0x80] sm:$0xff]  ;;  %v7940_v1 = vshrl.u32 %v5523_v23, 16  ;;  %v7948_v10 = vcombine.low %v6092_v50, %v4947_v43 }
 0x16b   : > { %vm6327_vm15 = vcmp.ne.s16.totalorder %v7934_v36, 0  ;;  %v6333_v60 = vsel %vm7937_vm10, %v6129_v52, %v1237_v45  ;;  %7939 = vst [vmem:[#allocation24_spill] sm:$0xff] %v6335_v33  ;;  %v7941_v61 = vshrl.u32 %v5594_v40, 16  ;;  %v7942_v62 = vshrl.u32 %v5584_v48, 16 }
 0x16c   : > { %v7936_v30 = vsel %vm6327_vm15, 4294967295, %v7935_v30  ;;  %7938 = vst [vmem:[#allocation37_spill] sm:$0xff] %v6333_v60  ;;  %v1258_v55 = vrot.slane %v7940_v1, 7  ;;  %v7943_v36 = vcombine.low %v6065_v12, %v4947_v43  ;;  %v7944_v11 = vmov 0  ;;  %1839 = vrot.lane.b32.xlu1 %v5584_v48, %s4801_s11  ;;  %1841 = vrot.lane.b32.xlu0 %v5656_v13, %s4801_s11 }
 0x16d   : > { %v6341_v25 = vrot.slane %v7941_v61, 7  ;;  %v6345_v44 = vrot.slane %v7942_v62, 7  ;;  %v7946_v52 = vshll.u32 %v6237_v22, 16  ;;  %v7947_v1 = vshrl.u32 %v5656_v13, 16 }
 0x16e   : > { %vm6350_vm2 = vcmp.ne.s16.totalorder %v7943_v36, 0  ;;  %v1290_v17 = vrot.slane %v1288_v35, 7  ;;  %vm6367_vm10 = vcmp.ne.s16.totalorder %v7948_v10, 0  ;;  %v7949_v12 = vmov 0 }
 0x16f   : > { %v7945_v11 = vsel %vm6350_vm2, 4294967295, %v7944_v11  ;;  %v6357_v45 = vor.u32 %v7946_v52, %v6312_v58  ;;  %v6361_v61 = vrot.slane %v7947_v1, 7  ;;  %v7950_v12 = vsel %vm6367_vm10, 4294967295, %v7949_v12 }
 0x170   : > { %v1380_v35 = vsel %vm7951_vm8, %v1361_v63, 0  ;;  %v7952_v50 = vcombine.low %v6084_v21, %v4947_v43  ;;  %v7953_v10 = vmov 0  ;;  %v7955_v52 = vcombine.low %v6100_v2, %v4947_v43 }
 0x171   : > { %v7956_v1 = vmov 0  ;;  %v7958_v62 = vshll.u32 %v7858_v24, 16  ;;  %v7959_v63 = vshll.u32 %v5535_v26, 16  ;;  %vm7960_vm5 = vnez %v7752_v39  ;;  %v6410_v24 = vld [vmem:[#allocation2 + $0x30] sm:$0xff] }
 0x172   : > { %vm6383_vm14 = vcmp.ne.s16.totalorder %v7952_v50, 0  ;;  %vm6390_vm9 = vcmp.ne.s16.totalorder %v7955_v52, 0  ;;  %v1794_v50 = vsel %vm7960_vm5, %v5782_v38, 0  ;;  %vm7962_vm13 = vnez %v7756_v51  ;;  %v6426_v52 = vld [vmem:[#allocation2 + $0x88] sm:$0xff] }
 0x173   : > { %v7954_v10 = vsel %vm6383_vm14, 4294967295, %v7953_v10  ;;  %v7957_v1 = vsel %vm6390_vm9, 4294967295, %v7956_v1  ;;  %v1245_v60 = vor.u32 %v7958_v62, %v1242_v7  ;;  %v1253_v21 = vor.u32 %v7959_v63, %v6290_v0  ;;  %v7961_v62 = vld [vmem:[#allocation45_spill] sm:$0xff]  ;;  %1887 = vrot.lane.b32.xlu1 %v1794_v50, %s4802_s12 }
 0x174   : > { %v1795_v26 = vsel %vm7962_vm13, %v7961_v62, 0  ;;  %v6415_v63 = vld [vmem:[#allocation2 + $0x40] sm:$0xff]  ;;  %v7963_v38 = vshrl.u32 %v6335_v33, 16  ;;  %vm7964_vm5 = vsmask.f32 256  ;;  %v1796_v36 = vsel %vm5844_vm3, %v1380_v35, 0 }
 0x175   : > { %v6424_v22 = vsel %vm7964_vm5, %v6207_v16, %v1245_v60  ;;  %vm7966_vm13 = vmmov %vm7964_vm5  ;;  %1889 = vrot.lane.b32.xlu0 %v1795_v26, %s4802_s12  ;;  %v7968_v16 = vshll.u32 %v6304_v53, 16  ;;  %v7969_v51 = vshll.u32 %v6335_v33, 16  ;;  %v7597_v35 = vshrl.u32 %v6430_v20, 16 }
 0x176   : > { %v6419_v39 = vrot.slane %v7963_v38, 7  ;;  %7965 = vst [vmem:[#allocation9_spill] sm:$0xff] %v6424_v22  ;;  %v6436_v38 = vsel %vm7966_vm13, %v1242_v7, %v1253_v21  ;;  %v7970_v21 = vshrl.u32 %v6304_v53, 16  ;;  %v7973_v33 = vshll.u32 %v5584_v48, 16  ;;  %v4788_v48 = vld [vmem:[#allocation2] sm:$0xff]  ;;  %vm7978_vm13 = vmmov %vm7964_vm5 }
 0x177   : > { %7967 = vst [vmem:[#allocation45_spill] sm:$0xff] %v6436_v38  ;;  %v6443_v60 = vrot.slane %v7968_v16, 1  ;;  %v7971_v16 = vshll.u32 %v5523_v23, 16  ;;  %v7975_v26 = vshll.u32 %v6426_v52, 16  ;;  %1843 = vrot.lane.b32.xlu1 %v5647_v4, %s4801_s11  ;;  %vm7987_vm4 = vmmov %vm7978_vm13 }
 0x178   : > { %v6449_v58 = vor.u32 %v7969_v51, %v6419_v39  ;;  %v2849_v50 = vrot.slane %v7970_v21, 7  ;;  %v7972_v51 = vshll.u32 %v5594_v40, 16  ;;  %v1277_v7 = vor.u32 %v7973_v33, %v6345_v44  ;;  %vm7989_vm2 = vmmov %vm7987_vm4 }
 0x179   : > { %v1261_v2 = vor.u32 %v7971_v16, %v1258_v55  ;;  %v7974_v21 = vshll.u32 %v5656_v13, 16  ;;  %v6472_v62 = vrot.slane %v7975_v26, 1  ;;  %v2951_v16 = vshrl.u32 %v6426_v52, 16  ;;  %2249 = vrot.lane.b32.xlu0 %v4788_v48, %s4801_s11 }
 0x17a   : > { %v1269_v22 = vor.u32 %v7972_v51, %v6341_v25  ;;  %v7976_v40 = vshll.u32 %v5647_v4, 16  ;;  %v7977_v13 = vshrl.u32 %v6410_v24, 16  ;;  %v7981_v4 = vmov 0 }
 0x17b   : > { %v1285_v38 = vor.u32 %v7974_v21, %v6361_v61  ;;  %v6476_v23 = vsel %vm7964_vm5, %v6290_v0, %v1261_v2  ;;  %v7979_v21 = vld [vmem:[#allocation25_spill] sm:$0xff]  ;;  %v7984_v48 = vmov 0  ;;  %v7994_v26 = vcombine.low %v5995_v49, %v4947_v43  ;;  %1891 = vrot.lane.b32.xlu1 %v1796_v36, %s4802_s12 }
 0x17c   : > { %v1293_v51 = vor.u32 %v7976_v40, %v1290_v17  ;;  %v2865_v33 = vrot.slane %v7977_v13, 7  ;;  %v6491_v2 = vsel %vm7978_vm13, %v1258_v55, %v1269_v22  ;;  %v7980_v17 = vcombine.low %v7979_v21, %v4947_v43 }
 0x17d   : > { %v7983_v40 = vcombine.low %v5532_v46, %v4947_v43  ;;  %v3021_v55 = vor.u32 %v6472_v62, %v2951_v16  ;;  %v6514_v21 = vsel %vm7978_vm13, %v6341_v25, %v1277_v7  ;;  %v6525_v13 = vsel %vm7987_vm4, %v6345_v44, %v1285_v38  ;;  %v1816_v25 = vpop.permute.xlu1 %1815  ;;  %2251 = vrot.lane.b32.xlu0 %v4789_v57, %s4801_s11 }
 0x17e   : > { %vm6496_vm5 = vcmp.ne.s16.totalorder %v7980_v17, 0  ;;  %v7986_v17 = vshrl.u32 %v6415_v63, 16  ;;  %7988 = vst [vmem:[#allocation25_spill] sm:$0xff] %v6525_v13  ;;  %v6529_v22 = vsel %vm7989_vm2, %v6361_v61, %v1293_v51  ;;  %v7991_v7 = vcombine.low %v5893_v34, %v4947_v43  ;;  %v6547_v61 = vld [vmem:[#allocation2 + $0x78] sm:$0xff]  ;;  %v8020_v13 = vld [vmem:[#allocation50_spill] sm:$0xff] }
 0x17f   : > { %v7982_v4 = vsel %vm6496_vm5, 4294967295, %v7981_v4  ;;  %vm6503_vm0 = vcmp.ne.s16.totalorder %v7983_v40, 0  ;;  %v6518_v40 = vld [vmem:[#allocation2 + $0x68] sm:$0xff]  ;;  %7990 = vst [vmem:[#allocation61_spill] sm:$0xff] %v6529_v22  ;;  %vm6541_vm15 = vcmp.ne.s16.totalorder %v7994_v26, 0  ;;  %v7995_v0 = vmov 0  ;;  %v1814_v26 = vpop.permute.xlu0 %1813  ;;  %3087 = vrot.lane.b32.xlu1 %v6018_v5, %s4801_s11 }
 0x180   : > { %v7985_v48 = vsel %vm6503_vm0, 4294967295, %v7984_v48  ;;  %v2881_v46 = vrot.slane %v7986_v17, 7  ;;  %vm6534_vm13 = vcmp.ne.s16.totalorder %v7991_v7, 0  ;;  %v7992_v17 = vmov 0  ;;  %v7999_v7 = vld [vmem:[#allocation17_spill] sm:$0xff]  ;;  %v8000_v34 = vld [vmem:[#allocation8_spill] sm:$0xff] }
 0x181   : > { %v7993_v17 = vsel %vm6534_vm13, 4294967295, %v7992_v17  ;;  %v7996_v0 = vsel %vm6541_vm15, 4294967295, %v7995_v0  ;;  %v2905_v44 = vrot.slane %v7597_v35, 7  ;;  %v3038_v38 = vsel %vm7951_vm8, %v3021_v55, 0  ;;  %vm8001_vm8 = vmmov %vm7989_vm2  ;;  %v1820_v22 = vpop.permute.xlu1 %1819 }
 0x182   : > { %v7997_v49 = vsel %vm6048_vm7, %v7901_v29, 0  ;;  %vm7998_vm4 = vcmask 31744   ;;  %v6568_v55 = vsel %vm5844_vm3, %v3038_v38, 0  ;;  %v6573_v43 = vsel %vm8001_vm8, %v8000_v34, %v7999_v7  ;;  %vm8005_vm3 = vmmov %vm8001_vm8  ;;  %v4790_v7 = vld [vmem:[#allocation2 + $0x18] sm:$0xff] }
 0x183   : > { %v6562_v51 = vsel %vm7998_vm4, %v7997_v49, %v1816_v25  ;;  %v2974_v29 = vsel %vm6104_vm1, 0, %v6251_v31  ;;  %vm8002_vm2 = vmmov %vm7998_vm4  ;;  %v6588_v38 = vsel %vm8005_vm3, %v6178_v15, %v8004_v19  ;;  %v8006_v35 = vshll.u32 %v6304_v53, 16  ;;  %3089 = vrot.lane.b32.xlu0 %v4790_v7, %s4801_s11 }
 0x184   : > { %v1895_v36 = vsel %vm8002_vm2, %v6248_v42, %v1814_v26  ;;  %v6583_v49 = vsel %vm6055_vm11, %v2974_v29, 0  ;;  %vm8007_vm4 = vmmov %vm8005_vm3  ;;  %v8009_v29 = vshll.u32 %v6410_v24, 16  ;;  %v8012_v19 = vshll.u32 %v6415_v63, 16 }
 0x185   : > { %8003 = vst [vmem:[#allocation17_spill] sm:$0xff] %v6583_v49  ;;  %v2852_v42 = vor.u32 %v8006_v35, %v2849_v50  ;;  %v6598_v26 = vsel %vm8007_vm4, %v2849_v50, %v5898_v14  ;;  %vm8010_vm8 = vmmov %vm8005_vm3  ;;  %v8013_v14 = vld [vmem:[#allocation16_spill] sm:$0xff]  ;;  %vm8018_vm4 = vnez %v7867_v9  ;;  %vm8031_vm7 = vcmask 31744  }
 0x186   : > { %8008 = vst [vmem:[#allocation8_spill] sm:$0xff] %v6598_v26  ;;  %v2868_v25 = vor.u32 %v8009_v29, %v2865_v33  ;;  %v6604_v15 = vsel %vm8010_vm8, %v2865_v33, %v5968_v56  ;;  %v2884_v57 = vor.u32 %v8012_v19, %v2881_v46  ;;  %vm8014_vm2 = vmmov %vm8005_vm3  ;;  %v8015_v29 = vld [vmem:[#allocation20_spill] sm:$0xff]  ;;  %v8019_v19 = vshrl.u32 %v6518_v40, 16  ;;  %v8023_v26 = vld [vmem:[#allocation53_spill] sm:$0xff] }
 0x187   : > { %8011 = vst [vmem:[#allocation21_spill] sm:$0xff] %v6604_v15  ;;  %v6615_v50 = vsel %vm8014_vm2, %v8013_v14, %v6251_v31  ;;  %vm8016_vm3 = vmmov %vm8014_vm2  ;;  %vm8044_vm11 = vnez %v7904_v8  ;;  %vm8045_vm1 = vnez %v7913_v3 }
 0x188   : > { %v6619_v56 = vsel %vm8016_vm3, %v8015_v29, %v2852_v42  ;;  %v2921_v49 = vrot.slane %v8019_v19, 7  ;;  %vm8021_vm8 = vmmov %vm8014_vm2  ;;  %v8022_v42 = vshrl.u32 %v6547_v61, 16  ;;  %v2953_v29 = vrot.slane %v2951_v16, 7 }
 0x189   : > { %8017 = vst [vmem:[#allocation16_spill] sm:$0xff] %v6619_v56  ;;  %v6632_v31 = vsel %vm8021_vm8, %v8020_v13, %v2868_v25  ;;  %v6644_v35 = vsel %vm8014_vm2, %v8023_v26, %v2884_v57  ;;  %v8025_v56 = vld [vmem:[#allocation23_spill] sm:$0xff]  ;;  %vm8026_vm3 = vmmov %vm8014_vm2  ;;  %v8027_v25 = vld [vmem:[#allocation30_spill] sm:$0xff]  ;;  %v8030_v19 = vsel %vm8018_vm4, %v7930_v18, 0  ;;  %v1862_v57 = vpop.permute.xlu0 %1861  ;;  %v8043_v18 = vshll.u32 %v6518_v40, 16 }
 0x18a   : > { %v2937_v14 = vrot.slane %v8022_v42, 7  ;;  %8024 = vst [vmem:[#allocation20_spill] sm:$0xff] %v6644_v35  ;;  %v6648_v13 = vsel %vm8026_vm3, %v2881_v46, %v8025_v56  ;;  %vm8028_vm8 = vmmov %vm8014_vm2  ;;  %v8029_v42 = vshll.u32 %v6430_v20, 16  ;;  %v6662_v15 = vsel %vm8031_vm7, %v8030_v19, %v1820_v22  ;;  %v8032_v46 = vld [vmem:[#allocation34_spill] sm:$0xff] }
 0x18b   : > { %v6653_v16 = vsel %vm8028_vm8, %v8027_v25, %v6223_v37  ;;  %v8033_v56 = vsel %vm7908_vm6, %v8032_v46, 0  ;;  %vm8034_vm2 = vnez %v7931_v6  ;;  %v8035_v37 = vld [vmem:[#allocation12_spill] sm:$0xff]  ;;  %vm8037_vm7 = vnez %v7878_v54  ;;  %v8039_v46 = vld [vmem:[#allocation6_spill] sm:$0xff]  ;;  %vm8041_vm4 = vmmov %vm8028_vm8 }
 0x18c   : > { %v2908_v33 = vor.u32 %v8029_v42, %v2905_v44  ;;  %2297 = vrot.lane.b32.xlu1 %v8033_v56, %s4802_s12  ;;  %v8036_v25 = vsel %vm8034_vm2, %v8035_v37, 0  ;;  %vm8038_vm3 = vcmask 64512   ;;  %v8040_v37 = vld [vmem:[#allocation7_spill] sm:$0xff]  ;;  %v2924_v35 = vor.u32 %v8043_v18, %v2921_v49  ;;  %v8069_v18 = vld [vmem:[#allocation49_spill] sm:$0xff] }
 0x18d   : > { %2299 = vrot.lane.b32.xlu0 %v8036_v25, %s4802_s12  ;;  %v6684_v42 = vsel %vm8038_vm3, %v1895_v36, %v1862_v57  ;;  %v6692_v25 = vsel %vm8041_vm4, %v2905_v44, %v8040_v37  ;;  %vm8046_vm3 = vmmov %vm8041_vm4  ;;  %v8049_v44 = vld [vmem:[#allocation18_spill] sm:$0xff]  ;;  %v8055_v36 = vshll.u32 %v6426_v52, 16  ;;  %v1577_v6 = vsel %vm6503_vm0, %v8069_v18, 0 }
 0x18e   : > { %v6688_v56 = vsel %vm8028_vm8, %v8039_v46, %v2908_v33  ;;  %8042 = vst [vmem:[#allocation50_spill] sm:$0xff] %v6692_v25  ;;  %v6704_v57 = vsel %vm8046_vm3, %v2921_v49, %v6357_v45  ;;  %v8048_v33 = vshll.u32 %v6547_v61, 16  ;;  %vm8050_vm4 = vmmov %vm8046_vm3  ;;  %vm8052_vm8 = vnez %v7945_v11  ;;  %v1818_v45 = vpop.permute.xlu0 %1817 }
 0x18f   : > { %8047 = vst [vmem:[#allocation53_spill] sm:$0xff] %v6704_v57  ;;  %v6710_v37 = vsel %vm8050_vm4, %v8049_v44, %v2924_v35  ;;  %vm8053_vm13 = vmmov %vm8046_vm3  ;;  %v2956_v19 = vor.u32 %v8055_v36, %v2953_v29  ;;  %v8056_v49 = vsel %vm7908_vm6, %v6322_v41, 0  ;;  %v8057_v35 = vld [vmem:[#allocation22_spill] sm:$0xff]  ;;  %vm8058_vm3 = vsmask.f32 7424  ;;  %v8062_v36 = vld [vmem:[#allocation43_spill] sm:$0xff] }
 0x190   : > { %v2940_v46 = vor.u32 %v8048_v33, %v2937_v14  ;;  %8051 = vst [vmem:[#allocation23_spill] sm:$0xff] %v6710_v37  ;;  %v6717_v22 = vsel %vm8053_vm13, %v2937_v14, %v6449_v58  ;;  %3135 = vrot.lane.b32.xlu1 %v8056_v49, %s4802_s12  ;;  %v2981_v33 = vsel %vm8058_vm3, %v8057_v35, %v6443_v60  ;;  %v8060_v14 = vld [vmem:[#allocation42_spill] sm:$0xff]  ;;  %vm8064_vm6 = vcmask 31744   ;;  %vm8065_vm3 = vmmov %vm8050_vm4 }
 0x191   : > { %8054 = vst [vmem:[#allocation30_spill] sm:$0xff] %v6717_v22  ;;  %2253 = vrot.lane.b32.xlu0 %v6018_v5, %s4801_s11  ;;  %vm8059_vm13 = vnez %v7936_v30  ;;  %v8063_v5 = vsel %vm6216_vm12, %v8062_v36, 0  ;;  %v6751_v35 = vsel %vm8065_vm3, %v6419_v39, %v2956_v19  ;;  %v3056_v47 = vsel %vm8034_vm2, %v2981_v33, 0  ;;  %vm8072_vm2 = vmmov %vm8064_vm6 }
 0x192   : > { %v6736_v29 = vsel %vm8050_vm4, %v8060_v14, %v2940_v46  ;;  %v1901_v44 = vsel %vm8064_vm6, %v8063_v5, %v1818_v45  ;;  %8066 = vst [vmem:[#allocation12_spill] sm:$0xff] %v6751_v35  ;;  %v6753_v46 = vpop.permute.xlu1 %1863  ;;  %v1866_v36 = vpop.permute.xlu0 %1865  ;;  %vm8067_vm4 = vcmask 64512   ;;  %v8068_v5 = vld [vmem:[#allocation47_spill] sm:$0xff]  ;;  %vm8098_vm0 = vcmask 64512  }
 0x193   : > { %8061 = vst [vmem:[#allocation34_spill] sm:$0xff] %v6736_v29  ;;  %v6763_v45 = vsel %vm8067_vm4, %v1901_v44, %v1866_v36  ;;  %v1578_v39 = vsel %vm6496_vm5, %v8068_v5, 0  ;;  %v8073_v36 = vshrl.u32 %v6304_v53, 16 }
 0x194   : > { %3137 = vrot.lane.b32.xlu1 %v3056_v47, %s4802_s12  ;;  %v8070_v47 = vld [vmem:[#allocation46_spill] sm:$0xff] }
 0x195   : > { %2255 = vrot.lane.b32.xlu0 %v4790_v7, %s4801_s11  ;;  %v8071_v7 = vshll.u32 %v8070_v47, 16  ;;  %v2982_v5 = vor.u32 %v6443_v60, %v8073_v36  ;;  %v8078_v22 = vshrl.u32 %v8070_v47, 16 }
 0x196   : > { %v1824_v19 = vpop.permute.xlu1 %1823  ;;  %v1822_v14 = vpop.permute.xlu0 %1821 }
 0x197   : > { %v1910_v49 = vsel %vm8064_vm6, %v1578_v39, %v1824_v19  ;;  %v2983_v58 = vrot.slane %v8071_v7, 1  ;;  %v1907_v44 = vsel %vm8072_vm2, %v1577_v6, %v1822_v14  ;;  %v8074_v39 = vld [vmem:[#allocation10_spill] sm:$0xff]  ;;  %vm8079_vm6 = vsmask.f32 7424 }
 0x198   : > { %3091 = vrot.lane.b32.xlu1 %v6304_v53, %s4801_s11  ;;  %vm8075_vm3 = vnez %v8074_v39  ;;  %v8076_v19 = vld [vmem:[#allocation14_spill] sm:$0xff]  ;;  %vm8080_vm2 = vcmask 64512   ;;  %vm8082_vm5 = vmmov %vm8079_vm6 }
 0x199   : > { %3093 = vrot.lane.b32.xlu0 %v8070_v47, %s4801_s11  ;;  %v2219_v18 = vsel %vm8075_vm3, %v6322_v41, 0  ;;  %vm8077_vm4 = vnez %v8076_v19  ;;  %v2985_v29 = vor.u32 %v2983_v58, %v8078_v22  ;;  %v2984_v14 = vsel %vm8079_vm6, %v2982_v5, %v2983_v58  ;;  %vm8083_vm6 = vmmov %vm8080_vm2 }
 0x19a   : > { %v2220_v35 = vsel %vm8077_vm4, %v2981_v33, 0  ;;  %v1870_v7 = vpop.permute.xlu0 %1869  ;;  %v6795_v60 = vpop.permute.xlu1 %1867  ;;  %v8081_v41 = vshll.u32 %v6410_v24, 16  ;;  %v3057_v33 = vsel %vm8075_vm3, %v2984_v14, 0 }
 0x19b   : > { %v6793_v6 = vsel %vm8080_vm2, %v1907_v44, %v1870_v7  ;;  %v8088_v7 = vld [vmem:[#allocation19_spill] sm:$0xff]  ;;  %vm8093_vm2 = vsmask.f32 256 }
 0x19c   : > { %2301 = vrot.lane.b32.xlu1 %v2219_v18, %s4802_s12  ;;  %v2986_v36 = vrot.slane %v8081_v41, 1  ;;  %v8086_v18 = vld [vmem:[#allocation15_spill] sm:$0xff]  ;;  %vm8089_vm3 = vnez %v8088_v7 }
 0x19d   : > { %2303 = vrot.lane.b32.xlu0 %v2220_v35, %s4802_s12  ;;  %v6858_v7 = vld [vmem:[%s7440_s3 + $0x10] sm:$0x3f]  }
 0x19e   : > { %v2987_v22 = vsel %vm8082_vm5, %v2985_v29, %v2986_v36  ;;  %v1872_v35 = vpop.permute.xlu1 %1871  ;;  %v2266_v5 = vpop.permute.xlu0 %2265  ;;  %v8085_v29 = vshrl.u32 %v6410_v24, 16  ;;  %vm8087_vm5 = vnez %v8086_v18 }
 0x19f   : > { %v6806_v58 = vsel %vm8083_vm6, %v1910_v49, %v1872_v35  ;;  %v3058_v44 = vsel %vm8077_vm4, %v2987_v22, 0  ;;  %v2221_v19 = vsel %vm8087_vm5, %v2984_v14, 0  ;;  %v2222_v41 = vsel %vm8089_vm3, %v2987_v22, 0  ;;  %v8092_v35 = vld [vmem:[#allocation27_spill] sm:$0xff]  ;;  %v8095_v22 = vld [vmem:[#allocation56_spill] sm:$0xff] }
 0x1a0   : > { %3139 = vrot.lane.b32.xlu1 %v3057_v33, %s4802_s12  ;;  %v2988_v39 = vor.u32 %v2986_v36, %v8085_v29  ;;  %vm8091_vm4 = vsmask.f32 7424  ;;  %v8094_v36 = vshll.u32 %v6415_v63, 16 }
 0x1a1   : > { %2257 = vrot.lane.b32.xlu0 %v6304_v53, %s4801_s11  ;;  %v8084_v53 = vld [vmem:[#allocation48_spill] sm:$0xff]  ;;  %vm8096_vm6 = vmmov %vm8091_vm4 }
 0x1a2   : > { %v2270_v49 = vpop.permute.xlu0 %2269  ;;  %v2992_v29 = vrot.slane %v8094_v36, 1 }
 0x1a4   : > { %3141 = vrot.lane.b32.xlu1 %v3058_v44, %s4802_s12  ;;  %v2063_v44 = vsel %vm8093_vm2, %v8023_v26, %v8092_v35  ;;  %vm8097_vm2 = vcmask 31744  }
 0x1a5   : > { %2259 = vrot.lane.b32.xlu0 %v8070_v47, %s4801_s11  ;;  %v8090_v47 = vld [vmem:[#allocation54_spill] sm:$0xff] }
 0x1a6   : > { %v2990_v33 = vsel %vm8091_vm4, %v2988_v39, %v8090_v47  ;;  %v2268_v57 = vpop.permute.xlu0 %2267  ;;  %v2209_v39 = vsel %vm8037_vm7, %v2063_v44, 0  ;;  %vm7624_vm4 = vcmask 97280  }
 0x1a7   : > { %v3059_v14 = vsel %vm8087_vm5, %v2990_v33, 0  ;;  %v2355_v26 = vsel %vm8097_vm2, %v2209_v39, %v2266_v5  ;;  %vm8100_vm5 = vmmov %vm8097_vm2 }
 0x1a8   : > { %3095 = vrot.lane.b32.xlu1 %v6410_v24, %s4801_s11 }
 0x1a9   : > { %3097 = vrot.lane.b32.xlu0 %v8084_v53, %s4801_s11 }
 0x1aa   : > { %v2274_v5 = vpop.permute.xlu0 %2273 }
 0x1ac   : > { %2305 = vrot.lane.b32.xlu1 %v2221_v19, %s4802_s12  ;;  %v2993_v19 = vsel %vm8096_vm6, %v8095_v22, %v2992_v29  ;;  %vm8107_vm6 = vmmov %vm8097_vm2 }
 0x1ad   : > { %2307 = vrot.lane.b32.xlu0 %v2222_v41, %s4802_s12  ;;  %v2314_v41 = vpop.permute.xlu1 %2313  ;;  %v3060_v18 = vsel %vm8089_vm3, %v2993_v19, 0  ;;  %vm8103_vm3 = vcmask 64512  }
 0x1ae   : > { %v2394_v47 = vsel %vm8098_vm0, %v2355_v26, %v2314_v41  ;;  %vm8102_vm0 = vcmask 1045504   ;;  %v8106_v26 = vld [vmem:[#allocation51_spill] sm:$0xff] }
 0x1af   : > { %4567 = vmatprep.mubr.msk.bf16.mxu1 %vm7624_vm4, %v2394_v47  ;;  %v2211_v41 = vsel %vm8045_vm1, %v8106_v26, 0  ;;  %vm8109_vm2 = vmmov %vm8102_vm0 }
 0x1b0   : > { %3143 = vrot.lane.b32.xlu1 %v3059_v14, %s4802_s12  ;;  %v8101_v14 = vld [vmem:[#allocation58_spill] sm:$0xff]  ;;  %v2361_v47 = vsel %vm8107_vm6, %v2211_v41, %v2270_v49  ;;  %v8117_v49 = vld [vmem:[#allocation4_spill] sm:$0xff] }
 0x1b1   : > { %2261 = vrot.lane.b32.xlu0 %v6410_v24, %s4801_s11  ;;  %v8099_v24 = vld [vmem:[#allocation52_spill] sm:$0xff]  ;;  %v2316_v36 = vpop.permute.xlu1 %2315  ;;  %v2652_v22 = vsel %vm8102_vm0, %v8101_v14, 0  ;;  %v8111_v14 = vld [vmem:[#allocation41_spill] sm:$0xff] }
 0x1b2   : > { %v2210_v35 = vsel %vm8044_vm11, %v8099_v24, 0  ;;  %v2318_v24 = vpop.permute.xlu0 %2317  ;;  %vm8112_vm0 = vnez %v8111_v14  ;;  %v8118_v41 = vld [vmem:[#allocation44_spill] sm:$0xff] }
 0x1b3   : > { %v2358_v44 = vsel %vm8100_vm5, %v2210_v35, %v2268_v57  ;;  %v8108_v35 = vshrl.u32 %v6415_v63, 16  ;;  %vm8110_vm5 = vmmov %vm8103_vm3  ;;  %vm8119_vm6 = vnez %v8118_v41 }
 0x1b4   : > { %3145 = vrot.lane.b32.xlu1 %v3060_v18, %s4802_s12  ;;  %v2396_v19 = vsel %vm8103_vm3, %v2358_v44, %v2316_v36  ;;  %v2398_v36 = vsel %vm8110_vm5, %v2361_v47, %v2318_v24  ;;  %vm8116_vm3 = vsmask.f32 7424  ;;  %v8122_v24 = vshll.u32 %v6430_v20, 16 }
 0x1b5   : > { %2263 = vrot.lane.b32.xlu0 %v8084_v53, %s4801_s11  ;;  %4568 = vmatmul.mubr.msk.bf16.vlgmr.msra.gmra.mrb[0].mxu1 %vm7624_vm4, %v2396_v19  ;;  %v8104_v53 = vld [vmem:[#allocation55_spill] sm:$0xff]  ;;  %v2272_v18 = vpop.permute.xlu1 %2271  ;;  %v2994_v44 = vor.u32 %v2992_v29, %v8108_v35  ;;  %v2223_v19 = vsel %vm8112_vm0, %v2990_v33, 0  ;;  %v2212_v29 = vsel %vm8059_vm13, %v8117_v49, 0  ;;  %v8120_v33 = vld [vmem:[#allocation26_spill] sm:$0xff] }
 0x1b6   : > { %v8105_v39 = vshll.u32 %v8104_v53, 16  ;;  %4584 = vmatpush3.bf16.msra.mxu1 %v2652_v22  ;;  %v8115_v22 = vshrl.u32 %v8104_v53, 16  ;;  %4571 = vmatprep.mubr.msk.bf16.mxu1 %vm7624_vm4, %v2398_v36  ;;  %v8121_v47 = vsel %vm8119_vm6, %v8120_v33, 0  ;;  %v8125_v33 = vld [vmem:[#allocation57_spill] sm:$0xff] }
 0x1b7   : > { %4754 = vmatprep.subr.msk.bf16.mxu1 %vm8109_vm2, %v6858_v7  ;;  %vm8123_vm2 = vcmask 31744  }
 0x1b8   : > { %3099 = vrot.lane.b32.xlu1 %v6415_v63, %s4801_s11  ;;  %v2995_v57 = vrot.slane %v8105_v39, 1  ;;  %v8113_v39 = vld [vmem:[#allocation60_spill] sm:$0xff]  ;;  %v2364_v35 = vsel %vm8123_vm2, %v2212_v29, %v2272_v18  ;;  %v2213_v18 = vsel %vm8052_vm8, %v8125_v33, 0  ;;  %vm8126_vm2 = vmmov %vm8116_vm3 }
 0x1b9   : > { %3101 = vrot.lane.b32.xlu0 %v8104_v53, %s4801_s11  ;;  %v8114_v26 = vshll.u32 %v8113_v39, 16  ;;  %v3001_v53 = vrot.slane %v8122_v24, 1  ;;  %v2320_v36 = vpop.permute.xlu1 %2319 }
 0x1ba   : > { %v2997_v25 = vor.u32 %v2995_v57, %v8115_v22  ;;  %v2996_v63 = vsel %vm8116_vm3, %v2994_v44, %v2995_v57  ;;  %v8124_v44 = vshrl.u32 %v8113_v39, 16 }
 0x1bb   : > { %v2998_v37 = vrot.slane %v8114_v26, 1  ;;  %v2278_v26 = vpop.permute.xlu0 %2277  ;;  %v3061_v57 = vsel %vm8112_vm0, %v2996_v63, 0  ;;  %vm8128_vm0 = vcmask 64512  }
 0x1bc   : > { %2309 = vrot.lane.b32.xlu1 %v2223_v19, %s4802_s12  ;;  %v2400_v19 = vsel %vm8110_vm5, %v2364_v35, %v2320_v36  ;;  %vm8127_vm5 = vcmask 31744   ;;  %v8129_v36 = vld [vmem:[#allocation11_spill] sm:$0xff] }
 0x1bd   : > { %2311 = vrot.lane.b32.xlu0 %v8121_v47, %s4802_s12  ;;  %v3000_v22 = vor.u32 %v2998_v37, %v8124_v44  ;;  %4572 = vmatmul.mubr.msk.bf16.gmra.mrb[4].mxu1 %vm7624_vm4, %v2400_v19  ;;  %v2999_v49 = vsel %vm8116_vm3, %v2997_v25, %v2998_v37  ;;  %v2367_v14 = vsel %vm8127_vm5, %v2213_v18, %v2274_v5  ;;  %v2276_v63 = vpop.permute.xlu1 %2275  ;;  %v8130_v25 = vshll.u32 %v8129_v36, 16  ;;  %v8131_v19 = vld [vmem:[#allocation28_spill] sm:$0xff] }
 0x1be   : > { %v3062_v35 = vsel %vm8119_vm6, %v2999_v49, 0  ;;  %vm8132_vm3 = vnez %v8131_v19  ;;  %v8134_v44 = vshll.u32 %v6518_v40, 16  ;;  %v8135_v33 = vshrl.u32 %v8129_v36, 16  ;;  %vm8136_vm6 = vmmov %vm8126_vm2 }
 0x1bf   : > { %v3002_v29 = vsel %vm8126_vm2, %v3000_v22, %v3001_v53  ;;  %v2322_v47 = vpop.permute.xlu0 %2321  ;;  %v3004_v37 = vrot.slane %v8130_v25, 1 }
 0x1c0   : > { %3147 = vrot.lane.b32.xlu1 %v3061_v57, %s4802_s12  ;;  %v2402_v24 = vsel %vm8128_vm0, %v2367_v14, %v2322_v47  ;;  %v8133_v57 = vshrl.u32 %v6430_v20, 16  ;;  %v3007_v22 = vrot.slane %v8134_v44, 1  ;;  %v8137_v14 = vld [vmem:[#allocation59_spill] sm:$0xff]  ;;  %v8138_v47 = vld [vmem:[#allocation13_spill] sm:$0xff]  ;;  %vm8139_vm0 = vmmov %vm8127_vm5 }
 0x1c1   : > { %3103 = vrot.lane.b32.xlu0 %v8113_v39, %s4801_s11  ;;  %4575 = vmatprep.mubr.msk.bf16.mxu1 %vm7624_vm4, %v2402_v24  ;;  %v3063_v39 = vsel %vm8132_vm3, %v3002_v29, 0  ;;  %v6926_v41 = vpop.permute.xlu1 %1827  ;;  %v3006_v18 = vor.u32 %v3004_v37, %v8135_v33  ;;  %v2214_v24 = vsel %vm6367_vm10, %v8138_v47, 0  ;;  %vm8140_vm3 = vcmask 64512   ;;  %v8144_v33 = vld [vmem:[#allocation5_spill] sm:$0xff] }
 0x1c2   : > { %v3003_v5 = vor.u32 %v3001_v53, %v8133_v57  ;;  %v2215_v53 = vsel %vm6383_vm14, %v8137_v14, 0  ;;  %v2370_v19 = vsel %vm8139_vm0, %v2214_v24, %v2276_v63  ;;  %v8145_v14 = vshll.u32 %v8144_v33, 16 }
 0x1c3   : > { %v6928_v49 = vpop.permute.xlu0 %1825  ;;  %v2373_v25 = vsel %vm8127_vm5, %v2215_v53, %v2278_v26  ;;  %vm8146_vm14 = vcmask 97280   ;;  %v8149_v63 = vshrl.u32 %v6518_v40, 16  ;;  %v8151_v53 = vshll.u32 %v6547_v61, 16 }
 0x1c4   : > { %3149 = vrot.lane.b32.xlu1 %v3062_v35, %s4802_s12  ;;  %v3005_v29 = vsel %vm8136_vm6, %v3003_v5, %v3004_v37  ;;  %v3008_v35 = vsel %vm8126_vm2, %v3006_v18, %v3007_v22  ;;  %vm8141_vm6 = vmmov %vm8140_vm3  ;;  %v8142_v5 = vld [vmem:[#allocation29_spill] sm:$0xff]  ;;  %v3010_v47 = vrot.slane %v8145_v14, 1 }
 0x1c5   : > { %3151 = vrot.lane.b32.xlu0 %v3063_v39, %s4802_s12  ;;  %vm8143_vm4 = vnez %v8142_v5  ;;  %v3009_v18 = vor.u32 %v3007_v22, %v8149_v63  ;;  %vm8150_vm5 = vmmov %vm8146_vm14  ;;  %v8157_v14 = vld [vmem:[#allocation33_spill] sm:$0xff] }
 0x1c6   : > { %v3064_v44 = vsel %vm8143_vm4, %v3005_v29, 0  ;;  %v3013_v29 = vrot.slane %v8151_v53, 1  ;;  %vm8158_vm0 = vnez %v8157_v14 }
 0x1c7   : > { %v2326_v39 = vpop.permute.xlu0 %2325 }
 0x1c8   : > { %3105 = vrot.lane.b32.xlu1 %v6430_v20, %s4801_s11  ;;  %v2324_v20 = vpop.permute.xlu1 %2323  ;;  %v2406_v57 = vsel %vm8141_vm6, %v2373_v25, %v2326_v39  ;;  %v8155_v39 = vld [vmem:[#allocation24_spill] sm:$0xff]  ;;  %vm8164_vm6 = vcmask 31744  }
 0x1c9   : > { %3107 = vrot.lane.b32.xlu0 %v8129_v36, %s4801_s11  ;;  %v2404_v37 = vsel %vm8140_vm3, %v2370_v19, %v2324_v20  ;;  %v8147_v36 = vld [vmem:[#allocation31_spill] sm:$0xff]  ;;  %v8152_v19 = vshrl.u32 %v8144_v33, 16  ;;  %v8163_v53 = vshrl.u32 %v8155_v39, 16 }
 0x1ca   : > { %4576 = vmatmul.mubr.msk.bf16.gmra.mrb[8].mxu1 %vm8146_vm14, %v2404_v37  ;;  %vm8148_vm2 = vnez %v8147_v36  ;;  %vm8153_vm14 = vsmask.f32 7424  ;;  %v8156_v37 = vshll.u32 %v8155_v39, 16 }
 0x1cb   : > { %v3065_v26 = vsel %vm8148_vm2, %v3008_v35, 0  ;;  %4579 = vmatprep.mubr.msk.bf16.mxu1 %vm8150_vm5, %v2406_v57  ;;  %v1874_v25 = vpop.permute.xlu0 %1873  ;;  %v3012_v20 = vor.u32 %v3010_v47, %v8152_v19  ;;  %v3011_v35 = vsel %vm8153_vm14, %v3009_v18, %v3010_v47  ;;  %vm8154_vm4 = vmmov %vm8153_vm14  ;;  %v8161_v47 = vshrl.u32 %v6547_v61, 16  ;;  %v8162_v18 = vld [vmem:[#allocation38_spill] sm:$0xff] }
 0x1cc   : > { %3153 = vrot.lane.b32.xlu1 %v3064_v44, %s4802_s12  ;;  %v2280_v24 = vpop.permute.xlu1 %2279  ;;  %v3016_v57 = vrot.slane %v8156_v37, 1  ;;  %v3066_v36 = vsel %vm8158_vm0, %v3011_v35, 0  ;;  %vm8165_vm2 = vcmask 64512   ;;  %vm8166_vm14 = vmmov %vm8154_vm4 }
 0x1cd   : > { %3155 = vrot.lane.b32.xlu0 %v3065_v26, %s4802_s12  ;;  %v3014_v22 = vsel %vm8154_vm4, %v3012_v20, %v3013_v29  ;;  %v8159_v26 = vld [vmem:[#allocation35_spill] sm:$0xff]  ;;  %v3015_v63 = vor.u32 %v3013_v29, %v8161_v47  ;;  %vm8167_vm4 = vmmov %vm8150_vm5  ;;  %v8171_v47 = vld [vmem:[#allocation40_spill] sm:$0xff] }
 0x1ce   : > { %vm8160_vm3 = vnez %v8159_v26  ;;  %v3018_v19 = vor.u32 %v3016_v57, %v8163_v53  ;;  %vm8168_vm0 = vmmov %vm8166_vm14  ;;  %v8169_v26 = vld [vmem:[#allocation39_spill] sm:$0xff]  ;;  %v8179_v53 = vld [vmem:[#allocation36_spill] sm:$0xff] }
 0x1cf   : > { %v1830_v44 = vpop.permute.xlu0 %1829  ;;  %v3017_v29 = vsel %vm8166_vm14, %v3015_v63, %v3016_v57  ;;  %vm8175_vm14 = vmmov %vm8167_vm4 }
 0x1d0   : > { %3109 = vrot.lane.b32.xlu1 %v6518_v40, %s4801_s11  ;;  %v1876_v5 = vpop.permute.xlu1 %1875  ;;  %v3067_v40 = vsel %vm8160_vm3, %v3014_v22, 0  ;;  %vm8170_vm3 = vnez %v8169_v26 }
 0x1d1   : > { %3111 = vrot.lane.b32.xlu0 %v8144_v33, %s4801_s11  ;;  %v2216_v33 = vsel %vm6390_vm9, %v8162_v18, 0 }
 0x1d2   : > { %v2376_v20 = vsel %vm8164_vm6, %v2216_v33, %v2280_v24  ;;  %v3020_v24 = vsel %vm8168_vm0, %v3018_v19, %v6472_v62  ;;  %vm8172_vm6 = vnez %v8171_v47 }
 0x1d3   : > { %v1878_v37 = vpop.permute.xlu0 %1877 }
 0x1d4   : > { %3157 = vrot.lane.b32.xlu1 %v3066_v36, %s4802_s12  ;;  %v2328_v35 = vpop.permute.xlu1 %2327 }
 0x1d5   : > { %3159 = vrot.lane.b32.xlu0 %v3067_v40, %s4802_s12  ;;  %v2408_v14 = vsel %vm8165_vm2, %v2376_v20, %v2328_v35  ;;  %v3068_v40 = vsel %vm8170_vm3, %v3017_v29, 0  ;;  %vm8173_vm2 = vcmask 1045504   ;;  %vm8177_vm3 = vmmov %vm8167_vm4 }
 0x1d6   : > { %4580 = vmatmul.mubr.msk.bf16.gmra.mrb[12].mxu1 %vm8150_vm5, %v2408_v14  ;;  %vm8174_vm5 = vcmask 64512  }
 0x1d7   : > { %4585 = vmatprep.mubr.msk.bf16.mxu1 %vm8167_vm4, %v6684_v42  ;;  %v1834_v36 = vpop.permute.xlu0 %1833  ;;  %v3288_v42 = vsel %vm8173_vm2, %v6858_v7, 0  ;;  %v1945_v62 = vsel %vm8174_vm5, %v6562_v51, %v6753_v46  ;;  %vm8176_vm0 = vmmov %vm8174_vm5  ;;  %vm8180_vm2 = vcmask 31744  }
 0x1d8   : > { %3113 = vrot.lane.b32.xlu1 %v6547_v61, %s4801_s11  ;;  %v1832_v22 = vpop.permute.xlu1 %1831  ;;  %v3069_v61 = vsel %vm8172_vm6, %v3020_v24, 0  ;;  %v1949_v51 = vsel %vm8176_vm0, %v6662_v15, %v6795_v60  ;;  %vm8178_vm6 = vmmov %vm8177_vm3  ;;  %v8184_v60 = vld [vmem:[#allocation3_spill] sm:$0xff]  ;;  %v8186_v24 = vld [vmem:[#allocation32_spill] sm:$0xff] }
 0x1d9   : > { %3115 = vrot.lane.b32.xlu0 %v8155_v39, %s4801_s11  ;;  %vm8181_vm5 = vmmov %vm8176_vm0  ;;  %v8185_v14 = vshll.u32 %v8184_v60, 16  ;;  %vm8187_vm0 = vnez %v7993_v17 }
 0x1da   : > { %v1580_v26 = vsel %vm8187_vm0, %v8186_v24, 0 }
 0x1db   : > { %v1882_v39 = vpop.permute.xlu0 %1881  ;;  %v1999_v29 = vor.u32 %v8185_v14, %v8000_v34 }
 0x1dc   : > { %3161 = vrot.lane.b32.xlu1 %v3068_v40, %s4802_s12  ;;  %v1880_v57 = vpop.permute.xlu1 %1879 }
 0x1dd   : > { %3163 = vrot.lane.b32.xlu0 %v3069_v61, %s4802_s12 }
 0x1de   : > { %4586 = vmatmul.mubr.msk.bf16.vlgmr.msra.gmra.mrb[16].mxu1 %vm8175_vm14, %v1945_v62  ;;  %vm8182_vm14 = vmmov %vm8177_vm3 }
 0x1df   : > { %4618 = vmatpush3.bf16.msra.mxu1 %v3288_v42  ;;  %4589 = vmatprep.mubr.msk.bf16.mxu1 %vm8167_vm4, %v6763_v45  ;;  %v1838_v18 = vpop.permute.xlu0 %1837  ;;  %v1579_v45 = vsel %vm6541_vm15, %v8179_v53, 0  ;;  %vm8183_vm4 = vmmov %vm8177_vm3 }
 0x1e0   : > { %3117 = vrot.lane.b32.xlu1 %v6426_v52, %s4801_s11  ;;  %v1836_v63 = vpop.permute.xlu1 %1835  ;;  %vm8193_vm0 = vmmov %vm8183_vm4 }
 0x1e3   : > { %v1886_v7 = vpop.permute.xlu0 %1885 }
 0x1e4   : > { %3165 = vrot.lane.b32.xlu1 %v6568_v55, %s4802_s12  ;;  %v1884_v33 = vpop.permute.xlu1 %1883  ;;  %v1913_v55 = vsel %vm8180_vm2, %v1579_v45, %v6928_v49 }
 0x1e5   : > { %v1955_v35 = vsel %vm8181_vm5, %v1913_v55, %v1874_v25 }
 0x1e6   : > { %4590 = vmatmul.mubr.msk.bf16.gmra.mrb[20].mxu1 %vm8177_vm3, %v1949_v51  ;;  %vm8188_vm3 = vmmov %vm8180_vm2 }
 0x1e7   : > { %4593 = vmatprep.mubr.msk.bf16.mxu1 %vm8178_vm6, %v6793_v6  ;;  %v1842_v46 = vpop.permute.xlu0 %1841  ;;  %v1916_v49 = vsel %vm8188_vm3, %v1580_v26, %v6926_v41  ;;  %vm8189_vm6 = vmmov %vm8181_vm5  ;;  %vm8194_vm3 = vnez %v7840_v28  ;;  %v8200_v28 = vld [vmem:[#allocation45_spill] sm:$0xff] }
 0x1e8   : > { %v1840_v52 = vpop.permute.xlu1 %1839  ;;  %v1957_v47 = vsel %vm8189_vm6, %v1916_v49, %v1876_v5  ;;  %vm8195_vm6 = vnez %v7836_v59  ;;  %v8201_v14 = vsel %vm8045_vm1, %v8200_v28, 0 }
 0x1e9   : > { %v2202_v53 = vsel %vm8195_vm6, %v6573_v43, 0 }
 0x1eb   : > { %v1890_v20 = vpop.permute.xlu0 %1889 }
 0x1ec   : > { %v1888_v19 = vpop.permute.xlu1 %1887 }
 0x1ee   : > { %4594 = vmatmul.mubr.msk.bf16.gmra.mrb[24].mxu1 %vm8182_vm14, %v6806_v58  ;;  %v8190_v58 = vld [vmem:[#allocation37_spill] sm:$0xff]  ;;  %vm8192_vm14 = vnez %v7849_v27 }
 0x1ef   : > { %4597 = vmatprep.mubr.msk.bf16.mxu1 %vm8183_vm4, %v1955_v35  ;;  %v2250_v6 = vpop.permute.xlu0 %2249  ;;  %v8191_v61 = vsel %vm8037_vm7, %v8190_v58, 0  ;;  %v2136_v34 = vsel %vm8192_vm14, 0, %v1999_v29  ;;  %vm8199_vm14 = vmmov %vm8180_vm2 }
 0x1f0   : > { %v1844_v15 = vpop.permute.xlu1 %1843  ;;  %v1919_v42 = vsel %vm8180_vm2, %v8191_v61, %v1830_v44  ;;  %v2201_v5 = vsel %vm8194_vm3, %v2136_v34, 0  ;;  %v8196_v44 = vld [vmem:[#allocation9_spill] sm:$0xff] }
 0x1f1   : > { %v1959_v62 = vsel %vm8181_vm5, %v1919_v42, %v1878_v37  ;;  %v8197_v37 = vsel %vm8044_vm11, %v8196_v44, 0  ;;  %vm8198_vm5 = vmmov %vm8180_vm2  ;;  %v8223_v44 = vld [vmem:[#allocation25_spill] sm:$0xff] }
 0x1f2   : > { %v1922_v27 = vsel %vm8180_vm2, %v8197_v37, %v1832_v22  ;;  %v2331_v45 = vsel %vm8198_vm5, %v2201_v5, %v2250_v6 }
 0x1f3   : > { %v2252_v25 = vpop.permute.xlu0 %2251 }
 0x1f4   : > { %v1892_v40 = vpop.permute.xlu1 %1891  ;;  %v2334_v55 = vsel %vm8199_vm14, %v2202_v53, %v2252_v25 }
 0x1f6   : > { %4598 = vmatmul.mubr.msk.bf16.gmra.mrb[28].mxu1 %vm8183_vm4, %v1957_v47  ;;  %vm8203_vm4 = vcmask 64512  }
 0x1f7   : > { %4601 = vmatprep.mubr.msk.bf16.mxu1 %vm8193_vm0, %v1959_v62  ;;  %v3090_v51 = vpop.permute.xlu0 %3089  ;;  %vm8202_vm0 = vmmov %vm8180_vm2  ;;  %v1961_v43 = vsel %vm8203_vm4, %v1922_v27, %v1880_v57  ;;  %vm8207_vm2 = vcmask 97280  }
 0x1f8   : > { %v3088_v41 = vpop.permute.xlu1 %3087  ;;  %v1925_v29 = vsel %vm8202_vm0, %v8201_v14, %v1834_v36  ;;  %vm8204_vm3 = vmmov %vm8203_vm4  ;;  %v8211_v36 = vsel %vm8059_vm13, %v6476_v23, 0 }
 0x1f9   : > { %vm8205_vm7 = vmmov %vm8204_vm3  ;;  %v1928_v57 = vsel %vm8202_vm0, %v8211_v36, %v1836_v63  ;;  %v2203_v63 = vsel %vm6216_vm12, %v6615_v50, 0 }
 0x1fa   : > { %vm8206_vm11 = vmmov %vm8204_vm3 }
 0x1fb   : > { %v1963_v22 = vsel %vm8206_vm11, %v1925_v29, %v1882_v39  ;;  %vm8208_vm5 = vmmov %vm8207_vm2  ;;  %v8212_v39 = vsel %vm8052_vm8, %v6491_v2, 0  ;;  %v8236_v29 = vld [vmem:[#allocation17_spill] sm:$0xff] }
 0x1fc   : > { %vm8209_vm14 = vmmov %vm8207_vm2 }
 0x1fd   : > { %vm8210_vm15 = vmmov %vm8207_vm2 }
 0x1fe   : > { %v2298_v35 = vpop.permute.xlu1 %2297  ;;  %4602 = vmatmul.mubr.msk.bf16.gmra.mrb[0].mxu1 %vm8208_vm5, %v1961_v43  ;;  %vm8213_vm11 = vmmov %vm8202_vm0 }
 0x1ff   : > { %v2300_v60 = vpop.permute.xlu0 %2299  ;;  %v2378_v24 = vsel %vm8204_vm3, %v2331_v45, %v2298_v35  ;;  %4605 = vmatprep.mubr.msk.bf16.mxu1 %vm8210_vm15, %v1963_v22  ;;  %v1931_v58 = vsel %vm8213_vm11, %v8212_v39, %v1838_v18  ;;  %vm8215_vm4 = vmmov %vm8204_vm3  ;;  %v8219_v18 = vsel %vm6367_vm10, %v6514_v21, 0  ;;  %vm8222_vm11 = vnez %v7954_v10 }
 0x200   : > { %v2380_v26 = vsel %vm8205_vm7, %v2334_v55, %v2300_v60  ;;  %4551 = vmatprep.mubr.msk.bf16.mxu0 %vm8207_vm2, %v2378_v24  ;;  %vm8214_vm7 = vmmov %vm8204_vm3  ;;  %v1967_v42 = vsel %vm8215_vm4, %v1931_v58, %v1886_v7  ;;  %v8224_v50 = vsel %vm8222_vm11, %v8223_v44, 0 }
 0x201   : > { %4552 = vmatmul.mubr.msk.bf16.vlgmr.msra.gmra.mrb[32].mxu0 %vm8209_vm14, %v2380_v26  ;;  %v1965_v61 = vsel %vm8214_vm7, %v1928_v57, %v1884_v33  ;;  %vm8216_vm15 = vmmov %vm8207_vm2 }
 0x202   : > { %v3136_v6 = vpop.permute.xlu1 %3135  ;;  %vm8217_vm3 = vmmov %vm8207_vm2  ;;  %vm8218_vm2 = vnez %v7867_v9 }
 0x203   : > { %v2254_v49 = vpop.permute.xlu0 %2253  ;;  %v2204_v2 = vsel %vm8218_vm2, %v6588_v38, 0  ;;  %vm8220_vm5 = vmmov %vm8202_vm0 }
 0x204   : > { %v1934_v33 = vsel %vm8220_vm5, %v8219_v18, %v1840_v52  ;;  %vm8221_vm14 = vmmov %vm8202_vm0  ;;  %vm8229_vm5 = vcmask 97280  }
 0x205   : > { %v2337_v7 = vsel %vm8221_vm14, %v2203_v63, %v2254_v49  ;;  %vm8225_vm7 = vmmov %vm8202_vm0  ;;  %v1969_v27 = vsel %vm8215_vm4, %v1934_v33, %v1888_v19  ;;  %v8241_v49 = vld [vmem:[#allocation16_spill] sm:$0xff] }
 0x206   : > { %v3138_v25 = vpop.permute.xlu1 %3137  ;;  %4606 = vmatmul.mubr.msk.bf16.gmra.mrb[4].mxu1 %vm8216_vm15, %v1965_v61  ;;  %v1937_v37 = vsel %vm8225_vm7, %v8224_v50, %v1842_v46  ;;  %vm8226_vm15 = vmmov %vm8215_vm4  ;;  %v8233_v46 = vld [vmem:[#allocation61_spill] sm:$0xff] }
 0x207   : > { %v2256_v47 = vpop.permute.xlu0 %2255  ;;  %4609 = vmatprep.mubr.msk.bf16.mxu1 %vm8217_vm3, %v1967_v42  ;;  %vm8227_vm3 = vmmov %vm8215_vm4  ;;  %v8234_v19 = vsel %vm6390_vm9, %v8233_v46, 0  ;;  %v8250_v42 = vsel %vm6216_vm12, %v8241_v49, 0  ;;  %v8279_v46 = vld [vmem:[#allocation20_spill] sm:$0xff] }
 0x208   : > { %v2340_v34 = vsel %vm8202_vm0, %v2204_v2, %v2256_v47  ;;  %vm8228_vm10 = vmmov %vm8227_vm3  ;;  %v1940_v60 = vsel %vm8225_vm7, %v8234_v19, %v1844_v15  ;;  %v8243_v15 = vld [vmem:[#allocation8_spill] sm:$0xff] }
 0x209   : > { %v1971_v52 = vsel %vm8228_vm10, %v1937_v37, %v1890_v20  ;;  %vm8230_vm14 = vmmov %vm8229_vm5 }
 0x20a   : > { %v3092_v62 = vpop.permute.xlu1 %3091  ;;  %vm8231_vm0 = vmmov %vm8229_vm5 }
 0x20b   : > { %v3094_v23 = vpop.permute.xlu0 %3093  ;;  %vm8232_vm8 = vmmov %vm8231_vm0 }
 0x20c   : > { %vm8235_vm4 = vmmov %vm8227_vm3 }
 0x20d   : > { %v1973_v20 = vsel %vm8235_vm4, %v1940_v60, %v1892_v40  ;;  %vm8237_vm10 = vmmov %vm8225_vm7  ;;  %v8245_v40 = vsel %vm8195_vm6, %v6588_v38, 0 }
 0x20e   : > { %v2302_v5 = vpop.permute.xlu1 %2301  ;;  %4610 = vmatmul.mubr.msk.bf16.gmra.mrb[8].mxu1 %vm8230_vm14, %v1969_v27  ;;  %v3169_v43 = vsel %vm8237_vm10, %v8236_v29, %v3088_v41  ;;  %vm8244_vm14 = vnez %v7982_v4 }
 0x20f   : > { %v2304_v53 = vpop.permute.xlu0 %2303  ;;  %v2382_v45 = vsel %vm8226_vm15, %v2337_v7, %v2302_v5  ;;  %4613 = vmatprep.mubr.msk.bf16.mxu1 %vm8232_vm8, %v1971_v52  ;;  %vm8238_vm15 = vmmov %vm8227_vm3  ;;  %v2206_v57 = vsel %vm8244_vm14, %v8243_v15, 0 }
 0x210   : > { %v2384_v21 = vsel %vm8227_vm3, %v2340_v34, %v2304_v53  ;;  %4555 = vmatprep.mubr.msk.bf16.mxu0 %vm8229_vm5, %v2382_v45  ;;  %v3216_v24 = vsel %vm8238_vm15, %v3169_v43, %v3136_v6  ;;  %vm8239_vm3 = vmmov %vm8231_vm0  ;;  %vm8242_vm5 = vnez %v7985_v48  ;;  %v8267_v48 = vld [vmem:[#allocation21_spill] sm:$0xff] }
 0x211   : > { %4556 = vmatmul.mubr.msk.bf16.gmra.mrb[36].mxu0 %vm8231_vm0, %v2384_v21  ;;  %vm8240_vm8 = vmmov %vm8231_vm0  ;;  %v2205_v36 = vsel %vm8242_vm5, %v8241_v49, 0  ;;  %v8262_v7 = vsel %vm8242_vm5, %v6632_v31, 0  ;;  %v8268_v50 = vsel %vm8244_vm14, %v8267_v48, 0 }
 0x212   : > { %v3140_v55 = vpop.permute.xlu1 %3139  ;;  %vm8246_vm0 = vmmov %vm8225_vm7 }
 0x213   : > { %v2258_v35 = vpop.permute.xlu0 %2257  ;;  %v3172_v41 = vsel %vm8246_vm0, %v8245_v40, %v3090_v51  ;;  %vm8247_vm7 = vmmov %vm8246_vm0 }
 0x214   : > { %v2343_v6 = vsel %vm8247_vm7, %v2205_v36, %v2258_v35  ;;  %vm8248_vm4 = vmmov %vm8246_vm0 }
 0x215   : > { %vm8249_vm10 = vmmov %vm8238_vm15 }
 0x216   : > { %v3142_v28 = vpop.permute.xlu1 %3141  ;;  %4614 = vmatmul.mubr.msk.bf16.gmra.mrb[12].mxu1 %vm8239_vm3, %v1973_v20  ;;  %v3218_v61 = vsel %vm8249_vm10, %v3172_v41, %v3138_v25  ;;  %vm8251_vm15 = vmmov %vm8246_vm0  ;;  %vm8255_vm0 = vcmask 97280  }
 0x217   : > { %v2260_v14 = vpop.permute.xlu0 %2259  ;;  %4619 = vmatprep.mubr.msk.bf16.mxu1 %vm8240_vm8, %v3216_v24  ;;  %v3175_v63 = vsel %vm8251_vm15, %v8250_v42, %v3092_v62  ;;  %vm8252_vm3 = vmmov %vm8249_vm10  ;;  %v8259_v62 = vsel %vm8218_vm2, %v8243_v15, 0  ;;  %vm8266_vm2 = vnez %v7996_v0 }
 0x218   : > { %v2346_v47 = vsel %vm8248_vm4, %v2206_v57, %v2260_v14  ;;  %vm8253_vm8 = vmmov %vm8252_vm3  ;;  %v8280_v19 = vsel %vm8266_vm2, %v8279_v46, 0  ;;  %v8296_v57 = vld [vmem:[#allocation50_spill] sm:$0xff] }
 0x219   : > { %vm8254_vm6 = vmmov %vm8252_vm3  ;;  %v8297_v40 = vsel %vm8045_vm1, %v8296_v57, 0  ;;  %vm8305_vm1 = vnez %v7945_v11 }
 0x21a   : > { %v3096_v26 = vpop.permute.xlu1 %3095  ;;  %v3220_v51 = vsel %vm8254_vm6, %v3175_v63, %v3140_v55  ;;  %vm8256_vm7 = vmmov %vm8255_vm0  ;;  %v8306_v63 = vld [vmem:[#allocation53_spill] sm:$0xff] }
 0x21b   : > { %v3098_v22 = vpop.permute.xlu0 %3097  ;;  %vm8257_vm4 = vmmov %vm8255_vm0 }
 0x21c   : > { %vm8258_vm9 = vmmov %vm8255_vm0 }
 0x21d   : > { %vm8260_vm12 = vmmov %vm8251_vm15 }
 0x21e   : > { %v2306_v39 = vpop.permute.xlu1 %2305  ;;  %4620 = vmatmul.mubr.msk.bf16.vlgmr.msra.gmra.mrb[16].mxu1 %vm8256_vm7, %v3218_v61  ;;  %v3178_v2 = vsel %vm8260_vm12, %v8259_v62, %v3094_v23  ;;  %vm8261_vm10 = vmmov %vm8252_vm3  ;;  %v2207_v23 = vsel %vm8266_vm2, %v6632_v31, 0 }
 0x21f   : > { %v2308_v58 = vpop.permute.xlu0 %2307  ;;  %v2386_v59 = vsel %vm8252_vm3, %v2343_v6, %v2306_v39  ;;  %4623 = vmatprep.mubr.msk.bf16.mxu1 %vm8258_vm9, %v3220_v51  ;;  %v3222_v33 = vsel %vm8261_vm10, %v3178_v2, %v3142_v28  ;;  %vm8263_vm15 = vmmov %vm8260_vm12  ;;  %v8312_v2 = vld [vmem:[#allocation34_spill] sm:$0xff] }
 0x220   : > { %v2388_v38 = vsel %vm8253_vm8, %v2346_v47, %v2308_v58  ;;  %4559 = vmatprep.mubr.msk.bf16.mxu0 %vm8255_vm0, %v2386_v59  ;;  %v3181_v34 = vsel %vm8263_vm15, %v8262_v7, %v3096_v26  ;;  %vm8264_vm9 = vmmov %vm8255_vm0  ;;  %v8302_v58 = vld [vmem:[#allocation23_spill] sm:$0xff]  ;;  %v8307_v59 = vsel %vm8305_vm1, %v8306_v63, 0  ;;  %v8315_v7 = vld [vmem:[#allocation30_spill] sm:$0xff]  ;;  %vm3626_vm1 = vcmask 1041408  }
 0x221   : > { %4560 = vmatmul.mubr.msk.bf16.gmra.mrb[40].mxu0 %vm8257_vm4, %v2388_v38  ;;  %vm8265_vm8 = vmmov %vm8255_vm0  ;;  %vm8271_vm0 = vnez %v7993_v17  ;;  %v8303_v61 = vsel %vm8059_vm13, %v8302_v58, 0  ;;  %vm8311_vm13 = vnez %v7950_v12 }
 0x222   : > { %v3144_v25 = vpop.permute.xlu1 %3143  ;;  %vm8269_vm5 = vmmov %vm8260_vm12  ;;  %v2208_v45 = vsel %vm8271_vm0, %v8267_v48, 0  ;;  %v8284_v29 = vsel %vm8271_vm0, %v6648_v13, 0  ;;  %vm8293_vm0 = vnez %v7904_v8 }
 0x223   : > { %v2262_v32 = vpop.permute.xlu0 %2261  ;;  %v3224_v53 = vsel %vm8252_vm3, %v3181_v34, %v3144_v25  ;;  %v3184_v37 = vsel %vm8269_vm5, %v8268_v50, %v3098_v22  ;;  %vm8270_vm6 = vmmov %vm8269_vm5  ;;  %v8294_v15 = vsel %vm8293_vm0, %v6688_v56, 0  ;;  %v8316_v34 = vsel %vm8222_vm11, %v8315_v7, 0 }
 0x224   : > { %v2349_v27 = vsel %vm8270_vm6, %v2207_v23, %v2262_v32  ;;  %vm8272_vm7 = vmmov %vm8252_vm3  ;;  %v8322_v23 = vld [vmem:[#allocation12_spill] sm:$0xff] }
 0x225   : > { %vm8273_vm4 = vmmov %vm8269_vm5 }
 0x226   : > { %v3146_v18 = vpop.permute.xlu1 %3145  ;;  %4624 = vmatmul.mubr.msk.bf16.gmra.mrb[20].mxu1 %vm8264_vm9, %v3222_v33  ;;  %vm8274_vm12 = vmmov %vm8252_vm3 }
 0x227   : > { %v2264_v5 = vpop.permute.xlu0 %2263  ;;  %4627 = vmatprep.mubr.msk.bf16.mxu1 %vm8265_vm8, %v3224_v53  ;;  %v3226_v52 = vsel %vm8272_vm7, %v3184_v37, %v3146_v18  ;;  %vm8275_vm10 = vmmov %vm8252_vm3  ;;  %v8313_v18 = vsel %vm8311_vm13, %v8312_v2, 0 }
 0x228   : > { %v2352_v55 = vsel %vm8273_vm4, %v2208_v45, %v2264_v5  ;;  %vm8276_vm15 = vmmov %vm8265_vm8 }
 0x229   : > { %vm8277_vm14 = vmmov %vm8265_vm8 }
 0x22a   : > { %v3100_v9 = vpop.permute.xlu1 %3099  ;;  %vm8278_vm3 = vmmov %vm8265_vm8 }
 0x22b   : > { %v3102_v44 = vpop.permute.xlu0 %3101  ;;  %vm8281_vm9 = vmmov %vm8273_vm4 }
 0x22c   : > { %v3187_v60 = vsel %vm8281_vm9, %v8280_v19, %v3100_v9  ;;  %vm8282_vm8 = vmmov %vm8272_vm7  ;;  %vm8286_vm7 = vnez %v7878_v54 }
 0x22d   : > { %vm8283_vm5 = vmmov %vm8278_vm3  ;;  %v8287_v0 = vsel %vm8286_vm7, %v6653_v16, 0 }
 0x22e   : > { %v2310_v21 = vpop.permute.xlu1 %2309  ;;  %4628 = vmatmul.mubr.msk.bf16.gmra.mrb[24].mxu1 %vm8277_vm14, %v3226_v52  ;;  %vm8285_vm6 = vmmov %vm8273_vm4 }
 0x22f   : > { %v2390_v35 = vsel %vm8274_vm12, %v2349_v27, %v2310_v21  ;;  %v2312_v31 = vpop.permute.xlu0 %2311  ;;  %v3190_v43 = vsel %vm8285_vm6, %v8284_v29, %v3102_v44  ;;  %vm8288_vm2 = vmmov %vm8273_vm4  ;;  %v3570_v27 = vld [vmem:[%s7442_s5] sm:$0x3] }
 0x230   : > { %v2392_v4 = vsel %vm8275_vm10, %v2352_v55, %v2312_v31  ;;  %4563 = vmatprep.mubr.msk.bf16.mxu0 %vm8276_vm15, %v2390_v35  ;;  %vm8289_vm4 = vmmov %vm8282_vm8  ;;  %4755 = vmatprep.subr.msk.bf16.mxu0 %vm3626_vm1, %v3570_v27  ;;  %v3628_v45 = vsel %vm3626_vm1, %v3570_v27, 0 }
 0x231   : > { %4564 = vmatmul.mubr.msk.bf16.gmra.mrb[44].mxu0 %vm8278_vm3, %v2392_v4  ;;  %vm8290_vm12 = vmmov %vm8289_vm4 }
 0x232   : > { %v3148_v28 = vpop.permute.xlu1 %3147  ;;  %vm8291_vm10 = vmmov %vm8278_vm3  ;;  %4652 = vmatpush3.bf16.msra.mxu0 %v3628_v45 }
 0x233   : > { %v3228_v14 = vsel %vm8282_vm8, %v3187_v60, %v3148_v28  ;;  %v3104_v20 = vpop.permute.xlu0 %3103  ;;  %vm8292_vm15 = vmmov %vm8278_vm3  ;;  %v7260_v60 = vld [vmem:[%s7441_s4] ss:$0 sm:$0xff] }
 0x234   : > { %4631 = vmatprep.mubr.msk.bf16.mxu1 %vm8283_vm5, %v3228_v14  ;;  %v3193_v26 = vsel %vm8288_vm2, %v8287_v0, %v3104_v20  ;;  %vm8295_vm14 = vmmov %vm8288_vm2 }
 0x235   : > { %vm8298_vm3 = vmmov %vm8288_vm2 }
 0x236   : > { %v3150_v24 = vpop.permute.xlu1 %3149  ;;  %vm8299_vm9 = vmmov %vm8289_vm4 }
 0x237   : > { %v3230_v22 = vsel %vm8289_vm4, %v3190_v43, %v3150_v24  ;;  %v3152_v49 = vpop.permute.xlu0 %3151  ;;  %vm8300_vm8 = vmmov %vm8289_vm4 }
 0x238   : > { %v3232_v36 = vsel %vm8290_vm12, %v3193_v26, %v3152_v49  ;;  %4632 = vmatmul.mubr.msk.bf16.gmra.mrb[28].mxu1 %vm8291_vm10, %v3230_v22  ;;  %vm8301_vm6 = vmmov %vm8283_vm5 }
 0x239   : > { %4635 = vmatprep.mubr.msk.bf16.mxu1 %vm8292_vm15, %v3232_v36  ;;  %vm8304_vm7 = vmmov %vm8288_vm2 }
 0x23a   : > { %v3106_v17 = vpop.permute.xlu1 %3105  ;;  %vm8308_vm12 = vmmov %vm8289_vm4 }
 0x23b   : > { %v3108_v13 = vpop.permute.xlu0 %3107  ;;  %v3196_v54 = vsel %vm8295_vm14, %v8294_v15, %v3106_v17  ;;  %vm8309_vm10 = vmmov %vm8283_vm5 }
 0x23c   : > { %v3199_v41 = vsel %vm8298_vm3, %v8297_v40, %v3108_v13  ;;  %vm8310_vm15 = vmmov %vm8283_vm5 }
 0x23d   : > { %vm8314_vm0 = vmmov %vm8288_vm2 }
 0x23e   : > { %v3154_v16 = vpop.permute.xlu1 %3153  ;;  %vm8317_vm14 = vmmov %vm8314_vm0 }
 0x23f   : > { %v3234_v6 = vsel %vm8299_vm9, %v3196_v54, %v3154_v16  ;;  %v3156_v47 = vpop.permute.xlu0 %3155  ;;  %vm8318_vm3 = vmmov %vm8289_vm4 }
 0x240   : > { %v3236_v39 = vsel %vm8300_vm8, %v3199_v41, %v3156_v47  ;;  %4636 = vmatmul.mubr.msk.bf16.gmra.mrb[0].mxu1 %vm8283_vm5, %v3234_v6  ;;  %vm8319_vm9 = vmmov %vm8318_vm3 }
 0x241   : > { %4639 = vmatprep.mubr.msk.bf16.mxu1 %vm8301_vm6, %v3236_v39  ;;  %vm8320_vm8 = vmmov %vm8283_vm5  ;;  %vm8321_vm6 = vnez %v7957_v1 }
 0x242   : > { %v3110_v8 = vpop.permute.xlu1 %3109  ;;  %v8323_v48 = vsel %vm8321_vm6, %v8322_v23, 0  ;;  %vm8325_vm11 = vmmov %vm8318_vm3 }
 0x243   : > { %v3112_v56 = vpop.permute.xlu0 %3111  ;;  %v3202_v3 = vsel %vm8304_vm7, %v8303_v61, %v3110_v8  ;;  %vm8324_vm7 = vmmov %vm8314_vm0 }
 0x244   : > { %v3205_v38 = vsel %vm8288_vm2, %v8307_v59, %v3112_v56  ;;  %vm8326_vm2 = vmmov %vm8283_vm5 }
 0x245   : > { %vm8331_vm13 = vmmov %vm8314_vm0 }
 0x246   : > { %v3158_v42 = vpop.permute.xlu1 %3157  ;;  %vm8337_vm6 = vmmov %vm8314_vm0 }
 0x247   : > { %v3238_v51 = vsel %vm8289_vm4, %v3202_v3, %v3158_v42  ;;  %v3160_v25 = vpop.permute.xlu0 %3159  ;;  %vm8327_vm4 = vmmov %vm8314_vm0 }
 0x248   : > { %v3240_v32 = vsel %vm8308_vm12, %v3205_v38, %v3160_v25  ;;  %4640 = vmatmul.mubr.msk.bf16.gmra.mrb[4].mxu1 %vm8309_vm10, %v3238_v51  ;;  %vm8328_vm12 = vmmov %vm8314_vm0 }
 0x249   : > { %4643 = vmatprep.mubr.msk.bf16.mxu1 %vm8310_vm15, %v3240_v32  ;;  %vm8329_vm10 = vmmov %vm8314_vm0 }
 0x24a   : > { %v3114_v30 = vpop.permute.xlu1 %3113  ;;  %vm8330_vm15 = vmmov %vm8314_vm0 }
 0x24b   : > { %v3116_v62 = vpop.permute.xlu0 %3115  ;;  %v3208_v11 = vsel %vm8314_vm0, %v8313_v18, %v3114_v30  ;;  %vm8340_vm1 = vmmov %vm8314_vm0 }
 0x24c   : > { %v3211_v5 = vsel %vm8317_vm14, %v8316_v34, %v3116_v62  ;;  %vm8332_vm14 = vmmov %vm8314_vm0 }
 0x24e   : > { %v3162_v33 = vpop.permute.xlu1 %3161 }
 0x24f   : > { %v3242_v53 = vsel %vm8318_vm3, %v3208_v11, %v3162_v33  ;;  %v3164_v9 = vpop.permute.xlu0 %3163  ;;  %vm8333_vm3 = vmmov %vm8314_vm0 }
 0x250   : > { %v3244_v44 = vsel %vm8319_vm9, %v3211_v5, %v3164_v9  ;;  %4644 = vmatmul.mubr.msk.bf16.gmra.mrb[8].mxu1 %vm8320_vm8, %v3242_v53  ;;  %vm8334_vm9 = vmmov %vm8314_vm0 }
 0x251   : > { %4647 = vmatprep.mubr.msk.bf16.mxu1 %vm8283_vm5, %v3244_v44  ;;  %vm8335_vm8 = vmmov %vm8314_vm0 }
 0x252   : > { %v3118_v12 = vpop.permute.xlu1 %3117  ;;  %vm8336_vm5 = vmmov %vm8314_vm0 }
 0x253   : > { %v3214_v10 = vsel %vm8324_vm7, %v8323_v48, %v3118_v12  ;;  %vm8338_vm7 = vmmov %vm8314_vm0 }
 0x256   : > { %v3166_v50 = vpop.permute.xlu1 %3165 }
 0x257   : > { %v3246_v37 = vsel %vm8325_vm11, %v3214_v10, %v3166_v50  ;;  %vm8339_vm11 = vmmov %vm8314_vm0 }
 0x258   : > { %4648 = vmatmul.mubr.msk.bf16.gmra.mrb[12].mxu1 %vm8326_vm2, %v3246_v37  ;;  %vm8341_vm2 = vmmov %vm8314_vm0 }
 0x2d4   : > { %v4553_v21 = vpop.f32.mrb[32].mxu0 }
 0x2d5   : > { %v2487_v52 = vpop.f32.mrb[33].mxu0 }
 0x2d6   : > { %v4554_v1 = vpop.f32.mrb[34].mxu0 }
 0x2d7   : > { %v2490_v55 = vpop.f32.mrb[35].mxu0 }
 0x2e4   : > { %v4557_v35 = vpop.f32.mrb[36].mxu0 }
 0x2e5   : > { %v2503_v31 = vpop.f32.mrb[37].mxu0 }
 0x2e6   : > { %v4558_v4 = vpop.f32.mrb[38].mxu0 }
 0x2e7   : > { %v2506_v46 = vpop.f32.mrb[39].mxu0 }
 0x2f1   : > { %v4621_v19 = vpop.f32.mrb[16].mxu1 }
 0x2f2   : > { %v4687_v28 = vadd.f32 %v4621_v19, %v4553_v21  ;;  %v3324_v20 = vpop.f32.mrb[17].mxu1 }
 0x2f3   : > { %v4688_v29 = vadd.f32 %v3324_v20, %v2487_v52  ;;  %v4622_v24 = vpop.f32.mrb[18].mxu1 }
 0x2f4   : > { %v4561_v14 = vpop.f32.mrb[40].mxu0  ;;  %v3492_v0 = vadd.f32 %v4687_v28, %v7260_v60  ;;  %v4689_v26 = vadd.f32 %v4622_v24, %v4554_v1  ;;  %v3327_v49 = vpop.f32.mrb[19].mxu1 }
 0x2f5   : > { %v2519_v43 = vpop.f32.mrb[41].mxu0  ;;  %v3490_v36 = vadd.f32 %v4688_v29, %v7260_v60  ;;  %v4690_v17 = vadd.f32 %v3327_v49, %v2490_v55 }
 0x2f6   : > { %v4562_v22 = vpop.f32.mrb[42].mxu0  ;;  %v3493_v15 = vadd.f32 %v4689_v26, %v7260_v60  ;;  %v3524_v16 = vmax.f32 %v3492_v0, 0.0 }
 0x2f7   : > { %v2522_v13 = vpop.f32.mrb[43].mxu0  ;;  %v3491_v54 = vadd.f32 %v4690_v17, %v7260_v60  ;;  %v3522_v40 = vmax.f32 %v3490_v36, 0.0 }
 0x2f8   : > { %v3525_v57 = vmax.f32 %v3493_v15, 0.0 }
 0x2f9   : > { %v3523_v41 = vmax.f32 %v3491_v54, 0.0  ;;  %v4625_v6 = vpop.f32.mrb[20].mxu1 }
 0x2fa   : > { %v3555_v47 = vpack.c.bf16 %v3525_v57, %v3524_v16  ;;  %v4691_v39 = vadd.f32 %v4625_v6, %v4557_v35  ;;  %v3340_v8 = vpop.f32.mrb[21].mxu1 }
 0x2fb   : > { %v3554_v56 = vpack.c.bf16 %v3523_v41, %v3522_v40  ;;  %v4692_v58 = vadd.f32 %v3340_v8, %v2503_v31  ;;  %v4626_v61 = vpop.f32.mrb[22].mxu1 }
 0x2fc   : > { %v3496_v3 = vadd.f32 %v4691_v39, %v7260_v60  ;;  %v4693_v42 = vadd.f32 %v4626_v61, %v4558_v4  ;;  %v3343_v63 = vpop.f32.mrb[23].mxu1 }
 0x2fd   : > { %v3494_v59 = vadd.f32 %v4692_v58, %v7260_v60  ;;  %v4694_v38 = vadd.f32 %v3343_v63, %v2506_v46  ;;  %4653 = vmatprep.mubr.msk.bf16.mxu0 %vm8327_vm4, %v3554_v56  ;;  %vm4047_vm4 = vcmask 125952  }
 0x2fe   : > { %v3497_v51 = vadd.f32 %v4693_v42, %v7260_v60  ;;  %4654 = vmatmul.mubr.msk.bf16.vlgmr.msra.gmra.mrb[48].mxu0 %vm8328_vm12, %v3555_v47  ;;  %v3528_v32 = vmax.f32 %v3496_v3, 0.0 }
 0x2ff   : > { %v3495_v25 = vadd.f32 %v4694_v38, %v7260_v60  ;;  %v3526_v62 = vmax.f32 %v3494_v59, 0.0 }
 0x300   : > { %v3529_v30 = vmax.f32 %v3497_v51, 0.0 }
 0x301   : > { %v3527_v2 = vmax.f32 %v3495_v25, 0.0  ;;  %v4629_v18 = vpop.f32.mrb[24].mxu1 }
 0x302   : > { %v3557_v11 = vpack.c.bf16 %v3529_v30, %v3528_v32  ;;  %v4695_v33 = vadd.f32 %v4629_v18, %v4561_v14  ;;  %v3356_v34 = vpop.f32.mrb[25].mxu1 }
 0x303   : > { %v3556_v5 = vpack.c.bf16 %v3527_v2, %v3526_v62  ;;  %v4696_v53 = vadd.f32 %v3356_v34, %v2519_v43  ;;  %v4630_v44 = vpop.f32.mrb[26].mxu1 }
 0x304   : > { %v4565_v7 = vpop.f32.mrb[44].mxu0  ;;  %v3500_v12 = vadd.f32 %v4695_v33, %v7260_v60  ;;  %v4697_v23 = vadd.f32 %v4630_v44, %v4562_v22  ;;  %v3359_v10 = vpop.f32.mrb[27].mxu1 }
 0x305   : > { %v2535_v9 = vpop.f32.mrb[45].mxu0  ;;  %v3498_v50 = vadd.f32 %v4696_v53, %v7260_v60  ;;  %v4698_v37 = vadd.f32 %v3359_v10, %v2522_v13  ;;  %4657 = vmatprep.mubr.msk.bf16.mxu0 %vm8329_vm10, %v3556_v5 }
 0x306   : > { %v4566_v48 = vpop.f32.mrb[46].mxu0  ;;  %v3501_v45 = vadd.f32 %v4697_v23, %v7260_v60  ;;  %4658 = vmatmul.mubr.msk.bf16.gmra.mrb[52].mxu0 %vm8330_vm15, %v3557_v11  ;;  %v3532_v52 = vmax.f32 %v3500_v12, 0.0 }
 0x307   : > { %v2538_v27 = vpop.f32.mrb[47].mxu0  ;;  %v3499_v21 = vadd.f32 %v4698_v37, %v7260_v60  ;;  %v3530_v55 = vmax.f32 %v3498_v50, 0.0 }
 0x308   : > { %v3533_v1 = vmax.f32 %v3501_v45, 0.0 }
 0x309   : > { %v3531_v35 = vmax.f32 %v3499_v21, 0.0 }
 0x30a   : > { %v3559_v4 = vpack.c.bf16 %v3533_v1, %v3532_v52 }
 0x30b   : > { %v4633_v31 = vpop.f32.mrb[28].mxu1  ;;  %v3558_v28 = vpack.c.bf16 %v3531_v35, %v3530_v55 }
 0x30c   : > { %v4699_v46 = vadd.f32 %v4633_v31, %v4565_v7  ;;  %v3372_v19 = vpop.f32.mrb[29].mxu1 }
 0x30d   : > { %v4700_v14 = vadd.f32 %v3372_v19, %v2535_v9  ;;  %v4634_v20 = vpop.f32.mrb[30].mxu1  ;;  %4661 = vmatprep.mubr.msk.bf16.mxu0 %vm8331_vm13, %v3558_v28 }
 0x30e   : > { %v3504_v29 = vadd.f32 %v4699_v46, %v7260_v60  ;;  %v4701_v43 = vadd.f32 %v4634_v20, %v4566_v48  ;;  %v3375_v24 = vpop.f32.mrb[31].mxu1  ;;  %4662 = vmatmul.mubr.msk.bf16.gmra.mrb[56].mxu0 %vm8314_vm0, %v3559_v4 }
 0x30f   : > { %v3502_v0 = vadd.f32 %v4700_v14, %v7260_v60  ;;  %v4702_v26 = vadd.f32 %v3375_v24, %v2538_v27 }
 0x310   : > { %v3505_v22 = vadd.f32 %v4701_v43, %v7260_v60  ;;  %v3536_v36 = vmax.f32 %v3504_v29, 0.0 }
 0x311   : > { %v3503_v49 = vadd.f32 %v4702_v26, %v7260_v60  ;;  %v3534_v13 = vmax.f32 %v3502_v0, 0.0 }
 0x312   : > { %v3537_v17 = vmax.f32 %v3505_v22, 0.0 }
 0x313   : > { %v3535_v15 = vmax.f32 %v3503_v49, 0.0  ;;  %v4637_v54 = vpop.f32.mrb[0].mxu1  ;;  %v4415_v49 = vld [vmem:[%s4862_s8 + $0x8] sm:$0xff]  }
 0x314   : > { %v3561_v16 = vpack.c.bf16 %v3537_v17, %v3536_v36  ;;  %v3508_v57 = vadd.f32 %v4637_v54, %v7260_v60  ;;  %v3388_v40 = vpop.f32.mrb[1].mxu1  ;;  %v4352_v36 = vld [vmem:[%s4862_s8] sm:$0xff]  }
 0x315   : > { %v3560_v41 = vpack.c.bf16 %v3535_v15, %v3534_v13  ;;  %v3506_v6 = vadd.f32 %v7260_v60, %v3388_v40  ;;  %v4638_v47 = vpop.f32.mrb[2].mxu1  ;;  %v7315_v17 = vld [vmem:[%s7443_s6] ss:$0 sm:$0xff]  ;;  %v4353_v15 = vunpack.c.l.bf16 %v4352_v36 }
 0x316   : > { %v3509_v39 = vadd.f32 %v4638_v47, %v7260_v60  ;;  %v3391_v8 = vpop.f32.mrb[3].mxu1  ;;  %v3540_v58 = vmax.f32 %v3508_v57, 0.0  ;;  %v4358_v57 = vunpack.c.h.bf16 %v4415_v49 }
 0x317   : > { %v3507_v56 = vadd.f32 %v7260_v60, %v3391_v8  ;;  %4665 = vmatprep.mubr.msk.bf16.mxu0 %vm8332_vm14, %v3560_v41  ;;  %v3538_v3 = vmax.f32 %v3506_v6, 0.0  ;;  %v4354_v6 = vunpack.c.h.bf16 %v4352_v36 }
 0x318   : > { %v3541_v61 = vmax.f32 %v3509_v39, 0.0  ;;  %4666 = vmatmul.mubr.msk.bf16.gmra.mrb[60].mxu0 %vm8333_vm3, %v3561_v16 }
 0x319   : > { %v3539_v42 = vmax.f32 %v3507_v56, 0.0 }
 0x31a   : > { %v3563_v63 = vpack.c.bf16 %v3541_v61, %v3540_v58  ;;  %v4417_v61 = vld [vmem:[%s4862_s8 + $0x18] sm:$0xff]  }
 0x31b   : > { %v3562_v59 = vpack.c.bf16 %v3539_v42, %v3538_v3  ;;  %v4641_v38 = vpop.f32.mrb[4].mxu1 }
 0x31c   : > { %v3512_v51 = vadd.f32 %v4641_v38, %v7260_v60  ;;  %v3404_v25 = vpop.f32.mrb[5].mxu1 }
 0x31d   : > { %v3510_v32 = vadd.f32 %v7260_v60, %v3404_v25  ;;  %v4642_v30 = vpop.f32.mrb[6].mxu1  ;;  %4669 = vmatprep.mubr.msk.bf16.mxu0 %vm8334_vm9, %v3562_v59 }
 0x31e   : > { %v3513_v62 = vadd.f32 %v4642_v30, %v7260_v60  ;;  %v3407_v2 = vpop.f32.mrb[7].mxu1  ;;  %v3544_v11 = vmax.f32 %v3512_v51, 0.0 }
 0x31f   : > { %v3511_v18 = vadd.f32 %v7260_v60, %v3407_v2  ;;  %v3542_v7 = vmax.f32 %v3510_v32, 0.0  ;;  %v4365_v32 = vunpack.c.l.bf16 %v4417_v61 }
 0x320   : > { %v3545_v33 = vmax.f32 %v3513_v62, 0.0  ;;  %4670 = vmatmul.mubr.msk.bf16.gmra.mrb[64].mxu0 %vm8335_vm8, %v3563_v63  ;;  %v4416_v63 = vld [vmem:[%s4862_s8 + $0x10] sm:$0xff]  }
 0x321   : > { %v3543_v34 = vmax.f32 %v3511_v18, 0.0  ;;  %v4361_v18 = vunpack.c.l.bf16 %v4416_v63 }
 0x322   : > { %v3565_v5 = vpack.c.bf16 %v3545_v33, %v3544_v11 }
 0x323   : > { %v3564_v53 = vpack.c.bf16 %v3543_v34, %v3542_v7  ;;  %v4645_v9 = vpop.f32.mrb[8].mxu1  ;;  %v4366_v34 = vunpack.c.h.bf16 %v4417_v61 }
 0x324   : > { %v3516_v44 = vadd.f32 %v4645_v9, %v7260_v60  ;;  %v3420_v12 = vpop.f32.mrb[9].mxu1 }
 0x325   : > { %v3514_v23 = vadd.f32 %v7260_v60, %v3420_v12  ;;  %v4646_v48 = vpop.f32.mrb[10].mxu1  ;;  %4673 = vmatprep.mubr.msk.bf16.mxu0 %vm8336_vm5, %v3564_v53 }
 0x326   : > { %v3517_v10 = vadd.f32 %v4646_v48, %v7260_v60  ;;  %v3423_v50 = vpop.f32.mrb[11].mxu1  ;;  %v3548_v27 = vmax.f32 %v3516_v44, 0.0  ;;  %v4362_v44 = vunpack.c.h.bf16 %v4416_v63 }
 0x327   : > { %v3515_v37 = vadd.f32 %v7260_v60, %v3423_v50  ;;  %v3546_v21 = vmax.f32 %v3514_v23, 0.0 }
 0x328   : > { %v3549_v45 = vmax.f32 %v3517_v10, 0.0  ;;  %4674 = vmatmul.mubr.msk.bf16.gmra.mrb[68].mxu0 %vm8337_vm6, %v3565_v5 }
 0x329   : > { %v3547_v52 = vmax.f32 %v3515_v37, 0.0  ;;  %v4419_v37 = vld [vmem:[%s4862_s8 + $0x28] sm:$0xff]  }
 0x32a   : > { %v3567_v1 = vpack.c.bf16 %v3549_v45, %v3548_v27 }
 0x32b   : > { %v3566_v55 = vpack.c.bf16 %v3547_v52, %v3546_v21  ;;  %v4649_v35 = vpop.f32.mrb[12].mxu1  ;;  %v4418_v21 = vld [vmem:[%s4862_s8 + $0x20] sm:$0xff]  }
 0x32c   : > { %v3520_v31 = vadd.f32 %v4649_v35, %v7260_v60  ;;  %v3436_v4 = vpop.f32.mrb[13].mxu1 }
 0x32d   : > { %v3518_v46 = vadd.f32 %v7260_v60, %v3436_v4  ;;  %v4650_v19 = vpop.f32.mrb[14].mxu1  ;;  %4677 = vmatprep.mubr.msk.bf16.mxu0 %vm8338_vm7, %v3566_v55 }
 0x32e   : > { %v3521_v28 = vadd.f32 %v4650_v19, %v7260_v60  ;;  %v3439_v14 = vpop.f32.mrb[15].mxu1  ;;  %v3552_v29 = vmax.f32 %v3520_v31, 0.0  ;;  %v4373_v31 = vunpack.c.l.bf16 %v4419_v37 }
 0x32f   : > { %v3519_v20 = vadd.f32 %v7260_v60, %v3439_v14  ;;  %v3550_v24 = vmax.f32 %v3518_v46, 0.0  ;;  %v4357_v60 = vunpack.c.l.bf16 %v4415_v49 }
 0x330   : > { %v3553_v43 = vmax.f32 %v3521_v28, 0.0  ;;  %4678 = vmatmul.mubr.msk.bf16.gmra.mrb[72].mxu0 %vm8339_vm11, %v3567_v1  ;;  %v4369_v28 = vunpack.c.l.bf16 %v4418_v21 }
 0x331   : > { %v3551_v0 = vmax.f32 %v3519_v20, 0.0 }
 0x332   : > { %v3569_v26 = vpack.c.bf16 %v3553_v43, %v3552_v29  ;;  %v4374_v43 = vunpack.c.h.bf16 %v4419_v37 }
 0x333   : > { %v3568_v22 = vpack.c.bf16 %v3551_v0, %v3550_v24 }
 0x335   : > { %4681 = vmatprep.mubr.msk.bf16.mxu0 %vm8340_vm1, %v3568_v22  ;;  %v4370_v22 = vunpack.c.h.bf16 %v4418_v21 }
 0x338   : > { %4682 = vmatmul.mubr.msk.bf16.gmra.mrb[76].mxu0 %vm8341_vm2, %v3569_v26 }
 0x3d1   : > { %v4655_v13 = vpop.f32.mrb[48].mxu0 }
 0x3d2   : > { %v3673_v54 = vadd.f32 %v4655_v13, %v7315_v17  ;;  %v3664_v16 = vpop.f32.mrb[49].mxu0 }
 0x3d3   : > { %v3665_v40 = vadd.f32 %v7315_v17, %v3664_v16  ;;  %v4656_v41 = vpop.f32.mrb[50].mxu0 }
 0x3d4   : > { %v3857_v47 = vadd.f32 %v4357_v60, %v3673_v54  ;;  %v3676_v39 = vadd.f32 %v4656_v41, %v7315_v17  ;;  %v3667_v8 = vpop.f32.mrb[51].mxu0  ;;  %v4421_v54 = vld [vmem:[%s4862_s8 + $0x38] sm:$0xff]  }
 0x3d5   : > { %v3855_v56 = vadd.f32 %v4353_v15, %v3665_v40  ;;  %v3668_v58 = vadd.f32 %v7315_v17, %v3667_v8  ;;  %v4420_v40 = vld [vmem:[%s4862_s8 + $0x30] sm:$0xff]   ;;  %v4381_v8 = vunpack.c.l.bf16 %v4421_v54 }
 0x3d6   : > { %v3889_v3 = vmax.f32 %v3857_v47, 0.0  ;;  %v3858_v42 = vadd.f32 %v4358_v57, %v3676_v39 }
 0x3d7   : > { %v3887_v59 = vmax.f32 %v3855_v56, 0.0  ;;  %v3856_v38 = vadd.f32 %v4354_v6, %v3668_v58 }
 0x3d8   : > { %v4321_v51 = vpack.c.bf16 %v3889_v3, %v3889_v3  ;;  %v3890_v25 = vmax.f32 %v3858_v42, 0.0  ;;  %v4377_v3 = vunpack.c.l.bf16 %v4420_v40 }
 0x3d9   : > { %v4319_v30 = vpack.c.bf16 %v3887_v59, %v3887_v59  ;;  %v3888_v62 = vmax.f32 %v3856_v38, 0.0  ;;  %v4659_v2 = vpop.f32.mrb[52].mxu0  ;;  %v4382_v38 = vunpack.c.h.bf16 %v4421_v54 }
 0x3da   : > { %4050 = vst.msk [vmem:[%s7328_s30 + $0x8] sm:$0xf] %vm4047_vm4, %v4321_v51  ;;  %v4322_v11 = vpack.c.bf16 %v3890_v25, %v3890_v25  ;;  %v3689_v33 = vadd.f32 %v4659_v2, %v7315_v17  ;;  %v3680_v7 = vpop.f32.mrb[53].mxu0 }
 0x3db   : > { %4048 = vst.msk [vmem:[%s7328_s30] sm:$0xf] %vm4047_vm4, %v4319_v30  ;;  %v4320_v5 = vpack.c.bf16 %v3888_v62, %v3888_v62  ;;  %v3681_v53 = vadd.f32 %v7315_v17, %v3680_v7  ;;  %v4660_v9 = vpop.f32.mrb[54].mxu0  ;;  %v4378_v30 = vunpack.c.h.bf16 %v4420_v40  ;;  %v4423_v7 = vld [vmem:[%s4862_s8 + $0x48] sm:$0xff]  }
 0x3dc   : > { %4051 = vst.msk [vmem:[%s7328_s30 + $0xc] sm:$0xf] %vm4047_vm4, %v4322_v11  ;;  %v3861_v12 = vadd.f32 %v4365_v32, %v3689_v33  ;;  %v3692_v23 = vadd.f32 %v4660_v9, %v7315_v17  ;;  %v3683_v48 = vpop.f32.mrb[55].mxu0 }
 0x3dd   : > { %4049 = vst.msk [vmem:[%s7328_s30 + $0x4] sm:$0xf] %vm4047_vm4, %v4320_v5  ;;  %v3859_v10 = vadd.f32 %v4361_v18, %v3681_v53  ;;  %v3684_v50 = vadd.f32 %v7315_v17, %v3683_v48  ;;  %v4422_v53 = vld [vmem:[%s4862_s8 + $0x40] sm:$0xff]   ;;  %v4389_v48 = vunpack.c.l.bf16 %v4423_v7 }
 0x3de   : > { %v3893_v27 = vmax.f32 %v3861_v12, 0.0  ;;  %v3862_v45 = vadd.f32 %v4366_v34, %v3692_v23 }
 0x3df   : > { %v3891_v52 = vmax.f32 %v3859_v10, 0.0  ;;  %v3860_v1 = vadd.f32 %v4362_v44, %v3684_v50 }
 0x3e0   : > { %v4325_v55 = vpack.c.bf16 %v3893_v27, %v3893_v27  ;;  %v3894_v35 = vmax.f32 %v3862_v45, 0.0  ;;  %v4385_v27 = vunpack.c.l.bf16 %v4422_v53 }
 0x3e1   : > { %v4323_v4 = vpack.c.bf16 %v3891_v52, %v3891_v52  ;;  %v3892_v46 = vmax.f32 %v3860_v1, 0.0  ;;  %v4663_v19 = vpop.f32.mrb[56].mxu0  ;;  %v4390_v1 = vunpack.c.h.bf16 %v4423_v7 }
 0x3e2   : > { %4054 = vst.msk [vmem:[%s7328_s30 + $0x18] sm:$0xf] %vm4047_vm4, %v4325_v55  ;;  %v4326_v14 = vpack.c.bf16 %v3894_v35, %v3894_v35  ;;  %v3705_v20 = vadd.f32 %v4663_v19, %v7315_v17  ;;  %v3696_v29 = vpop.f32.mrb[57].mxu0 }
 0x3e3   : > { %4052 = vst.msk [vmem:[%s7328_s30 + $0x10] sm:$0xf] %vm4047_vm4, %v4323_v4  ;;  %v4324_v24 = vpack.c.bf16 %v3892_v46, %v3892_v46  ;;  %v3697_v0 = vadd.f32 %v7315_v17, %v3696_v29  ;;  %v4664_v26 = vpop.f32.mrb[58].mxu0  ;;  %v4386_v4 = vunpack.c.h.bf16 %v4422_v53  ;;  %v4425_v29 = vld [vmem:[%s4862_s8 + $0x58] sm:$0xff]  }
 0x3e4   : > { %4055 = vst.msk [vmem:[%s7328_s30 + $0x1c] sm:$0xf] %vm4047_vm4, %v4326_v14  ;;  %v3865_v49 = vadd.f32 %v4373_v31, %v3705_v20  ;;  %v3708_v36 = vadd.f32 %v4664_v26, %v7315_v17  ;;  %v3699_v60 = vpop.f32.mrb[59].mxu0 }
 0x3e5   : > { %4053 = vst.msk [vmem:[%s7328_s30 + $0x14] sm:$0xf] %vm4047_vm4, %v4324_v24  ;;  %v3863_v13 = vadd.f32 %v4369_v28, %v3697_v0  ;;  %v3700_v15 = vadd.f32 %v7315_v17, %v3699_v60  ;;  %v4424_v0 = vld [vmem:[%s4862_s8 + $0x50] sm:$0xff]   ;;  %v4397_v60 = vunpack.c.l.bf16 %v4425_v29 }
 0x3e6   : > { %v3897_v16 = vmax.f32 %v3865_v49, 0.0  ;;  %v3866_v57 = vadd.f32 %v4374_v43, %v3708_v36 }
 0x3e7   : > { %v3895_v41 = vmax.f32 %v3863_v13, 0.0  ;;  %v3864_v6 = vadd.f32 %v4370_v22, %v3700_v15 }
 0x3e8   : > { %v4329_v47 = vpack.c.bf16 %v3897_v16, %v3897_v16  ;;  %v3898_v39 = vmax.f32 %v3866_v57, 0.0  ;;  %v4393_v16 = vunpack.c.l.bf16 %v4424_v0 }
 0x3e9   : > { %v4327_v56 = vpack.c.bf16 %v3895_v41, %v3895_v41  ;;  %v3896_v58 = vmax.f32 %v3864_v6, 0.0  ;;  %v4398_v6 = vunpack.c.h.bf16 %v4425_v29 }
 0x3ea   : > { %4058 = vst.msk [vmem:[%s7328_s30 + $0x28] sm:$0xf] %vm4047_vm4, %v4329_v47  ;;  %v4330_v42 = vpack.c.bf16 %v3898_v39, %v3898_v39 }
 0x3eb   : > { %v4667_v61 = vpop.f32.mrb[60].mxu0  ;;  %4056 = vst.msk [vmem:[%s7328_s30 + $0x20] sm:$0xf] %vm4047_vm4, %v4327_v56  ;;  %v4328_v51 = vpack.c.bf16 %v3896_v58, %v3896_v58  ;;  %v4394_v56 = vunpack.c.h.bf16 %v4424_v0 }
 0x3ec   : > { %v3721_v63 = vadd.f32 %v4667_v61, %v7315_v17  ;;  %v3712_v59 = vpop.f32.mrb[61].mxu0  ;;  %4059 = vst.msk [vmem:[%s7328_s30 + $0x2c] sm:$0xf] %vm4047_vm4, %v4330_v42 }
 0x3ed   : > { %v3713_v25 = vadd.f32 %v7315_v17, %v3712_v59  ;;  %v4668_v32 = vpop.f32.mrb[62].mxu0  ;;  %4057 = vst.msk [vmem:[%s7328_s30 + $0x24] sm:$0xf] %vm4047_vm4, %v4328_v51  ;;  %v4427_v59 = vld [vmem:[%s4862_s8 + $0x68] sm:$0xff]  }
 0x3ee   : > { %v3869_v62 = vadd.f32 %v4381_v8, %v3721_v63  ;;  %v3724_v2 = vadd.f32 %v4668_v32, %v7315_v17  ;;  %v3715_v18 = vpop.f32.mrb[63].mxu0 }
 0x3ef   : > { %v3867_v11 = vadd.f32 %v4377_v3, %v3713_v25  ;;  %v3716_v33 = vadd.f32 %v7315_v17, %v3715_v18  ;;  %v4426_v25 = vld [vmem:[%s4862_s8 + $0x60] sm:$0xff]   ;;  %v4405_v18 = vunpack.c.l.bf16 %v4427_v59 }
 0x3f0   : > { %v3901_v34 = vmax.f32 %v3869_v62, 0.0  ;;  %v3870_v5 = vadd.f32 %v4382_v38, %v3724_v2 }
 0x3f1   : > { %v3899_v9 = vmax.f32 %v3867_v11, 0.0  ;;  %v3868_v44 = vadd.f32 %v4378_v30, %v3716_v33 }
 0x3f2   : > { %v4333_v12 = vpack.c.bf16 %v3901_v34, %v3901_v34  ;;  %v3902_v23 = vmax.f32 %v3870_v5, 0.0  ;;  %v4401_v34 = vunpack.c.l.bf16 %v4426_v25 }
 0x3f3   : > { %v4331_v10 = vpack.c.bf16 %v3899_v9, %v3899_v9  ;;  %v3900_v50 = vmax.f32 %v3868_v44, 0.0  ;;  %v4671_v37 = vpop.f32.mrb[64].mxu0  ;;  %v4406_v44 = vunpack.c.h.bf16 %v4427_v59 }
 0x3f4   : > { %4062 = vst.msk [vmem:[%s7328_s30 + $0x38] sm:$0xf] %vm4047_vm4, %v4333_v12  ;;  %v4334_v45 = vpack.c.bf16 %v3902_v23, %v3902_v23  ;;  %v3737_v21 = vadd.f32 %v4671_v37, %v7315_v17  ;;  %v3728_v52 = vpop.f32.mrb[65].mxu0 }
 0x3f5   : > { %4060 = vst.msk [vmem:[%s7328_s30 + $0x30] sm:$0xf] %vm4047_vm4, %v4331_v10  ;;  %v4332_v55 = vpack.c.bf16 %v3900_v50, %v3900_v50  ;;  %v3729_v35 = vadd.f32 %v7315_v17, %v3728_v52  ;;  %v4672_v31 = vpop.f32.mrb[66].mxu0  ;;  %v4402_v10 = vunpack.c.h.bf16 %v4426_v25  ;;  %v4429_v52 = vld [vmem:[%s4862_s8 + $0x78] sm:$0xff]  }
 0x3f6   : > { %4063 = vst.msk [vmem:[%s7328_s30 + $0x3c] sm:$0xf] %vm4047_vm4, %v4334_v45  ;;  %v3873_v46 = vadd.f32 %v4389_v48, %v3737_v21  ;;  %v3740_v19 = vadd.f32 %v4672_v31, %v7315_v17  ;;  %v3731_v28 = vpop.f32.mrb[67].mxu0 }
 0x3f7   : > { %4061 = vst.msk [vmem:[%s7328_s30 + $0x34] sm:$0xf] %vm4047_vm4, %v4332_v55  ;;  %v3871_v14 = vadd.f32 %v4385_v27, %v3729_v35  ;;  %v3732_v20 = vadd.f32 %v7315_v17, %v3731_v28  ;;  %v4428_v35 = vld [vmem:[%s4862_s8 + $0x70] sm:$0xff]   ;;  %v4413_v28 = vunpack.c.l.bf16 %v4429_v52 }
 0x3f8   : > { %v3905_v43 = vmax.f32 %v3873_v46, 0.0  ;;  %v3874_v24 = vadd.f32 %v4390_v1, %v3740_v19 }
 0x3f9   : > { %v3903_v26 = vmax.f32 %v3871_v14, 0.0  ;;  %v3872_v22 = vadd.f32 %v4386_v4, %v3732_v20 }
 0x3fa   : > { %v4337_v49 = vpack.c.bf16 %v3905_v43, %v3905_v43  ;;  %v3906_v36 = vmax.f32 %v3874_v24, 0.0  ;;  %v4409_v43 = vunpack.c.l.bf16 %v4428_v35 }
 0x3fb   : > { %v4335_v13 = vpack.c.bf16 %v3903_v26, %v3903_v26  ;;  %v3904_v15 = vmax.f32 %v3872_v22, 0.0  ;;  %v4675_v54 = vpop.f32.mrb[68].mxu0  ;;  %v4414_v22 = vunpack.c.h.bf16 %v4429_v52 }
 0x3fc   : > { %4066 = vst.msk [vmem:[%s7328_s30 + $0x48] sm:$0xf] %vm4047_vm4, %v4337_v49  ;;  %v4338_v57 = vpack.c.bf16 %v3906_v36, %v3906_v36  ;;  %v3753_v40 = vadd.f32 %v4675_v54, %v7315_v17  ;;  %v3744_v41 = vpop.f32.mrb[69].mxu0 }
 0x3fd   : > { %4064 = vst.msk [vmem:[%s7328_s30 + $0x40] sm:$0xf] %vm4047_vm4, %v4335_v13  ;;  %v4336_v47 = vpack.c.bf16 %v3904_v15, %v3904_v15  ;;  %v3745_v39 = vadd.f32 %v7315_v17, %v3744_v41  ;;  %v4676_v8 = vpop.f32.mrb[70].mxu0  ;;  %v4410_v13 = vunpack.c.h.bf16 %v4428_v35 }
 0x3fe   : > { %4067 = vst.msk [vmem:[%s7328_s30 + $0x4c] sm:$0xf] %vm4047_vm4, %v4338_v57  ;;  %v3877_v58 = vadd.f32 %v4397_v60, %v3753_v40  ;;  %v3756_v61 = vadd.f32 %v4676_v8, %v7315_v17  ;;  %v3747_v3 = vpop.f32.mrb[71].mxu0 }
 0x3ff   : > { %4065 = vst.msk [vmem:[%s7328_s30 + $0x44] sm:$0xf] %vm4047_vm4, %v4336_v47  ;;  %v3875_v42 = vadd.f32 %v4393_v16, %v3745_v39  ;;  %v3748_v63 = vadd.f32 %v7315_v17, %v3747_v3 }
 0x400   : > { %v3909_v38 = vmax.f32 %v3877_v58, 0.0  ;;  %v3878_v51 = vadd.f32 %v4398_v6, %v3756_v61 }
 0x401   : > { %v3907_v32 = vmax.f32 %v3875_v42, 0.0  ;;  %v3876_v30 = vadd.f32 %v4394_v56, %v3748_v63 }
 0x402   : > { %v4341_v62 = vpack.c.bf16 %v3909_v38, %v3909_v38  ;;  %v3910_v2 = vmax.f32 %v3878_v51, 0.0 }
 0x403   : > { %v4339_v11 = vpack.c.bf16 %v3907_v32, %v3907_v32  ;;  %v3908_v33 = vmax.f32 %v3876_v30, 0.0  ;;  %v4679_v7 = vpop.f32.mrb[72].mxu0 }
 0x404   : > { %4070 = vst.msk [vmem:[%s7328_s30 + $0x58] sm:$0xf] %vm4047_vm4, %v4341_v62  ;;  %v4342_v5 = vpack.c.bf16 %v3910_v2, %v3910_v2  ;;  %v3769_v53 = vadd.f32 %v4679_v7, %v7315_v17  ;;  %v3760_v9 = vpop.f32.mrb[73].mxu0 }
 0x405   : > { %4068 = vst.msk [vmem:[%s7328_s30 + $0x50] sm:$0xf] %vm4047_vm4, %v4339_v11  ;;  %v4340_v12 = vpack.c.bf16 %v3908_v33, %v3908_v33  ;;  %v3761_v23 = vadd.f32 %v7315_v17, %v3760_v9  ;;  %v4680_v48 = vpop.f32.mrb[74].mxu0 }
 0x406   : > { %4071 = vst.msk [vmem:[%s7328_s30 + $0x5c] sm:$0xf] %vm4047_vm4, %v4342_v5  ;;  %v3881_v50 = vadd.f32 %v4405_v18, %v3769_v53  ;;  %v3772_v37 = vadd.f32 %v4680_v48, %v7315_v17  ;;  %v3763_v27 = vpop.f32.mrb[75].mxu0 }
 0x407   : > { %4069 = vst.msk [vmem:[%s7328_s30 + $0x54] sm:$0xf] %vm4047_vm4, %v4340_v12  ;;  %v3879_v45 = vadd.f32 %v4401_v34, %v3761_v23  ;;  %v3764_v21 = vadd.f32 %v7315_v17, %v3763_v27 }
 0x408   : > { %v3913_v1 = vmax.f32 %v3881_v50, 0.0  ;;  %v3882_v55 = vadd.f32 %v4406_v44, %v3772_v37 }
 0x409   : > { %v3911_v31 = vmax.f32 %v3879_v45, 0.0  ;;  %v3880_v4 = vadd.f32 %v4402_v10, %v3764_v21 }
 0x40a   : > { %v4345_v46 = vpack.c.bf16 %v3913_v1, %v3913_v1  ;;  %v3914_v19 = vmax.f32 %v3882_v55, 0.0 }
 0x40b   : > { %v4343_v14 = vpack.c.bf16 %v3911_v31, %v3911_v31  ;;  %v3912_v20 = vmax.f32 %v3880_v4, 0.0  ;;  %v4683_v29 = vpop.f32.mrb[76].mxu0 }
 0x40c   : > { %4074 = vst.msk [vmem:[%s7328_s30 + $0x68] sm:$0xf] %vm4047_vm4, %v4345_v46  ;;  %v4346_v24 = vpack.c.bf16 %v3914_v19, %v3914_v19  ;;  %v3785_v0 = vadd.f32 %v4683_v29, %v7315_v17  ;;  %v3776_v26 = vpop.f32.mrb[77].mxu0 }
 0x40d   : > { %4072 = vst.msk [vmem:[%s7328_s30 + $0x60] sm:$0xf] %vm4047_vm4, %v4343_v14  ;;  %v4344_v49 = vpack.c.bf16 %v3912_v20, %v3912_v20  ;;  %v3777_v36 = vadd.f32 %v7315_v17, %v3776_v26  ;;  %v4684_v60 = vpop.f32.mrb[78].mxu0 }
 0x40e   : > { %4075 = vst.msk [vmem:[%s7328_s30 + $0x6c] sm:$0xf] %vm4047_vm4, %v4346_v24  ;;  %v3885_v15 = vadd.f32 %v4413_v28, %v3785_v0  ;;  %v3788_v54 = vadd.f32 %v4684_v60, %v7315_v17  ;;  %v3779_v16 = vpop.f32.mrb[79].mxu0 }
 0x40f   : > { %4073 = vst.msk [vmem:[%s7328_s30 + $0x64] sm:$0xf] %vm4047_vm4, %v4344_v49  ;;  %v3883_v57 = vadd.f32 %v4409_v43, %v3777_v36  ;;  %v3780_v40 = vadd.f32 %v7315_v17, %v3779_v16 }
 0x410   : > { %v3917_v41 = vmax.f32 %v3885_v15, 0.0  ;;  %v3886_v6 = vadd.f32 %v4414_v22, %v3788_v54 }
 0x411   : > { %v3915_v47 = vmax.f32 %v3883_v57, 0.0  ;;  %v3884_v39 = vadd.f32 %v4410_v13, %v3780_v40 }
 0x412   : > { %v4349_v8 = vpack.c.bf16 %v3917_v41, %v3917_v41  ;;  %v3918_v56 = vmax.f32 %v3886_v6, 0.0 }
 0x413   : > { %v4347_v58 = vpack.c.bf16 %v3915_v47, %v3915_v47  ;;  %v3916_v61 = vmax.f32 %v3884_v39, 0.0 }
 0x414   : > { %4078 = vst.msk [vmem:[%s7328_s30 + $0x78] sm:$0xf] %vm4047_vm4, %v4349_v8  ;;  %v4350_v3 = vpack.c.bf16 %v3918_v56, %v3918_v56 }
 0x415   : > { %4076 = vst.msk [vmem:[%s7328_s30 + $0x70] sm:$0xf] %vm4047_vm4, %v4347_v58  ;;  %v4348_v42 = vpack.c.bf16 %v3916_v61, %v3916_v61 }
 0x416   : > { %4079 = vst.msk [vmem:[%s7328_s30 + $0x7c] sm:$0xf] %vm4047_vm4, %v4350_v3 }
 0x417   : > { %4077 = vst.msk [vmem:[%s7328_s30 + $0x74] sm:$0xf] %vm4047_vm4, %v4348_v42 }
 0x418 PF: > { %s17_s24 = sadd.s32 1, %s4797_s24  }
 0x419   : > { %p14_p4 = scmp.ge.s32.totalorder %s17_s24, 4  }
 0x41b   :  { %16 = sbr.rel (!%p14_p4) target bundleno = 1 (0x1), region = 80 }

</bundles_post_ra>
